<compile_context>
chip_gen: v7x
topology: tpu7x:2x2x1
jax: 0.10.0
libtpu: 0.0.40
codegen_flags: <defaults>
</compile_context>

<pallas_src>
import numpy as np
import jax
import jax.numpy as jnp
from jax.experimental import pallas as pl
from jax.experimental.pallas import tpu as pltpu

BN_EPS = 1e-5


def _approx_sigmoid(x):
    # exp on the EUP + approximate reciprocal (keeps the divide off the VPU).
    return pl.reciprocal(1.0 + jnp.exp(-x), approx=True)


# ---------------------------------------------------------------------------
# Fused kernel: fc+BN+GLU, then 4x (2x nearest upsample -> conv3x3 -> BN -> GLU)
# ---------------------------------------------------------------------------
def fused_init_stage_g_kernel(x_ref, fcw_ref, fcb_ref, w_ref, b_ref, o_ref,
                              g_scr, u_scr):
    # x_ref  : (1, 1, nz)       f32   one sample's [c_code | z_code]
    # fcw_ref: (nz, 2*16*ngf)   bf16  fc weight, BN folded, columns permuted
    # fcb_ref: (1, 2*16*ngf)    f32   folded BN bias (same permutation)
    # w_ref  : (12, LC, 2*LC)   bf16  4 blocks x 3 kernel rows of banded conv
    #                                 weights (BN + W-upsample + x-pad folded)
    # b_ref  : (4, 1, 2*LC)     f32   folded BN bias per block, tiled along x
    # o_ref  : (1, 64, LC)      f32   lane-dense output row layout (x*Cout + c)
    # g_scr  : (32, LC)         f32   previous block's GLU output
    # u_scr  : (66, LC)         f32   row-upsampled + row-padded block input
    LC = o_ref.shape[2]
    nz = x_ref.shape[2]
    F = fcw_ref.shape[1] // 2

    # ---------------- fc: Linear (BN folded) + GLU ----------------
    xb = jnp.broadcast_to(x_ref[0].astype(jnp.bfloat16), (8, nz))
    y8 = jnp.dot(xb, fcw_ref[...], preferred_element_type=jnp.float32)
    yv = y8[0:1, :] + fcb_ref[...]                        # (1, 2F)
    glu0 = yv[:, :F] * _approx_sigmoid(yv[:, F:])         # (1, F) lane-dense 4x4
    for r in range(F // LC):                              # 4 seed image rows
        g_scr[pl.ds(r, 1), :] = glu0[:, r * LC:(r + 1) * LC]

    # -------- 4 x (2x nearest upsample -> conv3x3 -> BN -> GLU) --------
    n_blocks = b_ref.shape[0]
    H = 4
    for i in range(n_blocks):
        H2 = 2 * H
        # rows: nearest 2x upsample + one zero-pad row top/bottom into u_scr.
        zrow = jnp.zeros((1, LC), jnp.float32)
        u_scr[pl.ds(0, 1), :] = zrow
        u_scr[pl.ds(H2 + 1, 1), :] = zrow
        for r in range(H):
            row = g_scr[pl.ds(r, 1), :]
            u_scr[pl.ds(1 + 2 * r, 1), :] = row
            u_scr[pl.ds(2 + 2 * r, 1), :] = row
        # conv3x3: W-upsample + x-pad folded into banded weights -> 3 matmuls
        # (one per kernel row dy), K = LC, N = 2*LC ([value | gate]).
        acc = b_ref[i]                                    # (1, 2*LC) bias init
        for dy in range(3):
            lhs = u_scr[pl.ds(dy, H2), :].astype(jnp.bfloat16)
            acc = acc + jnp.dot(lhs, w_ref[3 * i + dy],
                                preferred_element_type=jnp.float32)
        glu = acc[:, :LC] * _approx_sigmoid(acc[:, LC:])  # (H2, LC) f32
        if i + 1 < n_blocks:
            g_scr[pl.ds(0, H2), :] = glu
        else:
            o_ref[0] = glu.astype(o_ref.dtype)
        H = H2


# ---------------------------------------------------------------------------
# Host-side parameter prep: synthetic params, BN folding, banded conv weights
# ---------------------------------------------------------------------------
def _make_bn(key, c):
    k1, k2, k3, k4 = jax.random.split(key, 4)
    gamma = 1.0 + 0.1 * np.asarray(jax.random.normal(k1, (c,), jnp.float32))
    beta = 0.1 * np.asarray(jax.random.normal(k2, (c,), jnp.float32))
    mean = 0.1 * np.asarray(jax.random.normal(k3, (c,), jnp.float32))
    var = 0.5 + np.asarray(jax.random.uniform(k4, (c,), jnp.float32))
    return gamma, beta, mean, var


def _fold_bn(gamma, beta, mean, var):
    scale = gamma / np.sqrt(var + BN_EPS)
    return scale, beta - mean * scale


def _banded_upfold(w_half, W):
    """Banded matrix for one GLU half of conv3x3, with the W-direction 2x
    nearest upsample and x zero-padding folded in.

    w_half: (3, 3, Cin, C) HWIO (BN scale already folded).  Returns
    (3, W*Cin, 2W*C): for kernel row dy, maps a lane-dense input row
    (x-major, channel-minor, width W) to a lane-dense output row (width 2W)."""
    _, _, cin, c = w_half.shape
    W2 = 2 * W
    out = np.zeros((3, W * cin, W2 * c), np.float32)
    for dy in range(3):
        for x2 in range(W2):
            for dx in range(3):
                xu = x2 + dx - 1                 # column in the upsampled image
                if 0 <= xu < W2:
                    xin = xu // 2                # column in the original image
                    out[dy, xin * cin:(xin + 1) * cin, x2 * c:(x2 + 1) * c] += \
                        w_half[dy, dx]
    return out


def init_params(key, ngf, ncf, z_dim):
    nz = z_dim + ncf
    F = ngf * 16              # fc GLU output features (ngf x 4 x 4)
    LC = 4 * ngf              # lanes per activation row (W*Cin, constant)
    keys = jax.random.split(key, 10)

    # fc: Linear(nz, 2F, bias=False) -> BN1d(2F) -> GLU; fold BN and permute the
    # output columns so the kernel's fc output is lane-dense NHWC (y, x*ngf+c).
    fc_w = 0.05 * np.asarray(jax.random.normal(keys[0], (nz, 2 * F), jnp.float32))
    scale, bias = _fold_bn(*_make_bn(keys[1], 2 * F))
    fc_w = fc_w * scale[None, :]
    fc_b = bias
    n = np.arange(F)
    y, x, c = n // LC, (n % LC) // ngf, n % ngf
    perm_half = c * 16 + y * 4 + x               # torch view(-1, ngf, 4, 4) order
    perm = np.concatenate([perm_half, F + perm_half])
    fc_w = fc_w[:, perm]
    fc_b = fc_b[perm]

    # 4 up blocks: conv3x3(pad=1, bias=False) -> BN2d -> GLU.
    chans = [(ngf, ngf // 2), (ngf // 2, ngf // 4),
             (ngf // 4, ngf // 8), (ngf // 8, ngf // 16)]
    w_all, b_all = [], []
    W = 4
    for i, (cin, cout) in enumerate(chans):
        w = np.asarray(jax.random.normal(keys[2 + i], (3, 3, cin, 2 * cout),
                                         jnp.float32)) * (1.0 / (9.0 * cin)) ** 0.5
        scale, bias = _fold_bn(*_make_bn(keys[6 + i], 2 * cout))
        w = w * scale[None, None, None, :]        # BN scale into conv weight
        W2 = 2 * W
        wd = np.concatenate([_banded_upfold(w[..., :cout], W),     # value half
                             _banded_upfold(w[..., cout:], W)],     # gate half
                            axis=2)                                  # (3, LC, 2LC)
        b_flat = np.concatenate([np.tile(bias[:cout], W2),
                                 np.tile(bias[cout:], W2)])          # (2LC,)
        w_all.append(wd)
        b_all.append(b_flat[None, :])
        W = W2

    return {
        "ngf": ngf,
        "lc": LC,
        "fc_w": jnp.asarray(fc_w, jnp.bfloat16),                      # (nz, 2F)
        "fc_b": jnp.asarray(fc_b, jnp.float32)[None, :],              # (1, 2F)
        "w_all": jnp.asarray(np.concatenate(w_all, 0), jnp.bfloat16), # (12,LC,2LC)
        "b_all": jnp.asarray(np.stack(b_all), jnp.float32),           # (4,1,2LC)
    }


# ---------------------------------------------------------------------------
# Forward (mirrors INIT_STAGE_G.forward) — a single pallas_call
# ---------------------------------------------------------------------------
def init_stage_g_forward(z_code, c_code, params):
    x = jnp.concatenate([c_code, z_code], axis=1)          # torch.cat((c, z), 1)
    B, nz = x.shape
    LC = params["lc"]
    ngf = params["ngf"]
    out = pl.pallas_call(
        fused_init_stage_g_kernel,
        out_shape=jax.ShapeDtypeStruct((B, 64, LC), jnp.float32),
        grid_spec=pltpu.PrefetchScalarGridSpec(
            num_scalar_prefetch=0,
            grid=(B,),
            in_specs=[
                pl.BlockSpec((1, 1, nz), lambda b: (b, 0, 0)),
                pl.BlockSpec(params["fc_w"].shape, lambda b: (0, 0)),
                pl.BlockSpec(params["fc_b"].shape, lambda b: (0, 0)),
                pl.BlockSpec(params["w_all"].shape, lambda b: (0, 0, 0)),
                pl.BlockSpec(params["b_all"].shape, lambda b: (0, 0, 0)),
            ],
            out_specs=pl.BlockSpec((1, 64, LC), lambda b: (b, 0, 0)),
            scratch_shapes=[
                pltpu.VMEM((32, LC), jnp.float32),   # previous block GLU output
                pltpu.VMEM((66, LC), jnp.float32),   # row-upsampled padded input
            ],
        ),
        compiler_params=pltpu.CompilerParams(
            dimension_semantics=("parallel",)),
    )(x.reshape(B, 1, nz), params["fc_w"], params["fc_b"],
      params["w_all"], params["b_all"])
    out = out.reshape(B, 64, 64, ngf // 16)                # NHWC
    return jnp.transpose(out, (0, 3, 1, 2))                # NCHW (B, ngf/16, 64, 64)


if __name__ == "__main__":
    NGF, NCF, Z_DIM, B = 32, 16, 16, 2                     # small shapes; out 2x64x64
    key = jax.random.PRNGKey(0)
    kz, kc, kp = jax.random.split(key, 3)
    z_code = jax.random.normal(kz, (B, Z_DIM), jnp.float32)
    c_code = jax.random.normal(kc, (B, NCF), jnp.float32)
    params = init_params(kp, NGF, NCF, Z_DIM)

    fwd = jax.jit(lambda z, c: init_stage_g_forward(z, c, params))
    out = jax.block_until_ready(fwd(z_code, c_code))

    assert out.shape == (B, NGF // 16, 64, 64), out.shape
    assert bool(jnp.all(jnp.isfinite(out)))
    print("KERNEL_OK")
</pallas_src>

<mosaic_0001>
module attributes {stable_mosaic.version = 11 : i64} {
  func.func @fused_init_stage_g_kernel(%arg0: i32, %arg1: memref<1x1x32xf32, #tpu.memory_space<vmem>>, %arg2: memref<32x1024xbf16, #tpu.memory_space<vmem>>, %arg3: memref<1x1024xf32, #tpu.memory_space<vmem>>, %arg4: memref<12x128x256xbf16, #tpu.memory_space<vmem>>, %arg5: memref<4x1x256xf32, #tpu.memory_space<vmem>>, %arg6: memref<1x64x128xf32, #tpu.memory_space<vmem>>, %arg7: memref<32x128xf32, #tpu.memory_space<vmem>>, %arg8: memref<66x128xf32, #tpu.memory_space<vmem>>) attributes {dimension_semantics = [#tpu.dimension_semantics<parallel>], iteration_bounds = array<i64: 2>, scalar_prefetch = 0 : i64, scratch_operands = 2 : i64, tpu.core_type = #tpu.core_type<tc>, window_params = [{transform_indices = @transform_0, window_bounds = array<i64: 1, 1, 32>}, {pipeline_mode = #tpu.pipeline_mode<synchronous>, transform_indices = @transform_1, window_bounds = array<i64: 32, 1024>}, {pipeline_mode = #tpu.pipeline_mode<synchronous>, transform_indices = @transform_2, window_bounds = array<i64: 1, 1024>}, {pipeline_mode = #tpu.pipeline_mode<synchronous>, transform_indices = @transform_3, window_bounds = array<i64: 12, 128, 256>}, {pipeline_mode = #tpu.pipeline_mode<synchronous>, transform_indices = @transform_4, window_bounds = array<i64: 4, 1, 256>}, {transform_indices = @transform_5, window_bounds = array<i64: 1, 64, 128>}]} {
    %c0 = arith.constant 0 : index
    %c0_0 = arith.constant 0 : index
    %c0_1 = arith.constant 0 : index
    %0 = vector.load %arg1[%c0, %c0_0, %c0_1] : memref<1x1x32xf32, #tpu.memory_space<vmem>>, vector<1x1x32xf32>
    %1 = vector.shape_cast %0 : vector<1x1x32xf32> to vector<1x32xf32>
    %2 = arith.truncf %1 : vector<1x32xf32> to vector<1x32xbf16>
    %3 = vector.shape_cast %2 : vector<1x32xbf16> to vector<1x32xbf16>
    %4 = vector.broadcast %3 : vector<1x32xbf16> to vector<8x32xbf16>
    %c0_2 = arith.constant 0 : index
    %c0_3 = arith.constant 0 : index
    %5 = vector.load %arg2[%c0_2, %c0_3] : memref<32x1024xbf16, #tpu.memory_space<vmem>>, vector<32x1024xbf16>
    %cst = arith.constant dense<0.000000e+00> : vector<8x1024xf32>
    %6 = tpu.matmul %4, %5, %cst {dimension_numbers = #tpu.dot_dimension_numbers<[1], [0], [0], [1], [0, 0, 1, 1], [], []>} : vector<8x32xbf16>, vector<32x1024xbf16>, vector<8x1024xf32> -> vector<8x1024xf32>
    %7 = vector.extract_strided_slice %6 {offsets = [0, 0], sizes = [1, 1024], strides = [1, 1]} : vector<8x1024xf32> to vector<1x1024xf32>
    %c0_4 = arith.constant 0 : index
    %c0_5 = arith.constant 0 : index
    %8 = vector.load %arg3[%c0_4, %c0_5] : memref<1x1024xf32, #tpu.memory_space<vmem>>, vector<1x1024xf32>
    %9 = arith.addf %7, %8 : vector<1x1024xf32>
    %10 = vector.extract_strided_slice %9 {offsets = [0, 0], sizes = [1, 512], strides = [1, 1]} : vector<1x1024xf32> to vector<1x512xf32>
    %11 = vector.extract_strided_slice %9 {offsets = [0, 512], sizes = [1, 512], strides = [1, 1]} : vector<1x1024xf32> to vector<1x512xf32>
    %cst_6 = arith.constant 0.000000e+00 : f32
    %12 = vector.broadcast %cst_6 : f32 to vector<1x512xf32>
    %13 = arith.subf %12, %11 : vector<1x512xf32>
    %14 = math.exp %13 : vector<1x512xf32>
    %cst_7 = arith.constant 1.000000e+00 : f32
    %15 = vector.broadcast %cst_7 : f32 to vector<1x512xf32>
    %16 = arith.addf %15, %14 : vector<1x512xf32>
    %17 = tpu.reciprocal %16 {approx = true} : vector<1x512xf32> -> vector<1x512xf32>
    %18 = arith.mulf %10, %17 : vector<1x512xf32>
    %19 = vector.extract_strided_slice %18 {offsets = [0, 0], sizes = [1, 128], strides = [1, 1]} : vector<1x512xf32> to vector<1x128xf32>
    %c0_8 = arith.constant 0 : index
    %c0_9 = arith.constant 0 : index
    %20 = vector.load %arg7[%c0_8, %c0_9] : memref<32x128xf32, #tpu.memory_space<vmem>>, vector<1x128xf32>
    tpu.vector_store %arg7[%c0_8, %c0_9], %19 {strides = array<i32>} : memref<32x128xf32, #tpu.memory_space<vmem>>, vector<1x128xf32>,
    %21 = vector.extract_strided_slice %18 {offsets = [0, 128], sizes = [1, 128], strides = [1, 1]} : vector<1x512xf32> to vector<1x128xf32>
    %c1 = arith.constant 1 : index
    %c0_10 = arith.constant 0 : index
    %22 = vector.load %arg7[%c1, %c0_10] : memref<32x128xf32, #tpu.memory_space<vmem>>, vector<1x128xf32>
    tpu.vector_store %arg7[%c1, %c0_10], %21 {strides = array<i32>} : memref<32x128xf32, #tpu.memory_space<vmem>>, vector<1x128xf32>,
    %23 = vector.extract_strided_slice %18 {offsets = [0, 256], sizes = [1, 128], strides = [1, 1]} : vector<1x512xf32> to vector<1x128xf32>
    %c2 = arith.constant 2 : index
    %c0_11 = arith.constant 0 : index
    %24 = vector.load %arg7[%c2, %c0_11] : memref<32x128xf32, #tpu.memory_space<vmem>>, vector<1x128xf32>
    tpu.vector_store %arg7[%c2, %c0_11], %23 {strides = array<i32>} : memref<32x128xf32, #tpu.memory_space<vmem>>, vector<1x128xf32>,
    %25 = vector.extract_strided_slice %18 {offsets = [0, 384], sizes = [1, 128], strides = [1, 1]} : vector<1x512xf32> to vector<1x128xf32>
    %c3 = arith.constant 3 : index
    %c0_12 = arith.constant 0 : index
    %26 = vector.load %arg7[%c3, %c0_12] : memref<32x128xf32, #tpu.memory_space<vmem>>, vector<1x128xf32>
    tpu.vector_store %arg7[%c3, %c0_12], %25 {strides = array<i32>} : memref<32x128xf32, #tpu.memory_space<vmem>>, vector<1x128xf32>,
    %cst_13 = arith.constant 0.000000e+00 : f32
    %27 = vector.broadcast %cst_13 : f32 to vector<1x128xf32>
    %c0_14 = arith.constant 0 : index
    %c0_15 = arith.constant 0 : index
    %28 = vector.load %arg8[%c0_14, %c0_15] : memref<66x128xf32, #tpu.memory_space<vmem>>, vector<1x128xf32>
    tpu.vector_store %arg8[%c0_14, %c0_15], %27 {strides = array<i32>} : memref<66x128xf32, #tpu.memory_space<vmem>>, vector<1x128xf32>,
    %c9 = arith.constant 9 : index
    %c0_16 = arith.constant 0 : index
    %29 = vector.load %arg8[%c9, %c0_16] : memref<66x128xf32, #tpu.memory_space<vmem>>, vector<1x128xf32>
    tpu.vector_store %arg8[%c9, %c0_16], %27 {strides = array<i32>} : memref<66x128xf32, #tpu.memory_space<vmem>>, vector<1x128xf32>,
    %c0_17 = arith.constant 0 : index
    %c0_18 = arith.constant 0 : index
    %30 = vector.load %arg7[%c0_17, %c0_18] : memref<32x128xf32, #tpu.memory_space<vmem>>, vector<1x128xf32>
    %c1_19 = arith.constant 1 : index
    %c0_20 = arith.constant 0 : index
    %31 = vector.load %arg8[%c1_19, %c0_20] : memref<66x128xf32, #tpu.memory_space<vmem>>, vector<1x128xf32>
    tpu.vector_store %arg8[%c1_19, %c0_20], %30 {strides = array<i32>} : memref<66x128xf32, #tpu.memory_space<vmem>>, vector<1x128xf32>,
    %c2_21 = arith.constant 2 : index
    %c0_22 = arith.constant 0 : index
    %32 = vector.load %arg8[%c2_21, %c0_22] : memref<66x128xf32, #tpu.memory_space<vmem>>, vector<1x128xf32>
    tpu.vector_store %arg8[%c2_21, %c0_22], %30 {strides = array<i32>} : memref<66x128xf32, #tpu.memory_space<vmem>>, vector<1x128xf32>,
    %c1_23 = arith.constant 1 : index
    %c0_24 = arith.constant 0 : index
    %33 = vector.load %arg7[%c1_23, %c0_24] : memref<32x128xf32, #tpu.memory_space<vmem>>, vector<1x128xf32>
    %c3_25 = arith.constant 3 : index
    %c0_26 = arith.constant 0 : index
    %34 = vector.load %arg8[%c3_25, %c0_26] : memref<66x128xf32, #tpu.memory_space<vmem>>, vector<1x128xf32>
    tpu.vector_store %arg8[%c3_25, %c0_26], %33 {strides = array<i32>} : memref<66x128xf32, #tpu.memory_space<vmem>>, vector<1x128xf32>,
    %c4 = arith.constant 4 : index
    %c0_27 = arith.constant 0 : index
    %35 = vector.load %arg8[%c4, %c0_27] : memref<66x128xf32, #tpu.memory_space<vmem>>, vector<1x128xf32>
    tpu.vector_store %arg8[%c4, %c0_27], %33 {strides = array<i32>} : memref<66x128xf32, #tpu.memory_space<vmem>>, vector<1x128xf32>,
    %c2_28 = arith.constant 2 : index
    %c0_29 = arith.constant 0 : index
    %36 = vector.load %arg7[%c2_28, %c0_29] : memref<32x128xf32, #tpu.memory_space<vmem>>, vector<1x128xf32>
    %c5 = arith.constant 5 : index
    %c0_30 = arith.constant 0 : index
    %37 = vector.load %arg8[%c5, %c0_30] : memref<66x128xf32, #tpu.memory_space<vmem>>, vector<1x128xf32>
    tpu.vector_store %arg8[%c5, %c0_30], %36 {strides = array<i32>} : memref<66x128xf32, #tpu.memory_space<vmem>>, vector<1x128xf32>,
    %c6 = arith.constant 6 : index
    %c0_31 = arith.constant 0 : index
    %38 = vector.load %arg8[%c6, %c0_31] : memref<66x128xf32, #tpu.memory_space<vmem>>, vector<1x128xf32>
    tpu.vector_store %arg8[%c6, %c0_31], %36 {strides = array<i32>} : memref<66x128xf32, #tpu.memory_space<vmem>>, vector<1x128xf32>,
    %c3_32 = arith.constant 3 : index
    %c0_33 = arith.constant 0 : index
    %39 = vector.load %arg7[%c3_32, %c0_33] : memref<32x128xf32, #tpu.memory_space<vmem>>, vector<1x128xf32>
    %c7 = arith.constant 7 : index
    %c0_34 = arith.constant 0 : index
    %40 = vector.load %arg8[%c7, %c0_34] : memref<66x128xf32, #tpu.memory_space<vmem>>, vector<1x128xf32>
    tpu.vector_store %arg8[%c7, %c0_34], %39 {strides = array<i32>} : memref<66x128xf32, #tpu.memory_space<vmem>>, vector<1x128xf32>,
    %c8 = arith.constant 8 : index
    %c0_35 = arith.constant 0 : index
    %41 = vector.load %arg8[%c8, %c0_35] : memref<66x128xf32, #tpu.memory_space<vmem>>, vector<1x128xf32>
    tpu.vector_store %arg8[%c8, %c0_35], %39 {strides = array<i32>} : memref<66x128xf32, #tpu.memory_space<vmem>>, vector<1x128xf32>,
    %c0_36 = arith.constant 0 : index
    %c0_37 = arith.constant 0 : index
    %c0_38 = arith.constant 0 : index
    %42 = vector.load %arg5[%c0_36, %c0_37, %c0_38] : memref<4x1x256xf32, #tpu.memory_space<vmem>>, vector<1x1x256xf32>
    %43 = vector.shape_cast %42 : vector<1x1x256xf32> to vector<1x256xf32>
    %c0_39 = arith.constant 0 : index
    %c0_40 = arith.constant 0 : index
    %44 = vector.load %arg8[%c0_39, %c0_40] : memref<66x128xf32, #tpu.memory_space<vmem>>, vector<8x128xf32>
    %45 = arith.truncf %44 : vector<8x128xf32> to vector<8x128xbf16>
    %c0_41 = arith.constant 0 : index
    %c0_42 = arith.constant 0 : index
    %c0_43 = arith.constant 0 : index
    %46 = vector.load %arg4[%c0_41, %c0_42, %c0_43] : memref<12x128x256xbf16, #tpu.memory_space<vmem>>, vector<1x128x256xbf16>
    %47 = vector.shape_cast %46 : vector<1x128x256xbf16> to vector<128x256xbf16>
    %cst_44 = arith.constant dense<0.000000e+00> : vector<8x256xf32>
    %48 = tpu.matmul %45, %47, %cst_44 {dimension_numbers = #tpu.dot_dimension_numbers<[1], [0], [0], [1], [0, 0, 1, 1], [], []>} : vector<8x128xbf16>, vector<128x256xbf16>, vector<8x256xf32> -> vector<8x256xf32>
    %49 = vector.broadcast %43 : vector<1x256xf32> to vector<8x256xf32>
    %50 = arith.addf %49, %48 : vector<8x256xf32>
    %c1_45 = arith.constant 1 : index
    %c0_46 = arith.constant 0 : index
    %51 = vector.load %arg8[%c1_45, %c0_46] : memref<66x128xf32, #tpu.memory_space<vmem>>, vector<8x128xf32>
    %52 = arith.truncf %51 : vector<8x128xf32> to vector<8x128xbf16>
    %c1_47 = arith.constant 1 : index
    %c0_48 = arith.constant 0 : index
    %c0_49 = arith.constant 0 : index
    %53 = vector.load %arg4[%c1_47, %c0_48, %c0_49] : memref<12x128x256xbf16, #tpu.memory_space<vmem>>, vector<1x128x256xbf16>
    %54 = vector.shape_cast %53 : vector<1x128x256xbf16> to vector<128x256xbf16>
    %cst_50 = arith.constant dense<0.000000e+00> : vector<8x256xf32>
    %55 = tpu.matmul %52, %54, %cst_50 {dimension_numbers = #tpu.dot_dimension_numbers<[1], [0], [0], [1], [0, 0, 1, 1], [], []>} : vector<8x128xbf16>, vector<128x256xbf16>, vector<8x256xf32> -> vector<8x256xf32>
    %56 = arith.addf %50, %55 : vector<8x256xf32>
    %c2_51 = arith.constant 2 : index
    %c0_52 = arith.constant 0 : index
    %57 = vector.load %arg8[%c2_51, %c0_52] : memref<66x128xf32, #tpu.memory_space<vmem>>, vector<8x128xf32>
    %58 = arith.truncf %57 : vector<8x128xf32> to vector<8x128xbf16>
    %c2_53 = arith.constant 2 : index
    %c0_54 = arith.constant 0 : index
    %c0_55 = arith.constant 0 : index
    %59 = vector.load %arg4[%c2_53, %c0_54, %c0_55] : memref<12x128x256xbf16, #tpu.memory_space<vmem>>, vector<1x128x256xbf16>
    %60 = vector.shape_cast %59 : vector<1x128x256xbf16> to vector<128x256xbf16>
    %cst_56 = arith.constant dense<0.000000e+00> : vector<8x256xf32>
    %61 = tpu.matmul %58, %60, %cst_56 {dimension_numbers = #tpu.dot_dimension_numbers<[1], [0], [0], [1], [0, 0, 1, 1], [], []>} : vector<8x128xbf16>, vector<128x256xbf16>, vector<8x256xf32> -> vector<8x256xf32>
    %62 = arith.addf %56, %61 : vector<8x256xf32>
    %63 = vector.extract_strided_slice %62 {offsets = [0, 0], sizes = [8, 128], strides = [1, 1]} : vector<8x256xf32> to vector<8x128xf32>
    %64 = vector.extract_strided_slice %62 {offsets = [0, 128], sizes = [8, 128], strides = [1, 1]} : vector<8x256xf32> to vector<8x128xf32>
    %cst_57 = arith.constant 0.000000e+00 : f32
    %65 = vector.broadcast %cst_57 : f32 to vector<8x128xf32>
    %66 = arith.subf %65, %64 : vector<8x128xf32>
    %67 = math.exp %66 : vector<8x128xf32>
    %cst_58 = arith.constant 1.000000e+00 : f32
    %68 = vector.broadcast %cst_58 : f32 to vector<8x128xf32>
    %69 = arith.addf %68, %67 : vector<8x128xf32>
    %70 = tpu.reciprocal %69 {approx = true} : vector<8x128xf32> -> vector<8x128xf32>
    %71 = arith.mulf %63, %70 : vector<8x128xf32>
    %c0_59 = arith.constant 0 : index
    %c0_60 = arith.constant 0 : index
    %72 = vector.load %arg7[%c0_59, %c0_60] : memref<32x128xf32, #tpu.memory_space<vmem>>, vector<8x128xf32>
    tpu.vector_store %arg7[%c0_59, %c0_60], %71 {strides = array<i32>} : memref<32x128xf32, #tpu.memory_space<vmem>>, vector<8x128xf32>,
    %cst_61 = arith.constant 0.000000e+00 : f32
    %73 = vector.broadcast %cst_61 : f32 to vector<1x128xf32>
    %c0_62 = arith.constant 0 : index
    %c0_63 = arith.constant 0 : index
    %74 = vector.load %arg8[%c0_62, %c0_63] : memref<66x128xf32, #tpu.memory_space<vmem>>, vector<1x128xf32>
    tpu.vector_store %arg8[%c0_62, %c0_63], %73 {strides = array<i32>} : memref<66x128xf32, #tpu.memory_space<vmem>>, vector<1x128xf32>,
    %c17 = arith.constant 17 : index
    %c0_64 = arith.constant 0 : index
    %75 = vector.load %arg8[%c17, %c0_64] : memref<66x128xf32, #tpu.memory_space<vmem>>, vector<1x128xf32>
    tpu.vector_store %arg8[%c17, %c0_64], %73 {strides = array<i32>} : memref<66x128xf32, #tpu.memory_space<vmem>>, vector<1x128xf32>,
    %c0_65 = arith.constant 0 : index
    %c0_66 = arith.constant 0 : index
    %76 = vector.load %arg7[%c0_65, %c0_66] : memref<32x128xf32, #tpu.memory_space<vmem>>, vector<1x128xf32>
    %c1_67 = arith.constant 1 : index
    %c0_68 = arith.constant 0 : index
    %77 = vector.load %arg8[%c1_67, %c0_68] : memref<66x128xf32, #tpu.memory_space<vmem>>, vector<1x128xf32>
    tpu.vector_store %arg8[%c1_67, %c0_68], %76 {strides = array<i32>} : memref<66x128xf32, #tpu.memory_space<vmem>>, vector<1x128xf32>,
    %c2_69 = arith.constant 2 : index
    %c0_70 = arith.constant 0 : index
    %78 = vector.load %arg8[%c2_69, %c0_70] : memref<66x128xf32, #tpu.memory_space<vmem>>, vector<1x128xf32>
    tpu.vector_store %arg8[%c2_69, %c0_70], %76 {strides = array<i32>} : memref<66x128xf32, #tpu.memory_space<vmem>>, vector<1x128xf32>,
    %c1_71 = arith.constant 1 : index
    %c0_72 = arith.constant 0 : index
    %79 = vector.load %arg7[%c1_71, %c0_72] : memref<32x128xf32, #tpu.memory_space<vmem>>, vector<1x128xf32>
    %c3_73 = arith.constant 3 : index
    %c0_74 = arith.constant 0 : index
    %80 = vector.load %arg8[%c3_73, %c0_74] : memref<66x128xf32, #tpu.memory_space<vmem>>, vector<1x128xf32>
    tpu.vector_store %arg8[%c3_73, %c0_74], %79 {strides = array<i32>} : memref<66x128xf32, #tpu.memory_space<vmem>>, vector<1x128xf32>,
    %c4_75 = arith.constant 4 : index
    %c0_76 = arith.constant 0 : index
    %81 = vector.load %arg8[%c4_75, %c0_76] : memref<66x128xf32, #tpu.memory_space<vmem>>, vector<1x128xf32>
    tpu.vector_store %arg8[%c4_75, %c0_76], %79 {strides = array<i32>} : memref<66x128xf32, #tpu.memory_space<vmem>>, vector<1x128xf32>,
    %c2_77 = arith.constant 2 : index
    %c0_78 = arith.constant 0 : index
    %82 = vector.load %arg7[%c2_77, %c0_78] : memref<32x128xf32, #tpu.memory_space<vmem>>, vector<1x128xf32>
    %c5_79 = arith.constant 5 : index
    %c0_80 = arith.constant 0 : index
    %83 = vector.load %arg8[%c5_79, %c0_80] : memref<66x128xf32, #tpu.memory_space<vmem>>, vector<1x128xf32>
    tpu.vector_store %arg8[%c5_79, %c0_80], %82 {strides = array<i32>} : memref<66x128xf32, #tpu.memory_space<vmem>>, vector<1x128xf32>,
    %c6_81 = arith.constant 6 : index
    %c0_82 = arith.constant 0 : index
    %84 = vector.load %arg8[%c6_81, %c0_82] : memref<66x128xf32, #tpu.memory_space<vmem>>, vector<1x128xf32>
    tpu.vector_store %arg8[%c6_81, %c0_82], %82 {strides = array<i32>} : memref<66x128xf32, #tpu.memory_space<vmem>>, vector<1x128xf32>,
    %c3_83 = arith.constant 3 : index
    %c0_84 = arith.constant 0 : index
    %85 = vector.load %arg7[%c3_83, %c0_84] : memref<32x128xf32, #tpu.memory_space<vmem>>, vector<1x128xf32>
    %c7_85 = arith.constant 7 : index
    %c0_86 = arith.constant 0 : index
    %86 = vector.load %arg8[%c7_85, %c0_86] : memref<66x128xf32, #tpu.memory_space<vmem>>, vector<1x128xf32>
    tpu.vector_store %arg8[%c7_85, %c0_86], %85 {strides = array<i32>} : memref<66x128xf32, #tpu.memory_space<vmem>>, vector<1x128xf32>,
    %c8_87 = arith.constant 8 : index
    %c0_88 = arith.constant 0 : index
    %87 = vector.load %arg8[%c8_87, %c0_88] : memref<66x128xf32, #tpu.memory_space<vmem>>, vector<1x128xf32>
    tpu.vector_store %arg8[%c8_87, %c0_88], %85 {strides = array<i32>} : memref<66x128xf32, #tpu.memory_space<vmem>>, vector<1x128xf32>,
    %c4_89 = arith.constant 4 : index
    %c0_90 = arith.constant 0 : index
    %88 = vector.load %arg7[%c4_89, %c0_90] : memref<32x128xf32, #tpu.memory_space<vmem>>, vector<1x128xf32>
    %c9_91 = arith.constant 9 : index
    %c0_92 = arith.constant 0 : index
    %89 = vector.load %arg8[%c9_91, %c0_92] : memref<66x128xf32, #tpu.memory_space<vmem>>, vector<1x128xf32>
    tpu.vector_store %arg8[%c9_91, %c0_92], %88 {strides = array<i32>} : memref<66x128xf32, #tpu.memory_space<vmem>>, vector<1x128xf32>,
    %c10 = arith.constant 10 : index
    %c0_93 = arith.constant 0 : index
    %90 = vector.load %arg8[%c10, %c0_93] : memref<66x128xf32, #tpu.memory_space<vmem>>, vector<1x128xf32>
    tpu.vector_store %arg8[%c10, %c0_93], %88 {strides = array<i32>} : memref<66x128xf32, #tpu.memory_space<vmem>>, vector<1x128xf32>,
    %c5_94 = arith.constant 5 : index
    %c0_95 = arith.constant 0 : index
    %91 = vector.load %arg7[%c5_94, %c0_95] : memref<32x128xf32, #tpu.memory_space<vmem>>, vector<1x128xf32>
    %c11 = arith.constant 11 : index
    %c0_96 = arith.constant 0 : index
    %92 = vector.load %arg8[%c11, %c0_96] : memref<66x128xf32, #tpu.memory_space<vmem>>, vector<1x128xf32>
    tpu.vector_store %arg8[%c11, %c0_96], %91 {strides = array<i32>} : memref<66x128xf32, #tpu.memory_space<vmem>>, vector<1x128xf32>,
    %c12 = arith.constant 12 : index
    %c0_97 = arith.constant 0 : index
    %93 = vector.load %arg8[%c12, %c0_97] : memref<66x128xf32, #tpu.memory_space<vmem>>, vector<1x128xf32>
    tpu.vector_store %arg8[%c12, %c0_97], %91 {strides = array<i32>} : memref<66x128xf32, #tpu.memory_space<vmem>>, vector<1x128xf32>,
    %c6_98 = arith.constant 6 : index
    %c0_99 = arith.constant 0 : index
    %94 = vector.load %arg7[%c6_98, %c0_99] : memref<32x128xf32, #tpu.memory_space<vmem>>, vector<1x128xf32>
    %c13 = arith.constant 13 : index
    %c0_100 = arith.constant 0 : index
    %95 = vector.load %arg8[%c13, %c0_100] : memref<66x128xf32, #tpu.memory_space<vmem>>, vector<1x128xf32>
    tpu.vector_store %arg8[%c13, %c0_100], %94 {strides = array<i32>} : memref<66x128xf32, #tpu.memory_space<vmem>>, vector<1x128xf32>,
    %c14 = arith.constant 14 : index
    %c0_101 = arith.constant 0 : index
    %96 = vector.load %arg8[%c14, %c0_101] : memref<66x128xf32, #tpu.memory_space<vmem>>, vector<1x128xf32>
    tpu.vector_store %arg8[%c14, %c0_101], %94 {strides = array<i32>} : memref<66x128xf32, #tpu.memory_space<vmem>>, vector<1x128xf32>,
    %c7_102 = arith.constant 7 : index
    %c0_103 = arith.constant 0 : index
    %97 = vector.load %arg7[%c7_102, %c0_103] : memref<32x128xf32, #tpu.memory_space<vmem>>, vector<1x128xf32>
    %c15 = arith.constant 15 : index
    %c0_104 = arith.constant 0 : index
    %98 = vector.load %arg8[%c15, %c0_104] : memref<66x128xf32, #tpu.memory_space<vmem>>, vector<1x128xf32>
    tpu.vector_store %arg8[%c15, %c0_104], %97 {strides = array<i32>} : memref<66x128xf32, #tpu.memory_space<vmem>>, vector<1x128xf32>,
    %c16 = arith.constant 16 : index
    %c0_105 = arith.constant 0 : index
    %99 = vector.load %arg8[%c16, %c0_105] : memref<66x128xf32, #tpu.memory_space<vmem>>, vector<1x128xf32>
    tpu.vector_store %arg8[%c16, %c0_105], %97 {strides = array<i32>} : memref<66x128xf32, #tpu.memory_space<vmem>>, vector<1x128xf32>,
    %c1_106 = arith.constant 1 : index
    %c0_107 = arith.constant 0 : index
    %c0_108 = arith.constant 0 : index
    %100 = vector.load %arg5[%c1_106, %c0_107, %c0_108] : memref<4x1x256xf32, #tpu.memory_space<vmem>>, vector<1x1x256xf32>
    %101 = vector.shape_cast %100 : vector<1x1x256xf32> to vector<1x256xf32>
    %c0_109 = arith.constant 0 : index
    %c0_110 = arith.constant 0 : index
    %102 = vector.load %arg8[%c0_109, %c0_110] : memref<66x128xf32, #tpu.memory_space<vmem>>, vector<16x128xf32>
    %103 = arith.truncf %102 : vector<16x128xf32> to vector<16x128xbf16>
    %c3_111 = arith.constant 3 : index
    %c0_112 = arith.constant 0 : index
    %c0_113 = arith.constant 0 : index
    %104 = vector.load %arg4[%c3_111, %c0_112, %c0_113] : memref<12x128x256xbf16, #tpu.memory_space<vmem>>, vector<1x128x256xbf16>
    %105 = vector.shape_cast %104 : vector<1x128x256xbf16> to vector<128x256xbf16>
    %cst_114 = arith.constant dense<0.000000e+00> : vector<16x256xf32>
    %106 = tpu.matmul %103, %105, %cst_114 {dimension_numbers = #tpu.dot_dimension_numbers<[1], [0], [0], [1], [0, 0, 1, 1], [], []>} : vector<16x128xbf16>, vector<128x256xbf16>, vector<16x256xf32> -> vector<16x256xf32>
    %107 = vector.broadcast %101 : vector<1x256xf32> to vector<16x256xf32>
    %108 = arith.addf %107, %106 : vector<16x256xf32>
    %c1_115 = arith.constant 1 : index
    %c0_116 = arith.constant 0 : index
    %109 = vector.load %arg8[%c1_115, %c0_116] : memref<66x128xf32, #tpu.memory_space<vmem>>, vector<16x128xf32>
    %110 = arith.truncf %109 : vector<16x128xf32> to vector<16x128xbf16>
    %c4_117 = arith.constant 4 : index
    %c0_118 = arith.constant 0 : index
    %c0_119 = arith.constant 0 : index
    %111 = vector.load %arg4[%c4_117, %c0_118, %c0_119] : memref<12x128x256xbf16, #tpu.memory_space<vmem>>, vector<1x128x256xbf16>
    %112 = vector.shape_cast %111 : vector<1x128x256xbf16> to vector<128x256xbf16>
    %cst_120 = arith.constant dense<0.000000e+00> : vector<16x256xf32>
    %113 = tpu.matmul %110, %112, %cst_120 {dimension_numbers = #tpu.dot_dimension_numbers<[1], [0], [0], [1], [0, 0, 1, 1], [], []>} : vector<16x128xbf16>, vector<128x256xbf16>, vector<16x256xf32> -> vector<16x256xf32>
    %114 = arith.addf %108, %113 : vector<16x256xf32>
    %c2_121 = arith.constant 2 : index
    %c0_122 = arith.constant 0 : index
    %115 = vector.load %arg8[%c2_121, %c0_122] : memref<66x128xf32, #tpu.memory_space<vmem>>, vector<16x128xf32>
    %116 = arith.truncf %115 : vector<16x128xf32> to vector<16x128xbf16>
    %c5_123 = arith.constant 5 : index
    %c0_124 = arith.constant 0 : index
    %c0_125 = arith.constant 0 : index
    %117 = vector.load %arg4[%c5_123, %c0_124, %c0_125] : memref<12x128x256xbf16, #tpu.memory_space<vmem>>, vector<1x128x256xbf16>
    %118 = vector.shape_cast %117 : vector<1x128x256xbf16> to vector<128x256xbf16>
    %cst_126 = arith.constant dense<0.000000e+00> : vector<16x256xf32>
    %119 = tpu.matmul %116, %118, %cst_126 {dimension_numbers = #tpu.dot_dimension_numbers<[1], [0], [0], [1], [0, 0, 1, 1], [], []>} : vector<16x128xbf16>, vector<128x256xbf16>, vector<16x256xf32> -> vector<16x256xf32>
    %120 = arith.addf %114, %119 : vector<16x256xf32>
    %121 = vector.extract_strided_slice %120 {offsets = [0, 0], sizes = [16, 128], strides = [1, 1]} : vector<16x256xf32> to vector<16x128xf32>
    %122 = vector.extract_strided_slice %120 {offsets = [0, 128], sizes = [16, 128], strides = [1, 1]} : vector<16x256xf32> to vector<16x128xf32>
    %cst_127 = arith.constant 0.000000e+00 : f32
    %123 = vector.broadcast %cst_127 : f32 to vector<16x128xf32>
    %124 = arith.subf %123, %122 : vector<16x128xf32>
    %125 = math.exp %124 : vector<16x128xf32>
    %cst_128 = arith.constant 1.000000e+00 : f32
    %126 = vector.broadcast %cst_128 : f32 to vector<16x128xf32>
    %127 = arith.addf %126, %125 : vector<16x128xf32>
    %128 = tpu.reciprocal %127 {approx = true} : vector<16x128xf32> -> vector<16x128xf32>
    %129 = arith.mulf %121, %128 : vector<16x128xf32>
    %c0_129 = arith.constant 0 : index
    %c0_130 = arith.constant 0 : index
    %130 = vector.load %arg7[%c0_129, %c0_130] : memref<32x128xf32, #tpu.memory_space<vmem>>, vector<16x128xf32>
    tpu.vector_store %arg7[%c0_129, %c0_130], %129 {strides = array<i32>} : memref<32x128xf32, #tpu.memory_space<vmem>>, vector<16x128xf32>,
    %cst_131 = arith.constant 0.000000e+00 : f32
    %131 = vector.broadcast %cst_131 : f32 to vector<1x128xf32>
    %c0_132 = arith.constant 0 : index
    %c0_133 = arith.constant 0 : index
    %132 = vector.load %arg8[%c0_132, %c0_133] : memref<66x128xf32, #tpu.memory_space<vmem>>, vector<1x128xf32>
    tpu.vector_store %arg8[%c0_132, %c0_133], %131 {strides = array<i32>} : memref<66x128xf32, #tpu.memory_space<vmem>>, vector<1x128xf32>,
    %c33 = arith.constant 33 : index
    %c0_134 = arith.constant 0 : index
    %133 = vector.load %arg8[%c33, %c0_134] : memref<66x128xf32, #tpu.memory_space<vmem>>, vector<1x128xf32>
    tpu.vector_store %arg8[%c33, %c0_134], %131 {strides = array<i32>} : memref<66x128xf32, #tpu.memory_space<vmem>>, vector<1x128xf32>,
    %c0_135 = arith.constant 0 : index
    %c0_136 = arith.constant 0 : index
    %134 = vector.load %arg7[%c0_135, %c0_136] : memref<32x128xf32, #tpu.memory_space<vmem>>, vector<1x128xf32>
    %c1_137 = arith.constant 1 : index
    %c0_138 = arith.constant 0 : index
    %135 = vector.load %arg8[%c1_137, %c0_138] : memref<66x128xf32, #tpu.memory_space<vmem>>, vector<1x128xf32>
    tpu.vector_store %arg8[%c1_137, %c0_138], %134 {strides = array<i32>} : memref<66x128xf32, #tpu.memory_space<vmem>>, vector<1x128xf32>,
    %c2_139 = arith.constant 2 : index
    %c0_140 = arith.constant 0 : index
    %136 = vector.load %arg8[%c2_139, %c0_140] : memref<66x128xf32, #tpu.memory_space<vmem>>, vector<1x128xf32>
    tpu.vector_store %arg8[%c2_139, %c0_140], %134 {strides = array<i32>} : memref<66x128xf32, #tpu.memory_space<vmem>>, vector<1x128xf32>,
    %c1_141 = arith.constant 1 : index
    %c0_142 = arith.constant 0 : index
    %137 = vector.load %arg7[%c1_141, %c0_142] : memref<32x128xf32, #tpu.memory_space<vmem>>, vector<1x128xf32>
    %c3_143 = arith.constant 3 : index
    %c0_144 = arith.constant 0 : index
    %138 = vector.load %arg8[%c3_143, %c0_144] : memref<66x128xf32, #tpu.memory_space<vmem>>, vector<1x128xf32>
    tpu.vector_store %arg8[%c3_143, %c0_144], %137 {strides = array<i32>} : memref<66x128xf32, #tpu.memory_space<vmem>>, vector<1x128xf32>,
    %c4_145 = arith.constant 4 : index
    %c0_146 = arith.constant 0 : index
    %139 = vector.load %arg8[%c4_145, %c0_146] : memref<66x128xf32, #tpu.memory_space<vmem>>, vector<1x128xf32>
    tpu.vector_store %arg8[%c4_145, %c0_146], %137 {strides = array<i32>} : memref<66x128xf32, #tpu.memory_space<vmem>>, vector<1x128xf32>,
    %c2_147 = arith.constant 2 : index
    %c0_148 = arith.constant 0 : index
    %140 = vector.load %arg7[%c2_147, %c0_148] : memref<32x128xf32, #tpu.memory_space<vmem>>, vector<1x128xf32>
    %c5_149 = arith.constant 5 : index
    %c0_150 = arith.constant 0 : index
    %141 = vector.load %arg8[%c5_149, %c0_150] : memref<66x128xf32, #tpu.memory_space<vmem>>, vector<1x128xf32>
    tpu.vector_store %arg8[%c5_149, %c0_150], %140 {strides = array<i32>} : memref<66x128xf32, #tpu.memory_space<vmem>>, vector<1x128xf32>,
    %c6_151 = arith.constant 6 : index
    %c0_152 = arith.constant 0 : index
    %142 = vector.load %arg8[%c6_151, %c0_152] : memref<66x128xf32, #tpu.memory_space<vmem>>, vector<1x128xf32>
    tpu.vector_store %arg8[%c6_151, %c0_152], %140 {strides = array<i32>} : memref<66x128xf32, #tpu.memory_space<vmem>>, vector<1x128xf32>,
    %c3_153 = arith.constant 3 : index
    %c0_154 = arith.constant 0 : index
    %143 = vector.load %arg7[%c3_153, %c0_154] : memref<32x128xf32, #tpu.memory_space<vmem>>, vector<1x128xf32>
    %c7_155 = arith.constant 7 : index
    %c0_156 = arith.constant 0 : index
    %144 = vector.load %arg8[%c7_155, %c0_156] : memref<66x128xf32, #tpu.memory_space<vmem>>, vector<1x128xf32>
    tpu.vector_store %arg8[%c7_155, %c0_156], %143 {strides = array<i32>} : memref<66x128xf32, #tpu.memory_space<vmem>>, vector<1x128xf32>,
    %c8_157 = arith.constant 8 : index
    %c0_158 = arith.constant 0 : index
    %145 = vector.load %arg8[%c8_157, %c0_158] : memref<66x128xf32, #tpu.memory_space<vmem>>, vector<1x128xf32>
    tpu.vector_store %arg8[%c8_157, %c0_158], %143 {strides = array<i32>} : memref<66x128xf32, #tpu.memory_space<vmem>>, vector<1x128xf32>,
    %c4_159 = arith.constant 4 : index
    %c0_160 = arith.constant 0 : index
    %146 = vector.load %arg7[%c4_159, %c0_160] : memref<32x128xf32, #tpu.memory_space<vmem>>, vector<1x128xf32>
    %c9_161 = arith.constant 9 : index
    %c0_162 = arith.constant 0 : index
    %147 = vector.load %arg8[%c9_161, %c0_162] : memref<66x128xf32, #tpu.memory_space<vmem>>, vector<1x128xf32>
    tpu.vector_store %arg8[%c9_161, %c0_162], %146 {strides = array<i32>} : memref<66x128xf32, #tpu.memory_space<vmem>>, vector<1x128xf32>,
    %c10_163 = arith.constant 10 : index
    %c0_164 = arith.constant 0 : index
    %148 = vector.load %arg8[%c10_163, %c0_164] : memref<66x128xf32, #tpu.memory_space<vmem>>, vector<1x128xf32>
    tpu.vector_store %arg8[%c10_163, %c0_164], %146 {strides = array<i32>} : memref<66x128xf32, #tpu.memory_space<vmem>>, vector<1x128xf32>,
    %c5_165 = arith.constant 5 : index
    %c0_166 = arith.constant 0 : index
    %149 = vector.load %arg7[%c5_165, %c0_166] : memref<32x128xf32, #tpu.memory_space<vmem>>, vector<1x128xf32>
    %c11_167 = arith.constant 11 : index
    %c0_168 = arith.constant 0 : index
    %150 = vector.load %arg8[%c11_167, %c0_168] : memref<66x128xf32, #tpu.memory_space<vmem>>, vector<1x128xf32>
    tpu.vector_store %arg8[%c11_167, %c0_168], %149 {strides = array<i32>} : memref<66x128xf32, #tpu.memory_space<vmem>>, vector<1x128xf32>,
    %c12_169 = arith.constant 12 : index
    %c0_170 = arith.constant 0 : index
    %151 = vector.load %arg8[%c12_169, %c0_170] : memref<66x128xf32, #tpu.memory_space<vmem>>, vector<1x128xf32>
    tpu.vector_store %arg8[%c12_169, %c0_170], %149 {strides = array<i32>} : memref<66x128xf32, #tpu.memory_space<vmem>>, vector<1x128xf32>,
    %c6_171 = arith.constant 6 : index
    %c0_172 = arith.constant 0 : index
    %152 = vector.load %arg7[%c6_171, %c0_172] : memref<32x128xf32, #tpu.memory_space<vmem>>, vector<1x128xf32>
    %c13_173 = arith.constant 13 : index
    %c0_174 = arith.constant 0 : index
    %153 = vector.load %arg8[%c13_173, %c0_174] : memref<66x128xf32, #tpu.memory_space<vmem>>, vector<1x128xf32>
    tpu.vector_store %arg8[%c13_173, %c0_174], %152 {strides = array<i32>} : memref<66x128xf32, #tpu.memory_space<vmem>>, vector<1x128xf32>,
    %c14_175 = arith.constant 14 : index
    %c0_176 = arith.constant 0 : index
    %154 = vector.load %arg8[%c14_175, %c0_176] : memref<66x128xf32, #tpu.memory_space<vmem>>, vector<1x128xf32>
    tpu.vector_store %arg8[%c14_175, %c0_176], %152 {strides = array<i32>} : memref<66x128xf32, #tpu.memory_space<vmem>>, vector<1x128xf32>,
    %c7_177 = arith.constant 7 : index
    %c0_178 = arith.constant 0 : index
    %155 = vector.load %arg7[%c7_177, %c0_178] : memref<32x128xf32, #tpu.memory_space<vmem>>, vector<1x128xf32>
    %c15_179 = arith.constant 15 : index
    %c0_180 = arith.constant 0 : index
    %156 = vector.load %arg8[%c15_179, %c0_180] : memref<66x128xf32, #tpu.memory_space<vmem>>, vector<1x128xf32>
    tpu.vector_store %arg8[%c15_179, %c0_180], %155 {strides = array<i32>} : memref<66x128xf32, #tpu.memory_space<vmem>>, vector<1x128xf32>,
    %c16_181 = arith.constant 16 : index
    %c0_182 = arith.constant 0 : index
    %157 = vector.load %arg8[%c16_181, %c0_182] : memref<66x128xf32, #tpu.memory_space<vmem>>, vector<1x128xf32>
    tpu.vector_store %arg8[%c16_181, %c0_182], %155 {strides = array<i32>} : memref<66x128xf32, #tpu.memory_space<vmem>>, vector<1x128xf32>,
    %c8_183 = arith.constant 8 : index
    %c0_184 = arith.constant 0 : index
    %158 = vector.load %arg7[%c8_183, %c0_184] : memref<32x128xf32, #tpu.memory_space<vmem>>, vector<1x128xf32>
    %c17_185 = arith.constant 17 : index
    %c0_186 = arith.constant 0 : index
    %159 = vector.load %arg8[%c17_185, %c0_186] : memref<66x128xf32, #tpu.memory_space<vmem>>, vector<1x128xf32>
    tpu.vector_store %arg8[%c17_185, %c0_186], %158 {strides = array<i32>} : memref<66x128xf32, #tpu.memory_space<vmem>>, vector<1x128xf32>,
    %c18 = arith.constant 18 : index
    %c0_187 = arith.constant 0 : index
    %160 = vector.load %arg8[%c18, %c0_187] : memref<66x128xf32, #tpu.memory_space<vmem>>, vector<1x128xf32>
    tpu.vector_store %arg8[%c18, %c0_187], %158 {strides = array<i32>} : memref<66x128xf32, #tpu.memory_space<vmem>>, vector<1x128xf32>,
    %c9_188 = arith.constant 9 : index
    %c0_189 = arith.constant 0 : index
    %161 = vector.load %arg7[%c9_188, %c0_189] : memref<32x128xf32, #tpu.memory_space<vmem>>, vector<1x128xf32>
    %c19 = arith.constant 19 : index
    %c0_190 = arith.constant 0 : index
    %162 = vector.load %arg8[%c19, %c0_190] : memref<66x128xf32, #tpu.memory_space<vmem>>, vector<1x128xf32>
    tpu.vector_store %arg8[%c19, %c0_190], %161 {strides = array<i32>} : memref<66x128xf32, #tpu.memory_space<vmem>>, vector<1x128xf32>,
    %c20 = arith.constant 20 : index
    %c0_191 = arith.constant 0 : index
    %163 = vector.load %arg8[%c20, %c0_191] : memref<66x128xf32, #tpu.memory_space<vmem>>, vector<1x128xf32>
    tpu.vector_store %arg8[%c20, %c0_191], %161 {strides = array<i32>} : memref<66x128xf32, #tpu.memory_space<vmem>>, vector<1x128xf32>,
    %c10_192 = arith.constant 10 : index
    %c0_193 = arith.constant 0 : index
    %164 = vector.load %arg7[%c10_192, %c0_193] : memref<32x128xf32, #tpu.memory_space<vmem>>, vector<1x128xf32>
    %c21 = arith.constant 21 : index
    %c0_194 = arith.constant 0 : index
    %165 = vector.load %arg8[%c21, %c0_194] : memref<66x128xf32, #tpu.memory_space<vmem>>, vector<1x128xf32>
    tpu.vector_store %arg8[%c21, %c0_194], %164 {strides = array<i32>} : memref<66x128xf32, #tpu.memory_space<vmem>>, vector<1x128xf32>,
    %c22 = arith.constant 22 : index
    %c0_195 = arith.constant 0 : index
    %166 = vector.load %arg8[%c22, %c0_195] : memref<66x128xf32, #tpu.memory_space<vmem>>, vector<1x128xf32>
    tpu.vector_store %arg8[%c22, %c0_195], %164 {strides = array<i32>} : memref<66x128xf32, #tpu.memory_space<vmem>>, vector<1x128xf32>,
    %c11_196 = arith.constant 11 : index
    %c0_197 = arith.constant 0 : index
    %167 = vector.load %arg7[%c11_196, %c0_197] : memref<32x128xf32, #tpu.memory_space<vmem>>, vector<1x128xf32>
    %c23 = arith.constant 23 : index
    %c0_198 = arith.constant 0 : index
    %168 = vector.load %arg8[%c23, %c0_198] : memref<66x128xf32, #tpu.memory_space<vmem>>, vector<1x128xf32>
    tpu.vector_store %arg8[%c23, %c0_198], %167 {strides = array<i32>} : memref<66x128xf32, #tpu.memory_space<vmem>>, vector<1x128xf32>,
    %c24 = arith.constant 24 : index
    %c0_199 = arith.constant 0 : index
    %169 = vector.load %arg8[%c24, %c0_199] : memref<66x128xf32, #tpu.memory_space<vmem>>, vector<1x128xf32>
    tpu.vector_store %arg8[%c24, %c0_199], %167 {strides = array<i32>} : memref<66x128xf32, #tpu.memory_space<vmem>>, vector<1x128xf32>,
    %c12_200 = arith.constant 12 : index
    %c0_201 = arith.constant 0 : index
    %170 = vector.load %arg7[%c12_200, %c0_201] : memref<32x128xf32, #tpu.memory_space<vmem>>, vector<1x128xf32>
    %c25 = arith.constant 25 : index
    %c0_202 = arith.constant 0 : index
    %171 = vector.load %arg8[%c25, %c0_202] : memref<66x128xf32, #tpu.memory_space<vmem>>, vector<1x128xf32>
    tpu.vector_store %arg8[%c25, %c0_202], %170 {strides = array<i32>} : memref<66x128xf32, #tpu.memory_space<vmem>>, vector<1x128xf32>,
    %c26 = arith.constant 26 : index
    %c0_203 = arith.constant 0 : index
    %172 = vector.load %arg8[%c26, %c0_203] : memref<66x128xf32, #tpu.memory_space<vmem>>, vector<1x128xf32>
    tpu.vector_store %arg8[%c26, %c0_203], %170 {strides = array<i32>} : memref<66x128xf32, #tpu.memory_space<vmem>>, vector<1x128xf32>,
    %c13_204 = arith.constant 13 : index
    %c0_205 = arith.constant 0 : index
    %173 = vector.load %arg7[%c13_204, %c0_205] : memref<32x128xf32, #tpu.memory_space<vmem>>, vector<1x128xf32>
    %c27 = arith.constant 27 : index
    %c0_206 = arith.constant 0 : index
    %174 = vector.load %arg8[%c27, %c0_206] : memref<66x128xf32, #tpu.memory_space<vmem>>, vector<1x128xf32>
    tpu.vector_store %arg8[%c27, %c0_206], %173 {strides = array<i32>} : memref<66x128xf32, #tpu.memory_space<vmem>>, vector<1x128xf32>,
    %c28 = arith.constant 28 : index
    %c0_207 = arith.constant 0 : index
    %175 = vector.load %arg8[%c28, %c0_207] : memref<66x128xf32, #tpu.memory_space<vmem>>, vector<1x128xf32>
    tpu.vector_store %arg8[%c28, %c0_207], %173 {strides = array<i32>} : memref<66x128xf32, #tpu.memory_space<vmem>>, vector<1x128xf32>,
    %c14_208 = arith.constant 14 : index
    %c0_209 = arith.constant 0 : index
    %176 = vector.load %arg7[%c14_208, %c0_209] : memref<32x128xf32, #tpu.memory_space<vmem>>, vector<1x128xf32>
    %c29 = arith.constant 29 : index
    %c0_210 = arith.constant 0 : index
    %177 = vector.load %arg8[%c29, %c0_210] : memref<66x128xf32, #tpu.memory_space<vmem>>, vector<1x128xf32>
    tpu.vector_store %arg8[%c29, %c0_210], %176 {strides = array<i32>} : memref<66x128xf32, #tpu.memory_space<vmem>>, vector<1x128xf32>,
    %c30 = arith.constant 30 : index
    %c0_211 = arith.constant 0 : index
    %178 = vector.load %arg8[%c30, %c0_211] : memref<66x128xf32, #tpu.memory_space<vmem>>, vector<1x128xf32>
    tpu.vector_store %arg8[%c30, %c0_211], %176 {strides = array<i32>} : memref<66x128xf32, #tpu.memory_space<vmem>>, vector<1x128xf32>,
    %c15_212 = arith.constant 15 : index
    %c0_213 = arith.constant 0 : index
    %179 = vector.load %arg7[%c15_212, %c0_213] : memref<32x128xf32, #tpu.memory_space<vmem>>, vector<1x128xf32>
    %c31 = arith.constant 31 : index
    %c0_214 = arith.constant 0 : index
    %180 = vector.load %arg8[%c31, %c0_214] : memref<66x128xf32, #tpu.memory_space<vmem>>, vector<1x128xf32>
    tpu.vector_store %arg8[%c31, %c0_214], %179 {strides = array<i32>} : memref<66x128xf32, #tpu.memory_space<vmem>>, vector<1x128xf32>,
    %c32 = arith.constant 32 : index
    %c0_215 = arith.constant 0 : index
    %181 = vector.load %arg8[%c32, %c0_215] : memref<66x128xf32, #tpu.memory_space<vmem>>, vector<1x128xf32>
    tpu.vector_store %arg8[%c32, %c0_215], %179 {strides = array<i32>} : memref<66x128xf32, #tpu.memory_space<vmem>>, vector<1x128xf32>,
    %c2_216 = arith.constant 2 : index
    %c0_217 = arith.constant 0 : index
    %c0_218 = arith.constant 0 : index
    %182 = vector.load %arg5[%c2_216, %c0_217, %c0_218] : memref<4x1x256xf32, #tpu.memory_space<vmem>>, vector<1x1x256xf32>
    %183 = vector.shape_cast %182 : vector<1x1x256xf32> to vector<1x256xf32>
    %c0_219 = arith.constant 0 : index
    %c0_220 = arith.constant 0 : index
    %184 = vector.load %arg8[%c0_219, %c0_220] : memref<66x128xf32, #tpu.memory_space<vmem>>, vector<32x128xf32>
    %185 = arith.truncf %184 : vector<32x128xf32> to vector<32x128xbf16>
    %c6_221 = arith.constant 6 : index
    %c0_222 = arith.constant 0 : index
    %c0_223 = arith.constant 0 : index
    %186 = vector.load %arg4[%c6_221, %c0_222, %c0_223] : memref<12x128x256xbf16, #tpu.memory_space<vmem>>, vector<1x128x256xbf16>
    %187 = vector.shape_cast %186 : vector<1x128x256xbf16> to vector<128x256xbf16>
    %cst_224 = arith.constant dense<0.000000e+00> : vector<32x256xf32>
    %188 = tpu.matmul %185, %187, %cst_224 {dimension_numbers = #tpu.dot_dimension_numbers<[1], [0], [0], [1], [0, 0, 1, 1], [], []>} : vector<32x128xbf16>, vector<128x256xbf16>, vector<32x256xf32> -> vector<32x256xf32>
    %189 = vector.broadcast %183 : vector<1x256xf32> to vector<32x256xf32>
    %190 = arith.addf %189, %188 : vector<32x256xf32>
    %c1_225 = arith.constant 1 : index
    %c0_226 = arith.constant 0 : index
    %191 = vector.load %arg8[%c1_225, %c0_226] : memref<66x128xf32, #tpu.memory_space<vmem>>, vector<32x128xf32>
    %192 = arith.truncf %191 : vector<32x128xf32> to vector<32x128xbf16>
    %c7_227 = arith.constant 7 : index
    %c0_228 = arith.constant 0 : index
    %c0_229 = arith.constant 0 : index
    %193 = vector.load %arg4[%c7_227, %c0_228, %c0_229] : memref<12x128x256xbf16, #tpu.memory_space<vmem>>, vector<1x128x256xbf16>
    %194 = vector.shape_cast %193 : vector<1x128x256xbf16> to vector<128x256xbf16>
    %cst_230 = arith.constant dense<0.000000e+00> : vector<32x256xf32>
    %195 = tpu.matmul %192, %194, %cst_230 {dimension_numbers = #tpu.dot_dimension_numbers<[1], [0], [0], [1], [0, 0, 1, 1], [], []>} : vector<32x128xbf16>, vector<128x256xbf16>, vector<32x256xf32> -> vector<32x256xf32>
    %196 = arith.addf %190, %195 : vector<32x256xf32>
    %c2_231 = arith.constant 2 : index
    %c0_232 = arith.constant 0 : index
    %197 = vector.load %arg8[%c2_231, %c0_232] : memref<66x128xf32, #tpu.memory_space<vmem>>, vector<32x128xf32>
    %198 = arith.truncf %197 : vector<32x128xf32> to vector<32x128xbf16>
    %c8_233 = arith.constant 8 : index
    %c0_234 = arith.constant 0 : index
    %c0_235 = arith.constant 0 : index
    %199 = vector.load %arg4[%c8_233, %c0_234, %c0_235] : memref<12x128x256xbf16, #tpu.memory_space<vmem>>, vector<1x128x256xbf16>
    %200 = vector.shape_cast %199 : vector<1x128x256xbf16> to vector<128x256xbf16>
    %cst_236 = arith.constant dense<0.000000e+00> : vector<32x256xf32>
    %201 = tpu.matmul %198, %200, %cst_236 {dimension_numbers = #tpu.dot_dimension_numbers<[1], [0], [0], [1], [0, 0, 1, 1], [], []>} : vector<32x128xbf16>, vector<128x256xbf16>, vector<32x256xf32> -> vector<32x256xf32>
    %202 = arith.addf %196, %201 : vector<32x256xf32>
    %203 = vector.extract_strided_slice %202 {offsets = [0, 0], sizes = [32, 128], strides = [1, 1]} : vector<32x256xf32> to vector<32x128xf32>
    %204 = vector.extract_strided_slice %202 {offsets = [0, 128], sizes = [32, 128], strides = [1, 1]} : vector<32x256xf32> to vector<32x128xf32>
    %cst_237 = arith.constant 0.000000e+00 : f32
    %205 = vector.broadcast %cst_237 : f32 to vector<32x128xf32>
    %206 = arith.subf %205, %204 : vector<32x128xf32>
    %207 = math.exp %206 : vector<32x128xf32>
    %cst_238 = arith.constant 1.000000e+00 : f32
    %208 = vector.broadcast %cst_238 : f32 to vector<32x128xf32>
    %209 = arith.addf %208, %207 : vector<32x128xf32>
    %210 = tpu.reciprocal %209 {approx = true} : vector<32x128xf32> -> vector<32x128xf32>
    %211 = arith.mulf %203, %210 : vector<32x128xf32>
    %c0_239 = arith.constant 0 : index
    %c0_240 = arith.constant 0 : index
    %212 = vector.load %arg7[%c0_239, %c0_240] : memref<32x128xf32, #tpu.memory_space<vmem>>, vector<32x128xf32>
    tpu.vector_store %arg7[%c0_239, %c0_240], %211 {strides = array<i32>} : memref<32x128xf32, #tpu.memory_space<vmem>>, vector<32x128xf32>,
    %cst_241 = arith.constant 0.000000e+00 : f32
    %213 = vector.broadcast %cst_241 : f32 to vector<1x128xf32>
    %c0_242 = arith.constant 0 : index
    %c0_243 = arith.constant 0 : index
    %214 = vector.load %arg8[%c0_242, %c0_243] : memref<66x128xf32, #tpu.memory_space<vmem>>, vector<1x128xf32>
    tpu.vector_store %arg8[%c0_242, %c0_243], %213 {strides = array<i32>} : memref<66x128xf32, #tpu.memory_space<vmem>>, vector<1x128xf32>,
    %c65 = arith.constant 65 : index
    %c0_244 = arith.constant 0 : index
    %215 = vector.load %arg8[%c65, %c0_244] : memref<66x128xf32, #tpu.memory_space<vmem>>, vector<1x128xf32>
    tpu.vector_store %arg8[%c65, %c0_244], %213 {strides = array<i32>} : memref<66x128xf32, #tpu.memory_space<vmem>>, vector<1x128xf32>,
    %c0_245 = arith.constant 0 : index
    %c0_246 = arith.constant 0 : index
    %216 = vector.load %arg7[%c0_245, %c0_246] : memref<32x128xf32, #tpu.memory_space<vmem>>, vector<1x128xf32>
    %c1_247 = arith.constant 1 : index
    %c0_248 = arith.constant 0 : index
    %217 = vector.load %arg8[%c1_247, %c0_248] : memref<66x128xf32, #tpu.memory_space<vmem>>, vector<1x128xf32>
    tpu.vector_store %arg8[%c1_247, %c0_248], %216 {strides = array<i32>} : memref<66x128xf32, #tpu.memory_space<vmem>>, vector<1x128xf32>,
    %c2_249 = arith.constant 2 : index
    %c0_250 = arith.constant 0 : index
    %218 = vector.load %arg8[%c2_249, %c0_250] : memref<66x128xf32, #tpu.memory_space<vmem>>, vector<1x128xf32>
    tpu.vector_store %arg8[%c2_249, %c0_250], %216 {strides = array<i32>} : memref<66x128xf32, #tpu.memory_space<vmem>>, vector<1x128xf32>,
    %c1_251 = arith.constant 1 : index
    %c0_252 = arith.constant 0 : index
    %219 = vector.load %arg7[%c1_251, %c0_252] : memref<32x128xf32, #tpu.memory_space<vmem>>, vector<1x128xf32>
    %c3_253 = arith.constant 3 : index
    %c0_254 = arith.constant 0 : index
    %220 = vector.load %arg8[%c3_253, %c0_254] : memref<66x128xf32, #tpu.memory_space<vmem>>, vector<1x128xf32>
    tpu.vector_store %arg8[%c3_253, %c0_254], %219 {strides = array<i32>} : memref<66x128xf32, #tpu.memory_space<vmem>>, vector<1x128xf32>,
    %c4_255 = arith.constant 4 : index
    %c0_256 = arith.constant 0 : index
    %221 = vector.load %arg8[%c4_255, %c0_256] : memref<66x128xf32, #tpu.memory_space<vmem>>, vector<1x128xf32>
    tpu.vector_store %arg8[%c4_255, %c0_256], %219 {strides = array<i32>} : memref<66x128xf32, #tpu.memory_space<vmem>>, vector<1x128xf32>,
    %c2_257 = arith.constant 2 : index
    %c0_258 = arith.constant 0 : index
    %222 = vector.load %arg7[%c2_257, %c0_258] : memref<32x128xf32, #tpu.memory_space<vmem>>, vector<1x128xf32>
    %c5_259 = arith.constant 5 : index
    %c0_260 = arith.constant 0 : index
    %223 = vector.load %arg8[%c5_259, %c0_260] : memref<66x128xf32, #tpu.memory_space<vmem>>, vector<1x128xf32>
    tpu.vector_store %arg8[%c5_259, %c0_260], %222 {strides = array<i32>} : memref<66x128xf32, #tpu.memory_space<vmem>>, vector<1x128xf32>,
    %c6_261 = arith.constant 6 : index
    %c0_262 = arith.constant 0 : index
    %224 = vector.load %arg8[%c6_261, %c0_262] : memref<66x128xf32, #tpu.memory_space<vmem>>, vector<1x128xf32>
    tpu.vector_store %arg8[%c6_261, %c0_262], %222 {strides = array<i32>} : memref<66x128xf32, #tpu.memory_space<vmem>>, vector<1x128xf32>,
    %c3_263 = arith.constant 3 : index
    %c0_264 = arith.constant 0 : index
    %225 = vector.load %arg7[%c3_263, %c0_264] : memref<32x128xf32, #tpu.memory_space<vmem>>, vector<1x128xf32>
    %c7_265 = arith.constant 7 : index
    %c0_266 = arith.constant 0 : index
    %226 = vector.load %arg8[%c7_265, %c0_266] : memref<66x128xf32, #tpu.memory_space<vmem>>, vector<1x128xf32>
    tpu.vector_store %arg8[%c7_265, %c0_266], %225 {strides = array<i32>} : memref<66x128xf32, #tpu.memory_space<vmem>>, vector<1x128xf32>,
    %c8_267 = arith.constant 8 : index
    %c0_268 = arith.constant 0 : index
    %227 = vector.load %arg8[%c8_267, %c0_268] : memref<66x128xf32, #tpu.memory_space<vmem>>, vector<1x128xf32>
    tpu.vector_store %arg8[%c8_267, %c0_268], %225 {strides = array<i32>} : memref<66x128xf32, #tpu.memory_space<vmem>>, vector<1x128xf32>,
    %c4_269 = arith.constant 4 : index
    %c0_270 = arith.constant 0 : index
    %228 = vector.load %arg7[%c4_269, %c0_270] : memref<32x128xf32, #tpu.memory_space<vmem>>, vector<1x128xf32>
    %c9_271 = arith.constant 9 : index
    %c0_272 = arith.constant 0 : index
    %229 = vector.load %arg8[%c9_271, %c0_272] : memref<66x128xf32, #tpu.memory_space<vmem>>, vector<1x128xf32>
    tpu.vector_store %arg8[%c9_271, %c0_272], %228 {strides = array<i32>} : memref<66x128xf32, #tpu.memory_space<vmem>>, vector<1x128xf32>,
    %c10_273 = arith.constant 10 : index
    %c0_274 = arith.constant 0 : index
    %230 = vector.load %arg8[%c10_273, %c0_274] : memref<66x128xf32, #tpu.memory_space<vmem>>, vector<1x128xf32>
    tpu.vector_store %arg8[%c10_273, %c0_274], %228 {strides = array<i32>} : memref<66x128xf32, #tpu.memory_space<vmem>>, vector<1x128xf32>,
    %c5_275 = arith.constant 5 : index
    %c0_276 = arith.constant 0 : index
    %231 = vector.load %arg7[%c5_275, %c0_276] : memref<32x128xf32, #tpu.memory_space<vmem>>, vector<1x128xf32>
    %c11_277 = arith.constant 11 : index
    %c0_278 = arith.constant 0 : index
    %232 = vector.load %arg8[%c11_277, %c0_278] : memref<66x128xf32, #tpu.memory_space<vmem>>, vector<1x128xf32>
    tpu.vector_store %arg8[%c11_277, %c0_278], %231 {strides = array<i32>} : memref<66x128xf32, #tpu.memory_space<vmem>>, vector<1x128xf32>,
    %c12_279 = arith.constant 12 : index
    %c0_280 = arith.constant 0 : index
    %233 = vector.load %arg8[%c12_279, %c0_280] : memref<66x128xf32, #tpu.memory_space<vmem>>, vector<1x128xf32>
    tpu.vector_store %arg8[%c12_279, %c0_280], %231 {strides = array<i32>} : memref<66x128xf32, #tpu.memory_space<vmem>>, vector<1x128xf32>,
    %c6_281 = arith.constant 6 : index
    %c0_282 = arith.constant 0 : index
    %234 = vector.load %arg7[%c6_281, %c0_282] : memref<32x128xf32, #tpu.memory_space<vmem>>, vector<1x128xf32>
    %c13_283 = arith.constant 13 : index
    %c0_284 = arith.constant 0 : index
    %235 = vector.load %arg8[%c13_283, %c0_284] : memref<66x128xf32, #tpu.memory_space<vmem>>, vector<1x128xf32>
    tpu.vector_store %arg8[%c13_283, %c0_284], %234 {strides = array<i32>} : memref<66x128xf32, #tpu.memory_space<vmem>>, vector<1x128xf32>,
    %c14_285 = arith.constant 14 : index
    %c0_286 = arith.constant 0 : index
    %236 = vector.load %arg8[%c14_285, %c0_286] : memref<66x128xf32, #tpu.memory_space<vmem>>, vector<1x128xf32>
    tpu.vector_store %arg8[%c14_285, %c0_286], %234 {strides = array<i32>} : memref<66x128xf32, #tpu.memory_space<vmem>>, vector<1x128xf32>,
    %c7_287 = arith.constant 7 : index
    %c0_288 = arith.constant 0 : index
    %237 = vector.load %arg7[%c7_287, %c0_288] : memref<32x128xf32, #tpu.memory_space<vmem>>, vector<1x128xf32>
    %c15_289 = arith.constant 15 : index
    %c0_290 = arith.constant 0 : index
    %238 = vector.load %arg8[%c15_289, %c0_290] : memref<66x128xf32, #tpu.memory_space<vmem>>, vector<1x128xf32>
    tpu.vector_store %arg8[%c15_289, %c0_290], %237 {strides = array<i32>} : memref<66x128xf32, #tpu.memory_space<vmem>>, vector<1x128xf32>,
    %c16_291 = arith.constant 16 : index
    %c0_292 = arith.constant 0 : index
    %239 = vector.load %arg8[%c16_291, %c0_292] : memref<66x128xf32, #tpu.memory_space<vmem>>, vector<1x128xf32>
    tpu.vector_store %arg8[%c16_291, %c0_292], %237 {strides = array<i32>} : memref<66x128xf32, #tpu.memory_space<vmem>>, vector<1x128xf32>,
    %c8_293 = arith.constant 8 : index
    %c0_294 = arith.constant 0 : index
    %240 = vector.load %arg7[%c8_293, %c0_294] : memref<32x128xf32, #tpu.memory_space<vmem>>, vector<1x128xf32>
    %c17_295 = arith.constant 17 : index
    %c0_296 = arith.constant 0 : index
    %241 = vector.load %arg8[%c17_295, %c0_296] : memref<66x128xf32, #tpu.memory_space<vmem>>, vector<1x128xf32>
    tpu.vector_store %arg8[%c17_295, %c0_296], %240 {strides = array<i32>} : memref<66x128xf32, #tpu.memory_space<vmem>>, vector<1x128xf32>,
    %c18_297 = arith.constant 18 : index
    %c0_298 = arith.constant 0 : index
    %242 = vector.load %arg8[%c18_297, %c0_298] : memref<66x128xf32, #tpu.memory_space<vmem>>, vector<1x128xf32>
    tpu.vector_store %arg8[%c18_297, %c0_298], %240 {strides = array<i32>} : memref<66x128xf32, #tpu.memory_space<vmem>>, vector<1x128xf32>,
    %c9_299 = arith.constant 9 : index
    %c0_300 = arith.constant 0 : index
    %243 = vector.load %arg7[%c9_299, %c0_300] : memref<32x128xf32, #tpu.memory_space<vmem>>, vector<1x128xf32>
    %c19_301 = arith.constant 19 : index
    %c0_302 = arith.constant 0 : index
    %244 = vector.load %arg8[%c19_301, %c0_302] : memref<66x128xf32, #tpu.memory_space<vmem>>, vector<1x128xf32>
    tpu.vector_store %arg8[%c19_301, %c0_302], %243 {strides = array<i32>} : memref<66x128xf32, #tpu.memory_space<vmem>>, vector<1x128xf32>,
    %c20_303 = arith.constant 20 : index
    %c0_304 = arith.constant 0 : index
    %245 = vector.load %arg8[%c20_303, %c0_304] : memref<66x128xf32, #tpu.memory_space<vmem>>, vector<1x128xf32>
    tpu.vector_store %arg8[%c20_303, %c0_304], %243 {strides = array<i32>} : memref<66x128xf32, #tpu.memory_space<vmem>>, vector<1x128xf32>,
    %c10_305 = arith.constant 10 : index
    %c0_306 = arith.constant 0 : index
    %246 = vector.load %arg7[%c10_305, %c0_306] : memref<32x128xf32, #tpu.memory_space<vmem>>, vector<1x128xf32>
    %c21_307 = arith.constant 21 : index
    %c0_308 = arith.constant 0 : index
    %247 = vector.load %arg8[%c21_307, %c0_308] : memref<66x128xf32, #tpu.memory_space<vmem>>, vector<1x128xf32>
    tpu.vector_store %arg8[%c21_307, %c0_308], %246 {strides = array<i32>} : memref<66x128xf32, #tpu.memory_space<vmem>>, vector<1x128xf32>,
    %c22_309 = arith.constant 22 : index
    %c0_310 = arith.constant 0 : index
    %248 = vector.load %arg8[%c22_309, %c0_310] : memref<66x128xf32, #tpu.memory_space<vmem>>, vector<1x128xf32>
    tpu.vector_store %arg8[%c22_309, %c0_310], %246 {strides = array<i32>} : memref<66x128xf32, #tpu.memory_space<vmem>>, vector<1x128xf32>,
    %c11_311 = arith.constant 11 : index
    %c0_312 = arith.constant 0 : index
    %249 = vector.load %arg7[%c11_311, %c0_312] : memref<32x128xf32, #tpu.memory_space<vmem>>, vector<1x128xf32>
    %c23_313 = arith.constant 23 : index
    %c0_314 = arith.constant 0 : index
    %250 = vector.load %arg8[%c23_313, %c0_314] : memref<66x128xf32, #tpu.memory_space<vmem>>, vector<1x128xf32>
    tpu.vector_store %arg8[%c23_313, %c0_314], %249 {strides = array<i32>} : memref<66x128xf32, #tpu.memory_space<vmem>>, vector<1x128xf32>,
    %c24_315 = arith.constant 24 : index
    %c0_316 = arith.constant 0 : index
    %251 = vector.load %arg8[%c24_315, %c0_316] : memref<66x128xf32, #tpu.memory_space<vmem>>, vector<1x128xf32>
    tpu.vector_store %arg8[%c24_315, %c0_316], %249 {strides = array<i32>} : memref<66x128xf32, #tpu.memory_space<vmem>>, vector<1x128xf32>,
    %c12_317 = arith.constant 12 : index
    %c0_318 = arith.constant 0 : index
    %252 = vector.load %arg7[%c12_317, %c0_318] : memref<32x128xf32, #tpu.memory_space<vmem>>, vector<1x128xf32>
    %c25_319 = arith.constant 25 : index
    %c0_320 = arith.constant 0 : index
    %253 = vector.load %arg8[%c25_319, %c0_320] : memref<66x128xf32, #tpu.memory_space<vmem>>, vector<1x128xf32>
    tpu.vector_store %arg8[%c25_319, %c0_320], %252 {strides = array<i32>} : memref<66x128xf32, #tpu.memory_space<vmem>>, vector<1x128xf32>,
    %c26_321 = arith.constant 26 : index
    %c0_322 = arith.constant 0 : index
    %254 = vector.load %arg8[%c26_321, %c0_322] : memref<66x128xf32, #tpu.memory_space<vmem>>, vector<1x128xf32>
    tpu.vector_store %arg8[%c26_321, %c0_322], %252 {strides = array<i32>} : memref<66x128xf32, #tpu.memory_space<vmem>>, vector<1x128xf32>,
    %c13_323 = arith.constant 13 : index
    %c0_324 = arith.constant 0 : index
    %255 = vector.load %arg7[%c13_323, %c0_324] : memref<32x128xf32, #tpu.memory_space<vmem>>, vector<1x128xf32>
    %c27_325 = arith.constant 27 : index
    %c0_326 = arith.constant 0 : index
    %256 = vector.load %arg8[%c27_325, %c0_326] : memref<66x128xf32, #tpu.memory_space<vmem>>, vector<1x128xf32>
    tpu.vector_store %arg8[%c27_325, %c0_326], %255 {strides = array<i32>} : memref<66x128xf32, #tpu.memory_space<vmem>>, vector<1x128xf32>,
    %c28_327 = arith.constant 28 : index
    %c0_328 = arith.constant 0 : index
    %257 = vector.load %arg8[%c28_327, %c0_328] : memref<66x128xf32, #tpu.memory_space<vmem>>, vector<1x128xf32>
    tpu.vector_store %arg8[%c28_327, %c0_328], %255 {strides = array<i32>} : memref<66x128xf32, #tpu.memory_space<vmem>>, vector<1x128xf32>,
    %c14_329 = arith.constant 14 : index
    %c0_330 = arith.constant 0 : index
    %258 = vector.load %arg7[%c14_329, %c0_330] : memref<32x128xf32, #tpu.memory_space<vmem>>, vector<1x128xf32>
    %c29_331 = arith.constant 29 : index
    %c0_332 = arith.constant 0 : index
    %259 = vector.load %arg8[%c29_331, %c0_332] : memref<66x128xf32, #tpu.memory_space<vmem>>, vector<1x128xf32>
    tpu.vector_store %arg8[%c29_331, %c0_332], %258 {strides = array<i32>} : memref<66x128xf32, #tpu.memory_space<vmem>>, vector<1x128xf32>,
    %c30_333 = arith.constant 30 : index
    %c0_334 = arith.constant 0 : index
    %260 = vector.load %arg8[%c30_333, %c0_334] : memref<66x128xf32, #tpu.memory_space<vmem>>, vector<1x128xf32>
    tpu.vector_store %arg8[%c30_333, %c0_334], %258 {strides = array<i32>} : memref<66x128xf32, #tpu.memory_space<vmem>>, vector<1x128xf32>,
    %c15_335 = arith.constant 15 : index
    %c0_336 = arith.constant 0 : index
    %261 = vector.load %arg7[%c15_335, %c0_336] : memref<32x128xf32, #tpu.memory_space<vmem>>, vector<1x128xf32>
    %c31_337 = arith.constant 31 : index
    %c0_338 = arith.constant 0 : index
    %262 = vector.load %arg8[%c31_337, %c0_338] : memref<66x128xf32, #tpu.memory_space<vmem>>, vector<1x128xf32>
    tpu.vector_store %arg8[%c31_337, %c0_338], %261 {strides = array<i32>} : memref<66x128xf32, #tpu.memory_space<vmem>>, vector<1x128xf32>,
    %c32_339 = arith.constant 32 : index
    %c0_340 = arith.constant 0 : index
    %263 = vector.load %arg8[%c32_339, %c0_340] : memref<66x128xf32, #tpu.memory_space<vmem>>, vector<1x128xf32>
    tpu.vector_store %arg8[%c32_339, %c0_340], %261 {strides = array<i32>} : memref<66x128xf32, #tpu.memory_space<vmem>>, vector<1x128xf32>,
    %c16_341 = arith.constant 16 : index
    %c0_342 = arith.constant 0 : index
    %264 = vector.load %arg7[%c16_341, %c0_342] : memref<32x128xf32, #tpu.memory_space<vmem>>, vector<1x128xf32>
    %c33_343 = arith.constant 33 : index
    %c0_344 = arith.constant 0 : index
    %265 = vector.load %arg8[%c33_343, %c0_344] : memref<66x128xf32, #tpu.memory_space<vmem>>, vector<1x128xf32>
    tpu.vector_store %arg8[%c33_343, %c0_344], %264 {strides = array<i32>} : memref<66x128xf32, #tpu.memory_space<vmem>>, vector<1x128xf32>,
    %c34 = arith.constant 34 : index
    %c0_345 = arith.constant 0 : index
    %266 = vector.load %arg8[%c34, %c0_345] : memref<66x128xf32, #tpu.memory_space<vmem>>, vector<1x128xf32>
    tpu.vector_store %arg8[%c34, %c0_345], %264 {strides = array<i32>} : memref<66x128xf32, #tpu.memory_space<vmem>>, vector<1x128xf32>,
    %c17_346 = arith.constant 17 : index
    %c0_347 = arith.constant 0 : index
    %267 = vector.load %arg7[%c17_346, %c0_347] : memref<32x128xf32, #tpu.memory_space<vmem>>, vector<1x128xf32>
    %c35 = arith.constant 35 : index
    %c0_348 = arith.constant 0 : index
    %268 = vector.load %arg8[%c35, %c0_348] : memref<66x128xf32, #tpu.memory_space<vmem>>, vector<1x128xf32>
    tpu.vector_store %arg8[%c35, %c0_348], %267 {strides = array<i32>} : memref<66x128xf32, #tpu.memory_space<vmem>>, vector<1x128xf32>,
    %c36 = arith.constant 36 : index
    %c0_349 = arith.constant 0 : index
    %269 = vector.load %arg8[%c36, %c0_349] : memref<66x128xf32, #tpu.memory_space<vmem>>, vector<1x128xf32>
    tpu.vector_store %arg8[%c36, %c0_349], %267 {strides = array<i32>} : memref<66x128xf32, #tpu.memory_space<vmem>>, vector<1x128xf32>,
    %c18_350 = arith.constant 18 : index
    %c0_351 = arith.constant 0 : index
    %270 = vector.load %arg7[%c18_350, %c0_351] : memref<32x128xf32, #tpu.memory_space<vmem>>, vector<1x128xf32>
    %c37 = arith.constant 37 : index
    %c0_352 = arith.constant 0 : index
    %271 = vector.load %arg8[%c37, %c0_352] : memref<66x128xf32, #tpu.memory_space<vmem>>, vector<1x128xf32>
    tpu.vector_store %arg8[%c37, %c0_352], %270 {strides = array<i32>} : memref<66x128xf32, #tpu.memory_space<vmem>>, vector<1x128xf32>,
    %c38 = arith.constant 38 : index
    %c0_353 = arith.constant 0 : index
    %272 = vector.load %arg8[%c38, %c0_353] : memref<66x128xf32, #tpu.memory_space<vmem>>, vector<1x128xf32>
    tpu.vector_store %arg8[%c38, %c0_353], %270 {strides = array<i32>} : memref<66x128xf32, #tpu.memory_space<vmem>>, vector<1x128xf32>,
    %c19_354 = arith.constant 19 : index
    %c0_355 = arith.constant 0 : index
    %273 = vector.load %arg7[%c19_354, %c0_355] : memref<32x128xf32, #tpu.memory_space<vmem>>, vector<1x128xf32>
    %c39 = arith.constant 39 : index
    %c0_356 = arith.constant 0 : index
    %274 = vector.load %arg8[%c39, %c0_356] : memref<66x128xf32, #tpu.memory_space<vmem>>, vector<1x128xf32>
    tpu.vector_store %arg8[%c39, %c0_356], %273 {strides = array<i32>} : memref<66x128xf32, #tpu.memory_space<vmem>>, vector<1x128xf32>,
    %c40 = arith.constant 40 : index
    %c0_357 = arith.constant 0 : index
    %275 = vector.load %arg8[%c40, %c0_357] : memref<66x128xf32, #tpu.memory_space<vmem>>, vector<1x128xf32>
    tpu.vector_store %arg8[%c40, %c0_357], %273 {strides = array<i32>} : memref<66x128xf32, #tpu.memory_space<vmem>>, vector<1x128xf32>,
    %c20_358 = arith.constant 20 : index
    %c0_359 = arith.constant 0 : index
    %276 = vector.load %arg7[%c20_358, %c0_359] : memref<32x128xf32, #tpu.memory_space<vmem>>, vector<1x128xf32>
    %c41 = arith.constant 41 : index
    %c0_360 = arith.constant 0 : index
    %277 = vector.load %arg8[%c41, %c0_360] : memref<66x128xf32, #tpu.memory_space<vmem>>, vector<1x128xf32>
    tpu.vector_store %arg8[%c41, %c0_360], %276 {strides = array<i32>} : memref<66x128xf32, #tpu.memory_space<vmem>>, vector<1x128xf32>,
    %c42 = arith.constant 42 : index
    %c0_361 = arith.constant 0 : index
    %278 = vector.load %arg8[%c42, %c0_361] : memref<66x128xf32, #tpu.memory_space<vmem>>, vector<1x128xf32>
    tpu.vector_store %arg8[%c42, %c0_361], %276 {strides = array<i32>} : memref<66x128xf32, #tpu.memory_space<vmem>>, vector<1x128xf32>,
    %c21_362 = arith.constant 21 : index
    %c0_363 = arith.constant 0 : index
    %279 = vector.load %arg7[%c21_362, %c0_363] : memref<32x128xf32, #tpu.memory_space<vmem>>, vector<1x128xf32>
    %c43 = arith.constant 43 : index
    %c0_364 = arith.constant 0 : index
    %280 = vector.load %arg8[%c43, %c0_364] : memref<66x128xf32, #tpu.memory_space<vmem>>, vector<1x128xf32>
    tpu.vector_store %arg8[%c43, %c0_364], %279 {strides = array<i32>} : memref<66x128xf32, #tpu.memory_space<vmem>>, vector<1x128xf32>,
    %c44 = arith.constant 44 : index
    %c0_365 = arith.constant 0 : index
    %281 = vector.load %arg8[%c44, %c0_365] : memref<66x128xf32, #tpu.memory_space<vmem>>, vector<1x128xf32>
    tpu.vector_store %arg8[%c44, %c0_365], %279 {strides = array<i32>} : memref<66x128xf32, #tpu.memory_space<vmem>>, vector<1x128xf32>,
    %c22_366 = arith.constant 22 : index
    %c0_367 = arith.constant 0 : index
    %282 = vector.load %arg7[%c22_366, %c0_367] : memref<32x128xf32, #tpu.memory_space<vmem>>, vector<1x128xf32>
    %c45 = arith.constant 45 : index
    %c0_368 = arith.constant 0 : index
    %283 = vector.load %arg8[%c45, %c0_368] : memref<66x128xf32, #tpu.memory_space<vmem>>, vector<1x128xf32>
    tpu.vector_store %arg8[%c45, %c0_368], %282 {strides = array<i32>} : memref<66x128xf32, #tpu.memory_space<vmem>>, vector<1x128xf32>,
    %c46 = arith.constant 46 : index
    %c0_369 = arith.constant 0 : index
    %284 = vector.load %arg8[%c46, %c0_369] : memref<66x128xf32, #tpu.memory_space<vmem>>, vector<1x128xf32>
    tpu.vector_store %arg8[%c46, %c0_369], %282 {strides = array<i32>} : memref<66x128xf32, #tpu.memory_space<vmem>>, vector<1x128xf32>,
    %c23_370 = arith.constant 23 : index
    %c0_371 = arith.constant 0 : index
    %285 = vector.load %arg7[%c23_370, %c0_371] : memref<32x128xf32, #tpu.memory_space<vmem>>, vector<1x128xf32>
    %c47 = arith.constant 47 : index
    %c0_372 = arith.constant 0 : index
    %286 = vector.load %arg8[%c47, %c0_372] : memref<66x128xf32, #tpu.memory_space<vmem>>, vector<1x128xf32>
    tpu.vector_store %arg8[%c47, %c0_372], %285 {strides = array<i32>} : memref<66x128xf32, #tpu.memory_space<vmem>>, vector<1x128xf32>,
    %c48 = arith.constant 48 : index
    %c0_373 = arith.constant 0 : index
    %287 = vector.load %arg8[%c48, %c0_373] : memref<66x128xf32, #tpu.memory_space<vmem>>, vector<1x128xf32>
    tpu.vector_store %arg8[%c48, %c0_373], %285 {strides = array<i32>} : memref<66x128xf32, #tpu.memory_space<vmem>>, vector<1x128xf32>,
    %c24_374 = arith.constant 24 : index
    %c0_375 = arith.constant 0 : index
    %288 = vector.load %arg7[%c24_374, %c0_375] : memref<32x128xf32, #tpu.memory_space<vmem>>, vector<1x128xf32>
    %c49 = arith.constant 49 : index
    %c0_376 = arith.constant 0 : index
    %289 = vector.load %arg8[%c49, %c0_376] : memref<66x128xf32, #tpu.memory_space<vmem>>, vector<1x128xf32>
    tpu.vector_store %arg8[%c49, %c0_376], %288 {strides = array<i32>} : memref<66x128xf32, #tpu.memory_space<vmem>>, vector<1x128xf32>,
    %c50 = arith.constant 50 : index
    %c0_377 = arith.constant 0 : index
    %290 = vector.load %arg8[%c50, %c0_377] : memref<66x128xf32, #tpu.memory_space<vmem>>, vector<1x128xf32>
    tpu.vector_store %arg8[%c50, %c0_377], %288 {strides = array<i32>} : memref<66x128xf32, #tpu.memory_space<vmem>>, vector<1x128xf32>,
    %c25_378 = arith.constant 25 : index
    %c0_379 = arith.constant 0 : index
    %291 = vector.load %arg7[%c25_378, %c0_379] : memref<32x128xf32, #tpu.memory_space<vmem>>, vector<1x128xf32>
    %c51 = arith.constant 51 : index
    %c0_380 = arith.constant 0 : index
    %292 = vector.load %arg8[%c51, %c0_380] : memref<66x128xf32, #tpu.memory_space<vmem>>, vector<1x128xf32>
    tpu.vector_store %arg8[%c51, %c0_380], %291 {strides = array<i32>} : memref<66x128xf32, #tpu.memory_space<vmem>>, vector<1x128xf32>,
    %c52 = arith.constant 52 : index
    %c0_381 = arith.constant 0 : index
    %293 = vector.load %arg8[%c52, %c0_381] : memref<66x128xf32, #tpu.memory_space<vmem>>, vector<1x128xf32>
    tpu.vector_store %arg8[%c52, %c0_381], %291 {strides = array<i32>} : memref<66x128xf32, #tpu.memory_space<vmem>>, vector<1x128xf32>,
    %c26_382 = arith.constant 26 : index
    %c0_383 = arith.constant 0 : index
    %294 = vector.load %arg7[%c26_382, %c0_383] : memref<32x128xf32, #tpu.memory_space<vmem>>, vector<1x128xf32>
    %c53 = arith.constant 53 : index
    %c0_384 = arith.constant 0 : index
    %295 = vector.load %arg8[%c53, %c0_384] : memref<66x128xf32, #tpu.memory_space<vmem>>, vector<1x128xf32>
    tpu.vector_store %arg8[%c53, %c0_384], %294 {strides = array<i32>} : memref<66x128xf32, #tpu.memory_space<vmem>>, vector<1x128xf32>,
    %c54 = arith.constant 54 : index
    %c0_385 = arith.constant 0 : index
    %296 = vector.load %arg8[%c54, %c0_385] : memref<66x128xf32, #tpu.memory_space<vmem>>, vector<1x128xf32>
    tpu.vector_store %arg8[%c54, %c0_385], %294 {strides = array<i32>} : memref<66x128xf32, #tpu.memory_space<vmem>>, vector<1x128xf32>,
    %c27_386 = arith.constant 27 : index
    %c0_387 = arith.constant 0 : index
    %297 = vector.load %arg7[%c27_386, %c0_387] : memref<32x128xf32, #tpu.memory_space<vmem>>, vector<1x128xf32>
    %c55 = arith.constant 55 : index
    %c0_388 = arith.constant 0 : index
    %298 = vector.load %arg8[%c55, %c0_388] : memref<66x128xf32, #tpu.memory_space<vmem>>, vector<1x128xf32>
    tpu.vector_store %arg8[%c55, %c0_388], %297 {strides = array<i32>} : memref<66x128xf32, #tpu.memory_space<vmem>>, vector<1x128xf32>,
    %c56 = arith.constant 56 : index
    %c0_389 = arith.constant 0 : index
    %299 = vector.load %arg8[%c56, %c0_389] : memref<66x128xf32, #tpu.memory_space<vmem>>, vector<1x128xf32>
    tpu.vector_store %arg8[%c56, %c0_389], %297 {strides = array<i32>} : memref<66x128xf32, #tpu.memory_space<vmem>>, vector<1x128xf32>,
    %c28_390 = arith.constant 28 : index
    %c0_391 = arith.constant 0 : index
    %300 = vector.load %arg7[%c28_390, %c0_391] : memref<32x128xf32, #tpu.memory_space<vmem>>, vector<1x128xf32>
    %c57 = arith.constant 57 : index
    %c0_392 = arith.constant 0 : index
    %301 = vector.load %arg8[%c57, %c0_392] : memref<66x128xf32, #tpu.memory_space<vmem>>, vector<1x128xf32>
    tpu.vector_store %arg8[%c57, %c0_392], %300 {strides = array<i32>} : memref<66x128xf32, #tpu.memory_space<vmem>>, vector<1x128xf32>,
    %c58 = arith.constant 58 : index
    %c0_393 = arith.constant 0 : index
    %302 = vector.load %arg8[%c58, %c0_393] : memref<66x128xf32, #tpu.memory_space<vmem>>, vector<1x128xf32>
    tpu.vector_store %arg8[%c58, %c0_393], %300 {strides = array<i32>} : memref<66x128xf32, #tpu.memory_space<vmem>>, vector<1x128xf32>,
    %c29_394 = arith.constant 29 : index
    %c0_395 = arith.constant 0 : index
    %303 = vector.load %arg7[%c29_394, %c0_395] : memref<32x128xf32, #tpu.memory_space<vmem>>, vector<1x128xf32>
    %c59 = arith.constant 59 : index
    %c0_396 = arith.constant 0 : index
    %304 = vector.load %arg8[%c59, %c0_396] : memref<66x128xf32, #tpu.memory_space<vmem>>, vector<1x128xf32>
    tpu.vector_store %arg8[%c59, %c0_396], %303 {strides = array<i32>} : memref<66x128xf32, #tpu.memory_space<vmem>>, vector<1x128xf32>,
    %c60 = arith.constant 60 : index
    %c0_397 = arith.constant 0 : index
    %305 = vector.load %arg8[%c60, %c0_397] : memref<66x128xf32, #tpu.memory_space<vmem>>, vector<1x128xf32>
    tpu.vector_store %arg8[%c60, %c0_397], %303 {strides = array<i32>} : memref<66x128xf32, #tpu.memory_space<vmem>>, vector<1x128xf32>,
    %c30_398 = arith.constant 30 : index
    %c0_399 = arith.constant 0 : index
    %306 = vector.load %arg7[%c30_398, %c0_399] : memref<32x128xf32, #tpu.memory_space<vmem>>, vector<1x128xf32>
    %c61 = arith.constant 61 : index
    %c0_400 = arith.constant 0 : index
    %307 = vector.load %arg8[%c61, %c0_400] : memref<66x128xf32, #tpu.memory_space<vmem>>, vector<1x128xf32>
    tpu.vector_store %arg8[%c61, %c0_400], %306 {strides = array<i32>} : memref<66x128xf32, #tpu.memory_space<vmem>>, vector<1x128xf32>,
    %c62 = arith.constant 62 : index
    %c0_401 = arith.constant 0 : index
    %308 = vector.load %arg8[%c62, %c0_401] : memref<66x128xf32, #tpu.memory_space<vmem>>, vector<1x128xf32>
    tpu.vector_store %arg8[%c62, %c0_401], %306 {strides = array<i32>} : memref<66x128xf32, #tpu.memory_space<vmem>>, vector<1x128xf32>,
    %c31_402 = arith.constant 31 : index
    %c0_403 = arith.constant 0 : index
    %309 = vector.load %arg7[%c31_402, %c0_403] : memref<32x128xf32, #tpu.memory_space<vmem>>, vector<1x128xf32>
    %c63 = arith.constant 63 : index
    %c0_404 = arith.constant 0 : index
    %310 = vector.load %arg8[%c63, %c0_404] : memref<66x128xf32, #tpu.memory_space<vmem>>, vector<1x128xf32>
    tpu.vector_store %arg8[%c63, %c0_404], %309 {strides = array<i32>} : memref<66x128xf32, #tpu.memory_space<vmem>>, vector<1x128xf32>,
    %c64 = arith.constant 64 : index
    %c0_405 = arith.constant 0 : index
    %311 = vector.load %arg8[%c64, %c0_405] : memref<66x128xf32, #tpu.memory_space<vmem>>, vector<1x128xf32>
    tpu.vector_store %arg8[%c64, %c0_405], %309 {strides = array<i32>} : memref<66x128xf32, #tpu.memory_space<vmem>>, vector<1x128xf32>,
    %c3_406 = arith.constant 3 : index
    %c0_407 = arith.constant 0 : index
    %c0_408 = arith.constant 0 : index
    %312 = vector.load %arg5[%c3_406, %c0_407, %c0_408] : memref<4x1x256xf32, #tpu.memory_space<vmem>>, vector<1x1x256xf32>
    %313 = vector.shape_cast %312 : vector<1x1x256xf32> to vector<1x256xf32>
    %c0_409 = arith.constant 0 : index
    %c0_410 = arith.constant 0 : index
    %314 = vector.load %arg8[%c0_409, %c0_410] : memref<66x128xf32, #tpu.memory_space<vmem>>, vector<64x128xf32>
    %315 = arith.truncf %314 : vector<64x128xf32> to vector<64x128xbf16>
    %c9_411 = arith.constant 9 : index
    %c0_412 = arith.constant 0 : index
    %c0_413 = arith.constant 0 : index
    %316 = vector.load %arg4[%c9_411, %c0_412, %c0_413] : memref<12x128x256xbf16, #tpu.memory_space<vmem>>, vector<1x128x256xbf16>
    %317 = vector.shape_cast %316 : vector<1x128x256xbf16> to vector<128x256xbf16>
    %cst_414 = arith.constant dense<0.000000e+00> : vector<64x256xf32>
    %318 = tpu.matmul %315, %317, %cst_414 {dimension_numbers = #tpu.dot_dimension_numbers<[1], [0], [0], [1], [0, 0, 1, 1], [], []>} : vector<64x128xbf16>, vector<128x256xbf16>, vector<64x256xf32> -> vector<64x256xf32>
    %319 = vector.broadcast %313 : vector<1x256xf32> to vector<64x256xf32>
    %320 = arith.addf %319, %318 : vector<64x256xf32>
    %c1_415 = arith.constant 1 : index
    %c0_416 = arith.constant 0 : index
    %321 = vector.load %arg8[%c1_415, %c0_416] : memref<66x128xf32, #tpu.memory_space<vmem>>, vector<64x128xf32>
    %322 = arith.truncf %321 : vector<64x128xf32> to vector<64x128xbf16>
    %c10_417 = arith.constant 10 : index
    %c0_418 = arith.constant 0 : index
    %c0_419 = arith.constant 0 : index
    %323 = vector.load %arg4[%c10_417, %c0_418, %c0_419] : memref<12x128x256xbf16, #tpu.memory_space<vmem>>, vector<1x128x256xbf16>
    %324 = vector.shape_cast %323 : vector<1x128x256xbf16> to vector<128x256xbf16>
    %cst_420 = arith.constant dense<0.000000e+00> : vector<64x256xf32>
    %325 = tpu.matmul %322, %324, %cst_420 {dimension_numbers = #tpu.dot_dimension_numbers<[1], [0], [0], [1], [0, 0, 1, 1], [], []>} : vector<64x128xbf16>, vector<128x256xbf16>, vector<64x256xf32> -> vector<64x256xf32>
    %326 = arith.addf %320, %325 : vector<64x256xf32>
    %c2_421 = arith.constant 2 : index
    %c0_422 = arith.constant 0 : index
    %327 = vector.load %arg8[%c2_421, %c0_422] : memref<66x128xf32, #tpu.memory_space<vmem>>, vector<64x128xf32>
    %328 = arith.truncf %327 : vector<64x128xf32> to vector<64x128xbf16>
    %c11_423 = arith.constant 11 : index
    %c0_424 = arith.constant 0 : index
    %c0_425 = arith.constant 0 : index
    %329 = vector.load %arg4[%c11_423, %c0_424, %c0_425] : memref<12x128x256xbf16, #tpu.memory_space<vmem>>, vector<1x128x256xbf16>
    %330 = vector.shape_cast %329 : vector<1x128x256xbf16> to vector<128x256xbf16>
    %cst_426 = arith.constant dense<0.000000e+00> : vector<64x256xf32>
    %331 = tpu.matmul %328, %330, %cst_426 {dimension_numbers = #tpu.dot_dimension_numbers<[1], [0], [0], [1], [0, 0, 1, 1], [], []>} : vector<64x128xbf16>, vector<128x256xbf16>, vector<64x256xf32> -> vector<64x256xf32>
    %332 = arith.addf %326, %331 : vector<64x256xf32>
    %333 = vector.extract_strided_slice %332 {offsets = [0, 0], sizes = [64, 128], strides = [1, 1]} : vector<64x256xf32> to vector<64x128xf32>
    %334 = vector.extract_strided_slice %332 {offsets = [0, 128], sizes = [64, 128], strides = [1, 1]} : vector<64x256xf32> to vector<64x128xf32>
    %cst_427 = arith.constant 0.000000e+00 : f32
    %335 = vector.broadcast %cst_427 : f32 to vector<64x128xf32>
    %336 = arith.subf %335, %334 : vector<64x128xf32>
    %337 = math.exp %336 : vector<64x128xf32>
    %cst_428 = arith.constant 1.000000e+00 : f32
    %338 = vector.broadcast %cst_428 : f32 to vector<64x128xf32>
    %339 = arith.addf %338, %337 : vector<64x128xf32>
    %340 = tpu.reciprocal %339 {approx = true} : vector<64x128xf32> -> vector<64x128xf32>
    %341 = arith.mulf %333, %340 : vector<64x128xf32>
    %c0_429 = arith.constant 0 : index
    %c0_430 = arith.constant 0 : index
    %c0_431 = arith.constant 0 : index
    %342 = vector.load %arg6[%c0_429, %c0_430, %c0_431] : memref<1x64x128xf32, #tpu.memory_space<vmem>>, vector<1x64x128xf32>
    %343 = vector.shape_cast %342 : vector<1x64x128xf32> to vector<64x128xf32>
    %344 = vector.shape_cast %341 : vector<64x128xf32> to vector<1x64x128xf32>
    tpu.vector_store %arg6[%c0_429, %c0_430, %c0_431], %344 {strides = array<i32>} : memref<1x64x128xf32, #tpu.memory_space<vmem>>, vector<1x64x128xf32>,
    return
  }
  func.func @transform_0(%arg0: i32) -> (i32, i32, i32) {
    %c0_i32 = arith.constant 0 : i32
    %c0_i32_0 = arith.constant 0 : i32
    %c0_i32_1 = arith.constant 0 : i32
    return %arg0, %c0_i32, %c0_i32_0 : i32, i32, i32
  }
  func.func @transform_1(%arg0: i32) -> (i32, i32) {
    %c0_i32 = arith.constant 0 : i32
    %c0_i32_0 = arith.constant 0 : i32
    %c0_i32_1 = arith.constant 0 : i32
    return %c0_i32, %c0_i32_0 : i32, i32
  }
  func.func @transform_2(%arg0: i32) -> (i32, i32) {
    %c0_i32 = arith.constant 0 : i32
    %c0_i32_0 = arith.constant 0 : i32
    %c0_i32_1 = arith.constant 0 : i32
    return %c0_i32, %c0_i32_0 : i32, i32
  }
  func.func @transform_3(%arg0: i32) -> (i32, i32, i32) {
    %c0_i32 = arith.constant 0 : i32
    %c0_i32_0 = arith.constant 0 : i32
    %c0_i32_1 = arith.constant 0 : i32
    %c0_i32_2 = arith.constant 0 : i32
    return %c0_i32, %c0_i32_0, %c0_i32_1 : i32, i32, i32
  }
  func.func @transform_4(%arg0: i32) -> (i32, i32, i32) {
    %c0_i32 = arith.constant 0 : i32
    %c0_i32_0 = arith.constant 0 : i32
    %c0_i32_1 = arith.constant 0 : i32
    %c0_i32_2 = arith.constant 0 : i32
    return %c0_i32, %c0_i32_0, %c0_i32_1 : i32, i32, i32
  }
  func.func @transform_5(%arg0: i32) -> (i32, i32, i32) {
    %c0_i32 = arith.constant 0 : i32
    %c0_i32_0 = arith.constant 0 : i32
    %c0_i32_1 = arith.constant 0 : i32
    return %arg0, %c0_i32, %c0_i32_0 : i32, i32, i32
  }
}

</mosaic_0001>

<bundles_post_ra>
// kernel: _lambda_.1
= control target key start
LH: loop header
LB: loop body
LE: loop exit
PB: predicated region body
PF: predicated region fallthrough
CT: control target
= control target key end

     0   :  { %s3828_s18 = smov 0   ;;  %s4597_s0 = inlined_call_operand.vmem [shape: f32[2,1,32], index: 0, kind: input, shape index: {}]   ;;  %s4598_s1 = inlined_call_operand.vmem [shape: bf16[32,1024], index: 1, kind: input, shape index: {}]   ;;  %s4599_s2 = inlined_call_operand.vmem [shape: f32[1,1024], index: 2, kind: input, shape index: {}]   ;;  %s4600_s3 = inlined_call_operand.vmem [shape: bf16[12,128,256], index: 3, kind: input, shape index: {}]   ;;  %s4601_s4 = inlined_call_operand.vmem [shape: f32[4,1,256], index: 4, kind: input, shape index: {}]   ;;  %s4602_s5 = inlined_call_operand.vmem [shape: f32[2,64,128], index: 5, kind: output, shape index: {}]  }
   0x1 LB: > { %s2919_s19 = sadd.s32 4294967295, %s3794_s18   ;;  %p2923_p0 = scmp.ge.s32.totalorder %s3794_s18, 1  ;;  %s3794_s18 = sphi %s3828_s18, %s15_s18  }
   0x2   : > { %p185_p1 = scmp.lt.s32.totalorder %s3794_s18, 3 }
   0x4   : > { %p186_p2 = pnand %p2923_p0, %p185_p1 }
   0x5   : > { %v229_v0 = vld [vmem:[%s4598_s1] sm:$0xff] (!%p186_p2)  ;;  %v232_v2 = vld [vmem:[%s4598_s1 + $0x18] sm:$0xff] (!%p186_p2)  ;;  %p3845_p3 = scmp.lt.s32.totalorder (!%p186_p2), %s2919_s19, 1  ;;  %v225_v3 = vlaneseq (!%p186_p2)  ;;  %v3796_v9 = vmov (!%p186_p2), 0   ;;  %v230_v15 = vld [vmem:[%s4598_s1 + $0x8] sm:$0xff] (!%p186_p2)  ;;  %vm325_vm0 = vcmask (!%p186_p2), 261120  }
   0x6   : > { %189 = sbr.rel (%p186_p2) target bundleno = 1656 (0x678), region = 40  ;;  %v233_v1 = vld [vmem:[%s4598_s1 + $0x20] sm:$0xff] (!%p186_p2)  ;;  %v236_v6 = vld [vmem:[%s4598_s1 + $0x38] sm:$0xff] (!%p186_p2)  ;;  %361 = vmatprep.mubr.bf16.mxu0 (!%p186_p2), %v3796_v9  ;;  %484 = vmatprep.mubr.bf16.mxu1 (!%p186_p2), %v3796_v9  ;;  %v234_v17 = vld [vmem:[%s4598_s1 + $0x28] sm:$0xff] (!%p186_p2)  ;;  %v3797_v53 = vmov (!%p186_p2), 0.0  }
   0x7   : > { %v2927_v4 = vcombine.high (!%p186_p2), %v229_v0, %v233_v1  ;;  %v2926_v5 = vcombine.low (!%p186_p2), %v229_v0, %v233_v1  ;;  %v237_v7 = vld [vmem:[%s4598_s1 + $0x40] sm:$0xff] (!%p186_p2)  ;;  %v2933_v10 = vcombine.high (!%p186_p2), %v232_v2, %v236_v6  ;;  %v2932_v11 = vcombine.low (!%p186_p2), %v232_v2, %v236_v6  ;;  %v240_v13 = vld [vmem:[%s4598_s1 + $0x58] sm:$0xff] (!%p186_p2)  ;;  %v238_v23 = vld [vmem:[%s4598_s1 + $0x48] sm:$0xff] (!%p186_p2)  ;;  %571 = vst [vmem:[#allocation3] sm:$0x1] (!%p186_p2), %v3797_v53 }
   0x8   : > { %v241_v8 = vld [vmem:[%s4598_s1 + $0x60] sm:$0xff] (!%p186_p2)  ;;  %v244_v14 = vld [vmem:[%s4598_s1 + $0x78] sm:$0xff] (!%p186_p2)  ;;  %v3876_v18 = vshrl.u32 (!%p186_p2), %v225_v3, 7  ;;  %v2929_v21 = vcombine.high (!%p186_p2), %v230_v15, %v234_v17  ;;  %v242_v24 = vld [vmem:[%s4598_s1 + $0x68] sm:$0xff] (!%p186_p2)  ;;  %v2928_v28 = vcombine.low (!%p186_p2), %v230_v15, %v234_v17  ;;  %572 = vst [vmem:[#allocation3 + $0x9] sm:$0x1] (!%p186_p2), %v3797_v53 }
   0x9   : > { %v2935_v12 = vcombine.high (!%p186_p2), %v237_v7, %v241_v8  ;;  %329 = vmatprep.subr.bf16.mxu0 (!%p186_p2), %v2927_v4  ;;  %v2941_v16 = vcombine.high (!%p186_p2), %v240_v13, %v244_v14  ;;  %452 = vmatprep.subr.bf16.mxu1 (!%p186_p2), %v2933_v10  ;;  %v2934_v19 = vcombine.low (!%p186_p2), %v237_v7, %v241_v8  ;;  %v231_v29 = vld [vmem:[%s4598_s1 + $0x10] sm:$0xff] (!%p186_p2)  ;;  %v3426_v40 = vld [vmem:[%s4600_s3 + $0x4] ss:$8 sps:$4 sm:$0xff] (!%p186_p2)   ;;  %v3424_v41 = vld [vmem:[%s4600_s3] ss:$8 sps:$4 sm:$0xff] (!%p186_p2)  }
   0xa   : > { %330 = vmatpush1.bf16.msra.mxu0 (!%p186_p2), %v2926_v5  ;;  %453 = vmatpush1.bf16.msra.mxu1 (!%p186_p2), %v2932_v11  ;;  %v2940_v20 = vcombine.low (!%p186_p2), %v240_v13, %v244_v14  ;;  %v3889_v26 = vsub.s32 (!%p186_p2), 0, %v3876_v18  ;;  %v235_v30 = vld [vmem:[%s4598_s1 + $0x30] sm:$0xff] (!%p186_p2)  ;;  %v2937_v32 = vcombine.high (!%p186_p2), %v238_v23, %v242_v24  ;;  %v2936_v33 = vcombine.low (!%p186_p2), %v238_v23, %v242_v24  ;;  %v3432_v44 = vld [vmem:[%s4600_s3 + $0x24] ss:$8 sps:$4 sm:$0xff] (!%p186_p2)   ;;  %v3430_v45 = vld [vmem:[%s4600_s3 + $0x20] ss:$8 sps:$4 sm:$0xff] (!%p186_p2)  }
   0xb   : > { %331 = vmatprep.subr.bf16.mxu0 (!%p186_p2), %v2935_v12  ;;  %454 = vmatprep.subr.bf16.mxu1 (!%p186_p2), %v2941_v16  ;;  %v239_v34 = vld [vmem:[%s4598_s1 + $0x50] sm:$0xff] (!%p186_p2)  ;;  %v2931_v36 = vcombine.high (!%p186_p2), %v231_v29, %v235_v30  ;;  %v2930_v37 = vcombine.low (!%p186_p2), %v231_v29, %v235_v30  ;;  %v3438_v48 = vld [vmem:[%s4600_s3 + $0x44] ss:$8 sps:$4 sm:$0xff] (!%p186_p2)   ;;  %v3436_v49 = vld [vmem:[%s4600_s3 + $0x40] ss:$8 sps:$4 sm:$0xff] (!%p186_p2)   ;;  %v521_v58 = vsub.s32 (!%p186_p2), 6, %v3876_v18 }
   0xc   : > { %v243_v35 = vld [vmem:[%s4598_s1 + $0x70] sm:$0xff] (!%p186_p2)  ;;  %v3444_v52 = vld [vmem:[%s4600_s3 + $0x64] ss:$8 sps:$4 sm:$0xff] (!%p186_p2)   ;;  %1030 = vst [vmem:[#allocation3 + $0x11] sm:$0x1] (!%p186_p2), %v3797_v53  ;;  %v525_v60 = vsub.s32 (!%p186_p2), 7, %v3876_v18 }
   0xd   : > { %s4605_s19 = smov (!%p3845_p3, %s2919_s19), 1  ;;  %v2939_v38 = vcombine.high %v239_v34, %v243_v35  ;;  %v2938_v39 = vcombine.low %v239_v34, %v243_v35  ;;  %v3429_v42 = vld [vmem:[%s4600_s3 + $0x14] ss:$8 sps:$4 sm:$0xff]   ;;  %v3427_v43 = vld [vmem:[%s4600_s3 + $0x10] ss:$8 sps:$4 sm:$0xff]   ;;  %v3972_v59 = vld [vmem:[%s4599_s2] sm:$0xff] }
   0xe   : > { %s213_s20 = scalar_lea.vmem %s4597_s0, %s4605_s19  ;;  %332 = vmatpush1.bf16.msra.mxu0 %v2934_v19  ;;  %455 = vmatpush1.bf16.msra.mxu1 %v2940_v20  ;;  %v3435_v46 = vld [vmem:[%s4600_s3 + $0x34] ss:$8 sps:$4 sm:$0xff]   ;;  %v3433_v47 = vld [vmem:[%s4600_s3 + $0x30] ss:$8 sps:$4 sm:$0xff]   ;;  %1524 = vst [vmem:[#allocation3 + $0x21] sm:$0x1] %v3797_v53  ;;  %v522_v61 = vrot.slane %v3972_v59, %v521_v58  ;;  %v526_v62 = vrot.slane %v3972_v59, %v525_v60 }
   0xf   : > { %v220_v22 = vld [vmem:[%s213_s20] sm:$0x1]  ;;  %370 = vmatprep.subr.bf16.mxu0 %v2929_v21  ;;  %v3441_v50 = vld [vmem:[%s4600_s3 + $0x54] ss:$8 sps:$4 sm:$0xff]   ;;  %v3439_v51 = vld [vmem:[%s4600_s3 + $0x50] ss:$8 sps:$4 sm:$0xff]  }
  0x10   : > { %v221_v25 = vpack.c.bf16 %v220_v22, %v220_v22  ;;  %2107 = vst [vmem:[#allocation3 + $0x41] sm:$0x1] %v3797_v53  ;;  %v3442_v54 = vld [vmem:[%s4600_s3 + $0x60] ss:$8 sps:$4 sm:$0xff]   ;;  %v3447_v55 = vld [vmem:[%s4600_s3 + $0x74] ss:$8 sps:$4 sm:$0xff]  }
  0x11   : > { %v3445_v56 = vld [vmem:[%s4600_s3 + $0x70] ss:$8 sps:$4 sm:$0xff]   ;;  %v3450_v57 = vld [vmem:[%s4600_s3 + $0x84] ss:$8 sps:$4 sm:$0xff]   ;;  %v513_v16 = vsub.s32 4, %v3876_v18  ;;  %v517_v19 = vsub.s32 5, %v3876_v18 }
  0x12   : > { %v223_v27 = vpack.i.b16 %v221_v25, %v221_v25  ;;  %s3319_s11 = sshll.u32 %s4605_s19, 6 }
  0x13   : > { %v514_v21 = vrot.slane %v3972_v59, %v513_v16  ;;  %v518_v22 = vrot.slane %v3972_v59, %v517_v19  ;;  %v3466_v16 = vld [vmem:[%s4600_s3 + $0xe0] ss:$8 sps:$4 sm:$0xff]   ;;  %v3469_v19 = vld [vmem:[%s4600_s3 + $0xf0] ss:$8 sps:$4 sm:$0xff]   ;;  %s4580_s14 = scalar_lea.vmem %s4602_s5, %s3319_s11 }
  0x14   : > { %v228_v31 = vrot.slane %v223_v27, %v3889_v26 }
  0x16   : > { %2942 = vmatmul.mubr.msk.bf16.vlgmr.msra.gmra.mrb[0].mxu0 %vm325_vm0, %v228_v31  ;;  %2945 = vmatmul.mubr.msk.bf16.vlgmr.msra.gmra.mrb[0].mxu1 %vm325_vm0, %v228_v31 }
  0x17   : > { %371 = vmatpush1.bf16.msra.mxu0 %v2928_v28  ;;  %402 = vmatprep.mubr.bf16.mxu0 %v3796_v9 }
  0x18   : > { %372 = vmatprep.subr.bf16.mxu0 %v2937_v32  ;;  %1189 = vmatprep.mubr.bf16.mxu1 %v3796_v9 }
  0x1b   : > { %373 = vmatpush1.bf16.msra.mxu0 %v2936_v33 }
  0x1c   : > { %411 = vmatprep.subr.bf16.mxu0 %v2931_v36  ;;  %v505_v36 = vsub.s32 2, %v3876_v18 }
  0x1e   : > { %2943 = vmatmul.mubr.msk.bf16.vlgmr.msra.gmra.mrb[4].mxu0 %vm325_vm0, %v228_v31 }
  0x1f   : > { %412 = vmatpush1.bf16.msra.mxu0 %v2930_v37  ;;  %443 = vmatprep.mubr.bf16.mxu0 %v3796_v9 }
  0x20   : > { %413 = vmatprep.subr.bf16.mxu0 %v2939_v38  ;;  %v509_v38 = vsub.s32 3, %v3876_v18 }
  0x23   : > { %414 = vmatpush1.bf16.msra.mxu0 %v2938_v39 }
  0x24   : > { %684 = vmatprep.subr.bf16.mxu0 %v3426_v40  ;;  %v506_v40 = vrot.slane %v3972_v59, %v505_v36  ;;  %v3490_v36 = vld [vmem:[%s4600_s3 + $0x160] ss:$8 sps:$4 sm:$0xff]  }
  0x26   : > { %2944 = vmatmul.mubr.msk.bf16.vlgmr.msra.gmra.mrb[8].mxu0 %vm325_vm0, %v228_v31 }
  0x27   : > { %716 = vmatprep.mubr.bf16.mxu0 %v3796_v9  ;;  %685 = vmatpush1.bf16.msra.mxu0 %v3424_v41  ;;  %v510_v41 = vrot.slane %v3972_v59, %v509_v38  ;;  %v3493_v38 = vld [vmem:[%s4600_s3 + $0x170] ss:$8 sps:$4 sm:$0xff]  }
  0x28   : > { %686 = vmatprep.subr.bf16.mxu0 %v3429_v42 }
  0x2b   : > { %687 = vmatpush1.bf16.msra.mxu0 %v3427_v43 }
  0x2c   : > { %688 = vmatprep.subr.bf16.mxu0 %v3432_v44 }
  0x2f   : > { %689 = vmatpush1.bf16.msra.mxu0 %v3430_v45 }
  0x30   : > { %690 = vmatprep.subr.bf16.mxu0 %v3435_v46 }
  0x33   : > { %691 = vmatpush1.bf16.msra.mxu0 %v3433_v47 }
  0x34   : > { %692 = vmatprep.subr.bf16.mxu0 %v3438_v48 }
  0x37   : > { %693 = vmatpush1.bf16.msra.mxu0 %v3436_v49 }
  0x38   : > { %694 = vmatprep.subr.bf16.mxu0 %v3441_v50 }
  0x3b   : > { %695 = vmatpush1.bf16.msra.mxu0 %v3439_v51 }
  0x3c   : > { %696 = vmatprep.subr.bf16.mxu0 %v3444_v52  ;;  %v3990_v52 = vsub.s32 1, %v3876_v18 }
  0x3f   : > { %697 = vmatpush1.bf16.msra.mxu0 %v3442_v54 }
  0x40   : > { %698 = vmatprep.subr.bf16.mxu0 %v3447_v55  ;;  %v498_v55 = vrot.slane %v3972_v59, %v3889_v26 }
  0x43   : > { %699 = vmatpush1.bf16.msra.mxu0 %v3445_v56 }
  0x44   : > { %837 = vmatprep.subr.bf16.mxu0 %v3450_v57  ;;  %v502_v57 = vrot.slane %v3972_v59, %v3990_v52  ;;  %v3448_v59 = vld [vmem:[%s4600_s3 + $0x80] ss:$8 sps:$4 sm:$0xff]  }
  0xe9   : > { %v3977_v63 = vpop.f32.mrb[0].mxu0  ;;  %v486_v0 = vpop.f32.mrb[0].mxu1 }
  0xea   : > { %v541_v1 = vadd.f32 %v522_v61, %v486_v0  ;;  %v3979_v2 = vpop.f32.mrb[1].mxu0  ;;  %v488_v3 = vpop.f32.mrb[1].mxu1  ;;  %v535_v58 = vadd.f32 %v498_v55, %v3977_v63  ;;  %v3516_v55 = vld [vmem:[%s4600_s3 + $0x1e4] ss:$8 sps:$4 sm:$0xff]  }
  0xeb   : > { %v542_v4 = vadd.f32 %v526_v62, %v488_v3  ;;  %v367_v5 = vpop.f32.mrb[2].mxu0  ;;  %v490_v6 = vpop.f32.mrb[2].mxu1  ;;  %v536_v61 = vadd.f32 %v502_v57, %v3979_v2  ;;  %v3453_v2 = vld [vmem:[%s4600_s3 + $0x94] ss:$8 sps:$4 sm:$0xff]  }
  0xec   : > { %v545_v7 = vsub.f32 0.0, %v541_v1  ;;  %v368_v8 = vpop.f32.mrb[3].mxu0  ;;  %v491_v10 = vpop.f32.mrb[3].mxu1  ;;  %v3451_v5 = vld [vmem:[%s4600_s3 + $0x90] ss:$8 sps:$4 sm:$0xff]  }
  0xed   : > { %v546_v11 = vsub.f32 0.0, %v542_v4  ;;  %v3456_v6 = vld [vmem:[%s4600_s3 + $0xa4] ss:$8 sps:$4 sm:$0xff]   ;;  %v3459_v8 = vld [vmem:[%s4600_s3 + $0xb4] ss:$8 sps:$4 sm:$0xff]  }
  0xee   : > { %v551_v12 = vmul.f32 1.442695, %v545_v7  ;;  %v3454_v7 = vld [vmem:[%s4600_s3 + $0xa0] ss:$8 sps:$4 sm:$0xff]   ;;  %v3457_v10 = vld [vmem:[%s4600_s3 + $0xb0] ss:$8 sps:$4 sm:$0xff]  }
  0xef   : > { %v553_v13 = vmul.f32 1.442695, %v546_v11  ;;  %v3462_v11 = vld [vmem:[%s4600_s3 + $0xc4] ss:$8 sps:$4 sm:$0xff]   ;;  %v3519_v57 = vld [vmem:[%s4600_s3 + $0x1f4] ss:$8 sps:$4 sm:$0xff]  }
  0xf0   : > { %3712 = vpow2.f32 %v551_v12  ;;  %v3460_v12 = vld [vmem:[%s4600_s3 + $0xc0] ss:$8 sps:$4 sm:$0xff]  }
  0xf1   : > { %3714 = vpow2.f32 %v553_v13  ;;  %v404_v14 = vpop.f32.mrb[4].mxu0  ;;  %v3465_v13 = vld [vmem:[%s4600_s3 + $0xd4] ss:$8 sps:$4 sm:$0xff]  }
  0xf2   : > { %v406_v15 = vpop.f32.mrb[5].mxu0  ;;  %v537_v42 = vadd.f32 %v506_v40, %v404_v14  ;;  %v3463_v14 = vld [vmem:[%s4600_s3 + $0xd0] ss:$8 sps:$4 sm:$0xff]  }
  0xf3   : > { %v408_v17 = vpop.f32.mrb[6].mxu0  ;;  %v538_v44 = vadd.f32 %v510_v41, %v406_v15  ;;  %v3468_v15 = vld [vmem:[%s4600_s3 + $0xe4] ss:$8 sps:$4 sm:$0xff]  }
  0xf4   : > { %v409_v20 = vpop.f32.mrb[7].mxu0  ;;  %v3471_v17 = vld [vmem:[%s4600_s3 + $0xf4] ss:$8 sps:$4 sm:$0xff]   ;;  %v3498_v41 = vld [vmem:[%s4600_s3 + $0x184] ss:$8 sps:$4 sm:$0xff]  }
  0xf5   : > { %v3474_v20 = vld [vmem:[%s4600_s3 + $0x104] ss:$8 sps:$4 sm:$0xff]   ;;  %1157 = vmatprep.subr.bf16.mxu1 %v3498_v41 }
  0xf9   : > { %v445_v23 = vpop.f32.mrb[8].mxu0 }
  0xfa   : > { %v3713_v24 = vpop.eup %3712  ;;  %v539_v25 = vadd.f32 %v514_v21, %v445_v23  ;;  %v447_v27 = vpop.f32.mrb[9].mxu0 }
  0xfb   : > { %v3715_v28 = vpop.eup %3714  ;;  %v557_v29 = vadd.f32 1.0, %v3713_v24  ;;  %v540_v30 = vadd.f32 %v518_v22, %v447_v27  ;;  %v449_v31 = vpop.f32.mrb[10].mxu0  ;;  %v3472_v22 = vld [vmem:[%s4600_s3 + $0x100] ss:$8 sps:$4 sm:$0xff]   ;;  %v3477_v24 = vld [vmem:[%s4600_s3 + $0x114] ss:$8 sps:$4 sm:$0xff]  }
  0xfc   : > { %v558_v32 = vadd.f32 1.0, %v3715_v28  ;;  %v543_v33 = vsub.f32 0.0, %v539_v25  ;;  %v450_v34 = vpop.f32.mrb[11].mxu0  ;;  %v3475_v25 = vld [vmem:[%s4600_s3 + $0x110] ss:$8 sps:$4 sm:$0xff]  }
  0xfd   : > { %3716 = vrcp.f32 %v557_v29  ;;  %v544_v35 = vsub.f32 0.0, %v540_v30  ;;  %v3480_v27 = vld [vmem:[%s4600_s3 + $0x124] ss:$8 sps:$4 sm:$0xff]   ;;  %v3478_v28 = vld [vmem:[%s4600_s3 + $0x120] ss:$8 sps:$4 sm:$0xff]  }
  0xfe   : > { %3718 = vrcp.f32 %v558_v32  ;;  %v547_v37 = vmul.f32 1.442695, %v543_v33  ;;  %v3483_v29 = vld [vmem:[%s4600_s3 + $0x134] ss:$8 sps:$4 sm:$0xff]   ;;  %v3481_v30 = vld [vmem:[%s4600_s3 + $0x130] ss:$8 sps:$4 sm:$0xff]  }
  0xff   : > { %v549_v39 = vmul.f32 1.442695, %v544_v35  ;;  %v3486_v31 = vld [vmem:[%s4600_s3 + $0x144] ss:$8 sps:$4 sm:$0xff]   ;;  %v3484_v32 = vld [vmem:[%s4600_s3 + $0x140] ss:$8 sps:$4 sm:$0xff]  }
 0x100   : > { %3720 = vpow2.f32 %v547_v37  ;;  %v3489_v33 = vld [vmem:[%s4600_s3 + $0x154] ss:$8 sps:$4 sm:$0xff]   ;;  %v3487_v34 = vld [vmem:[%s4600_s3 + $0x150] ss:$8 sps:$4 sm:$0xff]   ;;  %v3492_v35 = vld [vmem:[%s4600_s3 + $0x164] ss:$8 sps:$4 sm:$0xff]  }
 0x101   : > { %3722 = vpow2.f32 %v549_v39  ;;  %v3495_v37 = vld [vmem:[%s4600_s3 + $0x174] ss:$8 sps:$4 sm:$0xff]  }
 0x107   : > { %v3717_v43 = vpop.eup %3716 }
 0x108   : > { %v3719_v45 = vpop.eup %3718  ;;  %v565_v46 = vmul.f32 %v3717_v43, %v537_v42  ;;  %v3496_v42 = vld [vmem:[%s4600_s3 + $0x180] ss:$8 sps:$4 sm:$0xff]   ;;  %v3501_v43 = vld [vmem:[%s4600_s3 + $0x194] ss:$8 sps:$4 sm:$0xff]  }
 0x109   : > { %v566_v47 = vmul.f32 %v3719_v45, %v538_v44  ;;  %1158 = vmatpush1.bf16.msra.mxu1 %v3496_v42  ;;  %v3499_v44 = vld [vmem:[%s4600_s3 + $0x190] ss:$8 sps:$4 sm:$0xff]   ;;  %v3504_v45 = vld [vmem:[%s4600_s3 + $0x1a4] ss:$8 sps:$4 sm:$0xff]   ;;  %v3544_v42 = vld [vmem:[%s4600_s3 + $0x280] ss:$8 sps:$4 sm:$0xff]  }
 0x10a   : > { %v3721_v48 = vpop.eup %3720  ;;  %569 = vst [vmem:[#allocation2 + $0x2] sm:$0x1] %v565_v46  ;;  %1159 = vmatprep.subr.bf16.mxu1 %v3501_v43  ;;  %v3502_v46 = vld [vmem:[%s4600_s3 + $0x1a0] ss:$8 sps:$4 sm:$0xff]  }
 0x10b   : > { %v3723_v49 = vpop.eup %3722  ;;  %570 = vst [vmem:[#allocation2 + $0x3] sm:$0x1] %v566_v47  ;;  %v555_v50 = vadd.f32 1.0, %v3721_v48  ;;  %v3507_v47 = vld [vmem:[%s4600_s3 + $0x1b4] ss:$8 sps:$4 sm:$0xff]  }
 0x10c   : > { %v556_v51 = vadd.f32 1.0, %v3723_v49  ;;  %v3505_v48 = vld [vmem:[%s4600_s3 + $0x1b0] ss:$8 sps:$4 sm:$0xff]   ;;  %v3510_v49 = vld [vmem:[%s4600_s3 + $0x1c4] ss:$8 sps:$4 sm:$0xff]  }
 0x10d   : > { %3724 = vrcp.f32 %v555_v50  ;;  %1160 = vmatpush1.bf16.msra.mxu1 %v3499_v44  ;;  %v3508_v50 = vld [vmem:[%s4600_s3 + $0x1c0] ss:$8 sps:$4 sm:$0xff]   ;;  %v3549_v44 = vld [vmem:[%s4600_s3 + $0x294] ss:$8 sps:$4 sm:$0xff]  }
 0x10e   : > { %3726 = vrcp.f32 %v556_v51  ;;  %1161 = vmatprep.subr.bf16.mxu1 %v3504_v45  ;;  %v3513_v51 = vld [vmem:[%s4600_s3 + $0x1d4] ss:$8 sps:$4 sm:$0xff]   ;;  %v3547_v45 = vld [vmem:[%s4600_s3 + $0x290] ss:$8 sps:$4 sm:$0xff]  }
 0x111   : > { %v579_v54 = vld [vmem:[#allocation2 + $0x2] sm:$0x1]  ;;  %1162 = vmatpush1.bf16.msra.mxu1 %v3502_v46  ;;  %v3552_v46 = vld [vmem:[%s4600_s3 + $0x2a4] ss:$8 sps:$4 sm:$0xff]  }
 0x112   : > { %580 = vst [vmem:[#allocation3 + $0x5] sm:$0x1] %v579_v54  ;;  %581 = vst [vmem:[#allocation3 + $0x6] sm:$0x1] %v579_v54  ;;  %v582_v56 = vld [vmem:[#allocation2 + $0x3] sm:$0x1]  ;;  %1163 = vmatprep.subr.bf16.mxu1 %v3507_v47 }
 0x113   : > { %583 = vst [vmem:[#allocation3 + $0x7] sm:$0x1] %v582_v56  ;;  %584 = vst [vmem:[#allocation3 + $0x8] sm:$0x1] %v582_v56  ;;  %v3511_v54 = vld [vmem:[%s4600_s3 + $0x1d0] ss:$8 sps:$4 sm:$0xff]  }
 0x114   : > { %v3514_v56 = vld [vmem:[%s4600_s3 + $0x1e0] ss:$8 sps:$4 sm:$0xff]  }
 0x115   : > { %1164 = vmatpush1.bf16.msra.mxu1 %v3505_v48  ;;  %v3550_v47 = vld [vmem:[%s4600_s3 + $0x2a0] ss:$8 sps:$4 sm:$0xff]   ;;  %v3555_v48 = vld [vmem:[%s4600_s3 + $0x2b4] ss:$8 sps:$4 sm:$0xff]  }
 0x116   : > { %1165 = vmatprep.subr.bf16.mxu1 %v3510_v49  ;;  %v3553_v49 = vld [vmem:[%s4600_s3 + $0x2b0] ss:$8 sps:$4 sm:$0xff]  }
 0x117   : > { %v3725_v60 = vpop.eup %3724 }
 0x118   : > { %v3727_v62 = vpop.eup %3726  ;;  %v563_v18 = vmul.f32 %v3725_v60, %v535_v58  ;;  %v3517_v58 = vld [vmem:[%s4600_s3 + $0x1f0] ss:$8 sps:$4 sm:$0xff]   ;;  %v3522_v60 = vld [vmem:[%s4600_s3 + $0x204] ss:$8 sps:$4 sm:$0xff]  }
 0x119   : > { %v564_v0 = vmul.f32 %v3727_v62, %v536_v61  ;;  %1166 = vmatpush1.bf16.msra.mxu1 %v3508_v50  ;;  %v585_v61 = vld [vmem:[%s4601_s4] sm:$0x3]  ;;  %v3558_v50 = vld [vmem:[%s4600_s3 + $0x2c4] ss:$8 sps:$4 sm:$0xff]  }
 0x11a   : > { %567 = vst [vmem:[#allocation2] sm:$0x1] %v563_v18  ;;  %1167 = vmatprep.subr.bf16.mxu1 %v3513_v51  ;;  %v733_v62 = vrot.slane %v585_v61, %v3990_v52  ;;  %v3556_v51 = vld [vmem:[%s4600_s3 + $0x2c0] ss:$8 sps:$4 sm:$0xff]  }
 0x11b   : > { %568 = vst [vmem:[#allocation2 + $0x1] sm:$0x1] %v564_v0 }
 0x11d   : > { %1168 = vmatpush1.bf16.msra.mxu1 %v3511_v54  ;;  %v3561_v54 = vld [vmem:[%s4600_s3 + $0x2d4] ss:$8 sps:$4 sm:$0xff]  }
 0x11e   : > { %1169 = vmatprep.subr.bf16.mxu1 %v3516_v55  ;;  %v3559_v55 = vld [vmem:[%s4600_s3 + $0x2d0] ss:$8 sps:$4 sm:$0xff]  }
 0x121   : > { %v573_v1 = vld [vmem:[#allocation2] sm:$0x1]  ;;  %1170 = vmatpush1.bf16.msra.mxu1 %v3514_v56  ;;  %v3564_v56 = vld [vmem:[%s4600_s3 + $0x2e4] ss:$8 sps:$4 sm:$0xff]  }
 0x122   : > { %574 = vst [vmem:[#allocation3 + $0x1] sm:$0x1] %v573_v1  ;;  %575 = vst [vmem:[#allocation3 + $0x2] sm:$0x1] %v573_v1  ;;  %v576_v3 = vld [vmem:[#allocation2 + $0x1] sm:$0x1]  ;;  %1171 = vmatprep.subr.bf16.mxu1 %v3519_v57 }
 0x123   : > { %577 = vst [vmem:[#allocation3 + $0x3] sm:$0x1] %v576_v3  ;;  %578 = vst [vmem:[#allocation3 + $0x4] sm:$0x1] %v576_v3  ;;  %v3562_v57 = vld [vmem:[%s4600_s3 + $0x2e0] ss:$8 sps:$4 sm:$0xff]  }
 0x125   : > { %1172 = vmatpush1.bf16.msra.mxu1 %v3517_v58  ;;  %v3567_v58 = vld [vmem:[%s4600_s3 + $0x2f4] ss:$8 sps:$4 sm:$0xff]  }
 0x126   : > { %1315 = vmatprep.subr.bf16.mxu1 %v3522_v60  ;;  %v3565_v60 = vld [vmem:[%s4600_s3 + $0x2f0] ss:$8 sps:$4 sm:$0xff]  }
 0x12a   : > { %v586_v4 = vld [vmem:[#allocation3] sm:$0xff] }
 0x12b   : > { %1029 = vst [vmem:[#allocation3] sm:$0x1] %v3797_v53  ;;  %v587_v63 = vpack.c.bf16 %v586_v4, %v586_v4  ;;  %v738_v21 = vld [vmem:[#allocation3 + $0x1] sm:$0xff] }
 0x12c   : > { %v739_v23 = vpack.c.bf16 %v738_v21, %v738_v21  ;;  %v880_v39 = vld [vmem:[#allocation3 + $0x2] sm:$0xff] }
 0x12d   : > { %717 = vmatmul.mubr.bf16.vlgmr.msra.gmra.mrb[12].mxu0 %v587_v63  ;;  %v881_v40 = vpack.c.bf16 %v880_v39, %v880_v39  ;;  %v3520_v21 = vld [vmem:[%s4600_s3 + $0x200] ss:$8 sps:$4 sm:$0xff]   ;;  %v3546_v39 = vld [vmem:[%s4600_s3 + $0x284] ss:$8 sps:$4 sm:$0xff]  }
 0x12e   : > { %838 = vmatpush1.bf16.msra.mxu0 %v3448_v59  ;;  %869 = vmatprep.mubr.bf16.mxu0 %v3796_v9 }
 0x12f   : > { %839 = vmatprep.subr.bf16.mxu0 %v3453_v2 }
 0x132   : > { %840 = vmatpush1.bf16.msra.mxu0 %v3451_v5 }
 0x133   : > { %841 = vmatprep.subr.bf16.mxu0 %v3456_v6  ;;  %v729_v6 = vrot.slane %v585_v61, %v3889_v26 }
 0x136   : > { %842 = vmatpush1.bf16.msra.mxu0 %v3454_v7 }
 0x137   : > { %843 = vmatprep.subr.bf16.mxu0 %v3459_v8 }
 0x13a   : > { %844 = vmatpush1.bf16.msra.mxu0 %v3457_v10 }
 0x13b   : > { %845 = vmatprep.subr.bf16.mxu0 %v3462_v11 }
 0x13e   : > { %846 = vmatpush1.bf16.msra.mxu0 %v3460_v12 }
 0x13f   : > { %847 = vmatprep.subr.bf16.mxu0 %v3465_v13 }
 0x142   : > { %848 = vmatpush1.bf16.msra.mxu0 %v3463_v14 }
 0x143   : > { %849 = vmatprep.subr.bf16.mxu0 %v3468_v15 }
 0x146   : > { %850 = vmatpush1.bf16.msra.mxu0 %v3466_v16 }
 0x147   : > { %851 = vmatprep.subr.bf16.mxu0 %v3471_v17 }
 0x14a   : > { %852 = vmatpush1.bf16.msra.mxu0 %v3469_v19 }
 0x14b   : > { %979 = vmatprep.subr.bf16.mxu0 %v3474_v20 }
 0x14d   : > { %870 = vmatmul.mubr.bf16.vlgmr.msra.gmra.mrb[12].mxu0 %v739_v23 }
 0x14e   : > { %980 = vmatpush1.bf16.msra.mxu0 %v3472_v22  ;;  %1011 = vmatprep.mubr.bf16.mxu0 %v3796_v9 }
 0x14f   : > { %981 = vmatprep.subr.bf16.mxu0 %v3477_v24  ;;  %v3525_v24 = vld [vmem:[%s4600_s3 + $0x214] ss:$8 sps:$4 sm:$0xff]  }
 0x152   : > { %982 = vmatpush1.bf16.msra.mxu0 %v3475_v25  ;;  %v3523_v25 = vld [vmem:[%s4600_s3 + $0x210] ss:$8 sps:$4 sm:$0xff]  }
 0x153   : > { %983 = vmatprep.subr.bf16.mxu0 %v3480_v27  ;;  %v3528_v27 = vld [vmem:[%s4600_s3 + $0x224] ss:$8 sps:$4 sm:$0xff]  }
 0x156   : > { %984 = vmatpush1.bf16.msra.mxu0 %v3478_v28  ;;  %v3526_v28 = vld [vmem:[%s4600_s3 + $0x220] ss:$8 sps:$4 sm:$0xff]  }
 0x157   : > { %985 = vmatprep.subr.bf16.mxu0 %v3483_v29  ;;  %v3531_v29 = vld [vmem:[%s4600_s3 + $0x234] ss:$8 sps:$4 sm:$0xff]  }
 0x15a   : > { %986 = vmatpush1.bf16.msra.mxu0 %v3481_v30  ;;  %v3529_v30 = vld [vmem:[%s4600_s3 + $0x230] ss:$8 sps:$4 sm:$0xff]  }
 0x15b   : > { %987 = vmatprep.subr.bf16.mxu0 %v3486_v31  ;;  %v3534_v31 = vld [vmem:[%s4600_s3 + $0x244] ss:$8 sps:$4 sm:$0xff]  }
 0x15e   : > { %988 = vmatpush1.bf16.msra.mxu0 %v3484_v32  ;;  %v3532_v32 = vld [vmem:[%s4600_s3 + $0x240] ss:$8 sps:$4 sm:$0xff]  }
 0x15f   : > { %989 = vmatprep.subr.bf16.mxu0 %v3489_v33  ;;  %v3537_v33 = vld [vmem:[%s4600_s3 + $0x254] ss:$8 sps:$4 sm:$0xff]  }
 0x162   : > { %990 = vmatpush1.bf16.msra.mxu0 %v3487_v34  ;;  %v3535_v34 = vld [vmem:[%s4600_s3 + $0x250] ss:$8 sps:$4 sm:$0xff]  }
 0x163   : > { %991 = vmatprep.subr.bf16.mxu0 %v3492_v35  ;;  %v3540_v35 = vld [vmem:[%s4600_s3 + $0x264] ss:$8 sps:$4 sm:$0xff]  }
 0x166   : > { %992 = vmatpush1.bf16.msra.mxu0 %v3490_v36  ;;  %v3538_v36 = vld [vmem:[%s4600_s3 + $0x260] ss:$8 sps:$4 sm:$0xff]  }
 0x167   : > { %993 = vmatprep.subr.bf16.mxu0 %v3495_v37  ;;  %v3543_v37 = vld [vmem:[%s4600_s3 + $0x274] ss:$8 sps:$4 sm:$0xff]  }
 0x16a   : > { %994 = vmatpush1.bf16.msra.mxu0 %v3493_v38  ;;  %v3541_v38 = vld [vmem:[%s4600_s3 + $0x270] ss:$8 sps:$4 sm:$0xff]  }
 0x16d   : > { %1012 = vmatmul.mubr.bf16.vlgmr.msra.gmra.mrb[12].mxu0 %v881_v40 }
 0x16e   : > { %1710 = vmatprep.mubr.bf16.mxu0 %v3796_v9 }
 0x240   : > { %v1013_v18 = vpop.f32.mrb[12].mxu0 }
 0x241   : > { %v1015_v0 = vpop.f32.mrb[13].mxu0  ;;  %v3320_v7 = vadd.f32 %v1013_v18, %v729_v6  ;;  %v3582_v6 = vld [vmem:[%s4600_s3 + $0x344] ss:$8 sps:$4 sm:$0xff]  }
 0x242   : > { %v3321_v1 = vadd.f32 %v1015_v0, %v733_v62  ;;  %v1017_v3 = vpop.f32.mrb[14].mxu0  ;;  %v3570_v0 = vld [vmem:[%s4600_s3 + $0x304] ss:$8 sps:$4 sm:$0xff]  }
 0x243   : > { %v1018_v4 = vpop.f32.mrb[15].mxu0  ;;  %1678 = vmatprep.subr.bf16.mxu0 %v3570_v0  ;;  %v3573_v3 = vld [vmem:[%s4600_s3 + $0x314] ss:$8 sps:$4 sm:$0xff]  }
 0x244   : > { %v1022_v59 = vsub.f32 0.0, %v3321_v1  ;;  %v3568_v1 = vld [vmem:[%s4600_s3 + $0x300] ss:$8 sps:$4 sm:$0xff]   ;;  %v3571_v4 = vld [vmem:[%s4600_s3 + $0x310] ss:$8 sps:$4 sm:$0xff]  }
 0x245   : > { %1679 = vmatpush1.bf16.msra.mxu0 %v3568_v1  ;;  %v3597_v0 = vld [vmem:[%s4600_s3 + $0x394] ss:$8 sps:$4 sm:$0xff]   ;;  %v3595_v1 = vld [vmem:[%s4600_s3 + $0x390] ss:$8 sps:$4 sm:$0xff]  }
 0x246   : > { %v1023_v63 = vmul.f32 1.442695, %v1022_v59  ;;  %1680 = vmatprep.subr.bf16.mxu0 %v3573_v3  ;;  %v3576_v59 = vld [vmem:[%s4600_s3 + $0x324] ss:$8 sps:$4 sm:$0xff]  }
 0x248   : > { %3728 = vpow2.f32 %v1023_v63  ;;  %v3574_v63 = vld [vmem:[%s4600_s3 + $0x320] ss:$8 sps:$4 sm:$0xff]  }
 0x249   : > { %1681 = vmatpush1.bf16.msra.mxu0 %v3571_v4 }
 0x24a   : > { %1682 = vmatprep.subr.bf16.mxu0 %v3576_v59  ;;  %v3598_v59 = vld [vmem:[%s4600_s3 + $0x3a0] ss:$8 sps:$4 sm:$0xff]  }
 0x24d   : > { %1683 = vmatpush1.bf16.msra.mxu0 %v3574_v63 }
 0x252   : > { %v3729_v2 = vpop.eup %3728 }
 0x253   : > { %v1025_v5 = vadd.f32 1.0, %v3729_v2  ;;  %v3579_v2 = vld [vmem:[%s4600_s3 + $0x334] ss:$8 sps:$4 sm:$0xff]  }
 0x254   : > { %1684 = vmatprep.subr.bf16.mxu0 %v3579_v2  ;;  %v3603_v2 = vld [vmem:[%s4600_s3 + $0x3b4] ss:$8 sps:$4 sm:$0xff]  }
 0x255   : > { %3730 = vrcp.f32 %v1025_v5  ;;  %v3577_v5 = vld [vmem:[%s4600_s3 + $0x330] ss:$8 sps:$4 sm:$0xff]  }
 0x256   : > { %1685 = vmatpush1.bf16.msra.mxu0 %v3577_v5  ;;  %v3601_v5 = vld [vmem:[%s4600_s3 + $0x3b0] ss:$8 sps:$4 sm:$0xff]  }
 0x257   : > { %1686 = vmatprep.subr.bf16.mxu0 %v3582_v6  ;;  %v3606_v6 = vld [vmem:[%s4600_s3 + $0x3c4] ss:$8 sps:$4 sm:$0xff]  }
 0x25f   : > { %v3731_v8 = vpop.eup %3730 }
 0x260   : > { %v1027_v10 = vmul.f32 %v3731_v8, %v3320_v7  ;;  %v3580_v7 = vld [vmem:[%s4600_s3 + $0x340] ss:$8 sps:$4 sm:$0xff]   ;;  %v3585_v8 = vld [vmem:[%s4600_s3 + $0x354] ss:$8 sps:$4 sm:$0xff]  }
 0x261   : > { %1687 = vmatpush1.bf16.msra.mxu0 %v3580_v7  ;;  %v3604_v7 = vld [vmem:[%s4600_s3 + $0x3c0] ss:$8 sps:$4 sm:$0xff]  }
 0x262   : > { %1028 = vst [vmem:[#allocation2] sm:$0xff] %v1027_v10  ;;  %v3583_v10 = vld [vmem:[%s4600_s3 + $0x350] ss:$8 sps:$4 sm:$0xff]   ;;  %1688 = vmatprep.subr.bf16.mxu0 %v3585_v8  ;;  %v3609_v8 = vld [vmem:[%s4600_s3 + $0x3d4] ss:$8 sps:$4 sm:$0xff]  }
 0x265   : > { %1689 = vmatpush1.bf16.msra.mxu0 %v3583_v10  ;;  %v3607_v10 = vld [vmem:[%s4600_s3 + $0x3d0] ss:$8 sps:$4 sm:$0xff]  }
 0x269   : > { %v1031_v11 = vld [vmem:[#allocation2] sm:$0x1]  ;;  %v1034_v12 = vld [vmem:[#allocation2 + $0x1] sm:$0x1]  ;;  %v1037_v13 = vld [vmem:[#allocation2 + $0x2] sm:$0x1] }
 0x26a   : > { %1032 = vst [vmem:[#allocation3 + $0x1] sm:$0x1] %v1031_v11  ;;  %1033 = vst [vmem:[#allocation3 + $0x2] sm:$0x1] %v1031_v11  ;;  %v1040_v14 = vld [vmem:[#allocation2 + $0x3] sm:$0x1] }
 0x26b   : > { %1035 = vst [vmem:[#allocation3 + $0x3] sm:$0x1] %v1034_v12  ;;  %1036 = vst [vmem:[#allocation3 + $0x4] sm:$0x1] %v1034_v12  ;;  %v1043_v15 = vld [vmem:[#allocation2 + $0x4] sm:$0x1] }
 0x26c   : > { %1038 = vst [vmem:[#allocation3 + $0x5] sm:$0x1] %v1037_v13  ;;  %1039 = vst [vmem:[#allocation3 + $0x6] sm:$0x1] %v1037_v13  ;;  %v1046_v16 = vld [vmem:[#allocation2 + $0x5] sm:$0x1] }
 0x26d   : > { %1041 = vst [vmem:[#allocation3 + $0x7] sm:$0x1] %v1040_v14  ;;  %1042 = vst [vmem:[#allocation3 + $0x8] sm:$0x1] %v1040_v14  ;;  %v1049_v17 = vld [vmem:[#allocation2 + $0x6] sm:$0x1] }
 0x26e   : > { %1044 = vst [vmem:[#allocation3 + $0x9] sm:$0x1] %v1043_v15  ;;  %1045 = vst [vmem:[#allocation3 + $0xa] sm:$0x1] %v1043_v15  ;;  %v1052_v19 = vld [vmem:[#allocation2 + $0x7] sm:$0x1] }
 0x26f   : > { %1047 = vst [vmem:[#allocation3 + $0xb] sm:$0x1] %v1046_v16  ;;  %1048 = vst [vmem:[#allocation3 + $0xc] sm:$0x1] %v1046_v16  ;;  %v3588_v11 = vld [vmem:[%s4600_s3 + $0x364] ss:$8 sps:$4 sm:$0xff]  }
 0x270   : > { %1050 = vst [vmem:[#allocation3 + $0xd] sm:$0x1] %v1049_v17  ;;  %1051 = vst [vmem:[#allocation3 + $0xe] sm:$0x1] %v1049_v17  ;;  %v3586_v12 = vld [vmem:[%s4600_s3 + $0x360] ss:$8 sps:$4 sm:$0xff]   ;;  %1690 = vmatprep.subr.bf16.mxu0 %v3588_v11 }
 0x271   : > { %1053 = vst [vmem:[#allocation3 + $0xf] sm:$0x1] %v1052_v19  ;;  %1054 = vst [vmem:[#allocation3 + $0x10] sm:$0x1] %v1052_v19  ;;  %1691 = vmatpush1.bf16.msra.mxu0 %v3586_v12  ;;  %v3589_v13 = vld [vmem:[%s4600_s3 + $0x370] ss:$8 sps:$4 sm:$0xff]  }
 0x272   : > { %v3591_v14 = vld [vmem:[%s4600_s3 + $0x374] ss:$8 sps:$4 sm:$0xff]   ;;  %v3594_v15 = vld [vmem:[%s4600_s3 + $0x384] ss:$8 sps:$4 sm:$0xff]   ;;  %v3026_v16 = vld [vmem:[%s4601_s4 + $0x2] sm:$0x3] }
 0x273   : > { %1692 = vmatprep.subr.bf16.mxu0 %v3591_v14  ;;  %v1208_v17 = vrot.slane %v3026_v16, %v3990_v52  ;;  %v3612_v11 = vld [vmem:[%s4600_s3 + $0x3e4] ss:$8 sps:$4 sm:$0xff]   ;;  %v3610_v12 = vld [vmem:[%s4600_s3 + $0x3e0] ss:$8 sps:$4 sm:$0xff]   ;;  %v3613_v14 = vld [vmem:[%s4600_s3 + $0x3f0] ss:$8 sps:$4 sm:$0xff]  }
 0x274   : > { %v1057_v20 = vld [vmem:[#allocation3] sm:$0xff] }
 0x275   : > { %1523 = vst [vmem:[#allocation3] sm:$0x1] %v3797_v53  ;;  %v1215_v40 = vld [vmem:[#allocation3 + $0x1] sm:$0xff]  ;;  %1693 = vmatpush1.bf16.msra.mxu0 %v3589_v13  ;;  %v3615_v13 = vld [vmem:[%s4600_s3 + $0x3f4] ss:$8 sps:$4 sm:$0xff]  }
 0x276   : > { %v1362_v61 = vld [vmem:[#allocation3 + $0x2] sm:$0xff]  ;;  %1853 = vmatprep.subr.bf16.mxu0 %v3594_v15 }
 0x277   : > { %v3618_v15 = vld [vmem:[%s4600_s3 + $0x404] ss:$8 sps:$4 sm:$0xff]  }
 0x278   : > { %v1058_v22 = vld [vmem:[#allocation3 + $0x8] sm:$0xff] }
 0x279   : > { %v1059_v23 = vpack.c.bf16 %v1058_v22, %v1057_v20  ;;  %v1216_v41 = vld [vmem:[#allocation3 + $0x9] sm:$0xff] }
 0x27a   : > { %v1217_v43 = vpack.c.bf16 %v1216_v41, %v1215_v40  ;;  %v1363_v62 = vld [vmem:[#allocation3 + $0xa] sm:$0xff] }
 0x27b   : > { %1190 = vmatmul.mubr.bf16.vlgmr.msra.gmra.mrb[4].mxu1 %v1059_v23  ;;  %v1364_v18 = vpack.c.bf16 %v1363_v62, %v1362_v61  ;;  %v3592_v61 = vld [vmem:[%s4600_s3 + $0x380] ss:$8 sps:$4 sm:$0xff]  }
 0x27c   : > { %1316 = vmatpush1.bf16.msra.mxu1 %v3520_v21  ;;  %1347 = vmatprep.mubr.bf16.mxu1 %v3796_v9 }
 0x27d   : > { %1317 = vmatprep.subr.bf16.mxu1 %v3525_v24 }
 0x280   : > { %1318 = vmatpush1.bf16.msra.mxu1 %v3523_v25 }
 0x281   : > { %1319 = vmatprep.subr.bf16.mxu1 %v3528_v27 }
 0x284   : > { %1320 = vmatpush1.bf16.msra.mxu1 %v3526_v28 }
 0x285   : > { %1321 = vmatprep.subr.bf16.mxu1 %v3531_v29 }
 0x288   : > { %1322 = vmatpush1.bf16.msra.mxu1 %v3529_v30 }
 0x289   : > { %1323 = vmatprep.subr.bf16.mxu1 %v3534_v31 }
 0x28c   : > { %1324 = vmatpush1.bf16.msra.mxu1 %v3532_v32 }
 0x28d   : > { %1325 = vmatprep.subr.bf16.mxu1 %v3537_v33 }
 0x290   : > { %1326 = vmatpush1.bf16.msra.mxu1 %v3535_v34  ;;  %v1204_v34 = vrot.slane %v3026_v16, %v3889_v26 }
 0x291   : > { %1327 = vmatprep.subr.bf16.mxu1 %v3540_v35 }
 0x294   : > { %1328 = vmatpush1.bf16.msra.mxu1 %v3538_v36 }
 0x295   : > { %1329 = vmatprep.subr.bf16.mxu1 %v3543_v37 }
 0x298   : > { %1330 = vmatpush1.bf16.msra.mxu1 %v3541_v38 }
 0x299   : > { %1462 = vmatprep.subr.bf16.mxu1 %v3546_v39 }
 0x29b   : > { %1348 = vmatmul.mubr.bf16.vlgmr.msra.gmra.mrb[4].mxu1 %v1217_v43 }
 0x29c   : > { %1463 = vmatpush1.bf16.msra.mxu1 %v3544_v42  ;;  %1494 = vmatprep.mubr.bf16.mxu1 %v3796_v9 }
 0x29d   : > { %1464 = vmatprep.subr.bf16.mxu1 %v3549_v44 }
 0x2a0   : > { %1465 = vmatpush1.bf16.msra.mxu1 %v3547_v45 }
 0x2a1   : > { %1466 = vmatprep.subr.bf16.mxu1 %v3552_v46 }
 0x2a4   : > { %1467 = vmatpush1.bf16.msra.mxu1 %v3550_v47 }
 0x2a5   : > { %1468 = vmatprep.subr.bf16.mxu1 %v3555_v48 }
 0x2a8   : > { %1469 = vmatpush1.bf16.msra.mxu1 %v3553_v49 }
 0x2a9   : > { %1470 = vmatprep.subr.bf16.mxu1 %v3558_v50 }
 0x2ac   : > { %1471 = vmatpush1.bf16.msra.mxu1 %v3556_v51 }
 0x2ad   : > { %1472 = vmatprep.subr.bf16.mxu1 %v3561_v54 }
 0x2b0   : > { %1473 = vmatpush1.bf16.msra.mxu1 %v3559_v55 }
 0x2b1   : > { %1474 = vmatprep.subr.bf16.mxu1 %v3564_v56 }
 0x2b4   : > { %1475 = vmatpush1.bf16.msra.mxu1 %v3562_v57 }
 0x2b5   : > { %1476 = vmatprep.subr.bf16.mxu1 %v3567_v58 }
 0x2b8   : > { %1477 = vmatpush1.bf16.msra.mxu1 %v3565_v60 }
 0x2bb   : > { %1495 = vmatmul.mubr.bf16.vlgmr.msra.gmra.mrb[4].mxu1 %v1364_v18 }
 0x2bc   : > { %2347 = vmatprep.mubr.bf16.mxu1 %v3796_v9 }
 0x38e   : > { %v1496_v19 = vpop.f32.mrb[4].mxu1 }
 0x38f   : > { %v1498_v20 = vpop.f32.mrb[5].mxu1  ;;  %v3322_v35 = vadd.f32 %v1496_v19, %v1204_v34  ;;  %v3616_v19 = vld [vmem:[%s4600_s3 + $0x400] ss:$8 sps:$4 sm:$0xff]  }
 0x390   : > { %v3323_v21 = vadd.f32 %v1498_v20, %v1208_v17  ;;  %v1500_v22 = vpop.f32.mrb[6].mxu1 }
 0x391   : > { %v1502_v23 = vpop.f32.mrb[7].mxu1  ;;  %v3324_v38 = vadd.f32 %v1500_v22, %v1204_v34  ;;  %v3619_v22 = vld [vmem:[%s4600_s3 + $0x410] ss:$8 sps:$4 sm:$0xff]  }
 0x392   : > { %v1509_v24 = vsub.f32 0.0, %v3323_v21  ;;  %v3325_v25 = vadd.f32 %v1502_v23, %v1208_v17  ;;  %v3621_v21 = vld [vmem:[%s4600_s3 + $0x414] ss:$8 sps:$4 sm:$0xff]   ;;  %v3624_v23 = vld [vmem:[%s4600_s3 + $0x424] ss:$8 sps:$4 sm:$0xff]  }
 0x393   : > { %v3631_v34 = vld [vmem:[%s4600_s3 + $0x450] ss:$8 sps:$4 sm:$0xff]  }
 0x394   : > { %v1511_v27 = vmul.f32 1.442695, %v1509_v24  ;;  %v1510_v28 = vsub.f32 0.0, %v3325_v25 }
 0x396   : > { %3732 = vpow2.f32 %v1511_v27  ;;  %v1513_v29 = vmul.f32 1.442695, %v1510_v28  ;;  %v3622_v27 = vld [vmem:[%s4600_s3 + $0x420] ss:$8 sps:$4 sm:$0xff]  }
 0x398   : > { %3734 = vpow2.f32 %v1513_v29  ;;  %v3627_v29 = vld [vmem:[%s4600_s3 + $0x434] ss:$8 sps:$4 sm:$0xff]  }
 0x3a0   : > { %v3733_v30 = vpop.eup %3732 }
 0x3a1   : > { %v1515_v31 = vadd.f32 1.0, %v3733_v30  ;;  %v3625_v30 = vld [vmem:[%s4600_s3 + $0x430] ss:$8 sps:$4 sm:$0xff]  }
 0x3a2   : > { %v3735_v32 = vpop.eup %3734 }
 0x3a3   : > { %3736 = vrcp.f32 %v1515_v31  ;;  %v1516_v33 = vadd.f32 1.0, %v3735_v32  ;;  %v3630_v31 = vld [vmem:[%s4600_s3 + $0x444] ss:$8 sps:$4 sm:$0xff]   ;;  %v3628_v32 = vld [vmem:[%s4600_s3 + $0x440] ss:$8 sps:$4 sm:$0xff]  }
 0x3a5   : > { %3738 = vrcp.f32 %v1516_v33  ;;  %v3633_v33 = vld [vmem:[%s4600_s3 + $0x454] ss:$8 sps:$4 sm:$0xff]  }
 0x3ad   : > { %v3737_v36 = vpop.eup %3736 }
 0x3ae   : > { %v1519_v37 = vmul.f32 %v3737_v36, %v3322_v35  ;;  %v3636_v35 = vld [vmem:[%s4600_s3 + $0x464] ss:$8 sps:$4 sm:$0xff]   ;;  %v3634_v36 = vld [vmem:[%s4600_s3 + $0x460] ss:$8 sps:$4 sm:$0xff]  }
 0x3af   : > { %v3739_v39 = vpop.eup %3738 }
 0x3b0   : > { %1521 = vst [vmem:[#allocation2] sm:$0xff] %v1519_v37  ;;  %v1520_v40 = vmul.f32 %v3739_v39, %v3324_v38  ;;  %v3639_v37 = vld [vmem:[%s4600_s3 + $0x474] ss:$8 sps:$4 sm:$0xff]   ;;  %v3637_v38 = vld [vmem:[%s4600_s3 + $0x470] ss:$8 sps:$4 sm:$0xff]  }
 0x3b2   : > { %1522 = vst [vmem:[#allocation2 + $0x8] sm:$0xff] %v1520_v40 }
 0x3b7   : > { %v1525_v41 = vld [vmem:[#allocation2] sm:$0x1]  ;;  %v1528_v42 = vld [vmem:[#allocation2 + $0x1] sm:$0x1]  ;;  %v1531_v43 = vld [vmem:[#allocation2 + $0x2] sm:$0x1] }
 0x3b8   : > { %1526 = vst [vmem:[#allocation3 + $0x1] sm:$0x1] %v1525_v41  ;;  %1527 = vst [vmem:[#allocation3 + $0x2] sm:$0x1] %v1525_v41  ;;  %v1534_v44 = vld [vmem:[#allocation2 + $0x3] sm:$0x1] }
 0x3b9   : > { %1529 = vst [vmem:[#allocation3 + $0x3] sm:$0x1] %v1528_v42  ;;  %1530 = vst [vmem:[#allocation3 + $0x4] sm:$0x1] %v1528_v42  ;;  %v1537_v45 = vld [vmem:[#allocation2 + $0x4] sm:$0x1] }
 0x3ba   : > { %1532 = vst [vmem:[#allocation3 + $0x5] sm:$0x1] %v1531_v43  ;;  %1533 = vst [vmem:[#allocation3 + $0x6] sm:$0x1] %v1531_v43  ;;  %v1540_v46 = vld [vmem:[#allocation2 + $0x5] sm:$0x1] }
 0x3bb   : > { %v1549_v47 = vld [vmem:[#allocation2 + $0x8] sm:$0x1]  ;;  %v1552_v48 = vld [vmem:[#allocation2 + $0x9] sm:$0x1]  ;;  %v1555_v49 = vld [vmem:[#allocation2 + $0xa] sm:$0x1] }
 0x3bc   : > { %1535 = vst [vmem:[#allocation3 + $0x7] sm:$0x1] %v1534_v44  ;;  %1536 = vst [vmem:[#allocation3 + $0x8] sm:$0x1] %v1534_v44  ;;  %v1558_v50 = vld [vmem:[#allocation2 + $0xb] sm:$0x1] }
 0x3bd   : > { %1538 = vst [vmem:[#allocation3 + $0x9] sm:$0x1] %v1537_v45  ;;  %1539 = vst [vmem:[#allocation3 + $0xa] sm:$0x1] %v1537_v45  ;;  %v1561_v51 = vld [vmem:[#allocation2 + $0xc] sm:$0x1] }
 0x3be   : > { %1541 = vst [vmem:[#allocation3 + $0xb] sm:$0x1] %v1540_v46  ;;  %1542 = vst [vmem:[#allocation3 + $0xc] sm:$0x1] %v1540_v46  ;;  %v1564_v54 = vld [vmem:[#allocation2 + $0xd] sm:$0x1] }
 0x3bf   : > { %1550 = vst [vmem:[#allocation3 + $0x11] sm:$0x1] %v1549_v47  ;;  %1551 = vst [vmem:[#allocation3 + $0x12] sm:$0x1] %v1549_v47  ;;  %v1567_v55 = vld [vmem:[#allocation2 + $0xe] sm:$0x1] }
 0x3c0   : > { %1553 = vst [vmem:[#allocation3 + $0x13] sm:$0x1] %v1552_v48  ;;  %1554 = vst [vmem:[#allocation3 + $0x14] sm:$0x1] %v1552_v48  ;;  %v1570_v56 = vld [vmem:[#allocation2 + $0xf] sm:$0x1] }
 0x3c1   : > { %1556 = vst [vmem:[#allocation3 + $0x15] sm:$0x1] %v1555_v49  ;;  %1557 = vst [vmem:[#allocation3 + $0x16] sm:$0x1] %v1555_v49  ;;  %v1543_v57 = vld [vmem:[#allocation2 + $0x6] sm:$0x1] }
 0x3c2   : > { %1559 = vst [vmem:[#allocation3 + $0x17] sm:$0x1] %v1558_v50  ;;  %1560 = vst [vmem:[#allocation3 + $0x18] sm:$0x1] %v1558_v50  ;;  %v1546_v58 = vld [vmem:[#allocation2 + $0x7] sm:$0x1] }
 0x3c3   : > { %1562 = vst [vmem:[#allocation3 + $0x19] sm:$0x1] %v1561_v51  ;;  %1563 = vst [vmem:[#allocation3 + $0x1a] sm:$0x1] %v1561_v51  ;;  %v1575_v60 = vld [vmem:[#allocation3] sm:$0xff] }
 0x3c4   : > { %1565 = vst [vmem:[#allocation3 + $0x1b] sm:$0x1] %v1564_v54  ;;  %1566 = vst [vmem:[#allocation3 + $0x1c] sm:$0x1] %v1564_v54  ;;  %v1750_v16 = vld [vmem:[#allocation3 + $0x1] sm:$0xff] }
 0x3c5   : > { %1568 = vst [vmem:[#allocation3 + $0x1d] sm:$0x1] %v1567_v55  ;;  %1569 = vst [vmem:[#allocation3 + $0x1e] sm:$0x1] %v1567_v55  ;;  %v1914_v40 = vld [vmem:[#allocation3 + $0x2] sm:$0xff] }
 0x3c6   : > { %1571 = vst [vmem:[#allocation3 + $0x1f] sm:$0x1] %v1570_v56  ;;  %1572 = vst [vmem:[#allocation3 + $0x20] sm:$0x1] %v1570_v56  ;;  %v3642_v45 = vld [vmem:[%s4600_s3 + $0x484] ss:$8 sps:$4 sm:$0xff]  }
 0x3c7   : > { %1544 = vst [vmem:[#allocation3 + $0xd] sm:$0x1] %v1543_v57  ;;  %1545 = vst [vmem:[#allocation3 + $0xe] sm:$0x1] %v1543_v57  ;;  %v3640_v46 = vld [vmem:[%s4600_s3 + $0x480] ss:$8 sps:$4 sm:$0xff]   ;;  %2315 = vmatprep.subr.bf16.mxu1 %v3642_v45 }
 0x3c8   : > { %1547 = vst [vmem:[#allocation3 + $0xf] sm:$0x1] %v1546_v58  ;;  %1548 = vst [vmem:[#allocation3 + $0x10] sm:$0x1] %v1546_v58  ;;  %2316 = vmatpush1.bf16.msra.mxu1 %v3640_v46  ;;  %v3645_v47 = vld [vmem:[%s4600_s3 + $0x494] ss:$8 sps:$4 sm:$0xff]  }
 0x3c9   : > { %2106 = vst [vmem:[#allocation3] sm:$0x1] %v3797_v53  ;;  %v3600_v53 = vld [vmem:[%s4600_s3 + $0x3a4] ss:$8 sps:$4 sm:$0xff]   ;;  %v1752_v24 = vld [vmem:[#allocation3 + $0x11] sm:$0xff]  ;;  %2317 = vmatprep.subr.bf16.mxu1 %v3645_v47 }
 0x3ca   : > { %v1916_v42 = vld [vmem:[#allocation3 + $0x12] sm:$0xff]  ;;  %v3648_v49 = vld [vmem:[%s4600_s3 + $0x4a4] ss:$8 sps:$4 sm:$0xff]  }
 0x3cb   : > { %v3643_v48 = vld [vmem:[%s4600_s3 + $0x490] ss:$8 sps:$4 sm:$0xff]   ;;  %v3646_v50 = vld [vmem:[%s4600_s3 + $0x4a0] ss:$8 sps:$4 sm:$0xff]   ;;  %v3651_v51 = vld [vmem:[%s4600_s3 + $0x4b4] ss:$8 sps:$4 sm:$0xff]  }
 0x3cc   : > { %2318 = vmatpush1.bf16.msra.mxu1 %v3643_v48  ;;  %v3649_v54 = vld [vmem:[%s4600_s3 + $0x4b0] ss:$8 sps:$4 sm:$0xff]   ;;  %v3654_v55 = vld [vmem:[%s4600_s3 + $0x4c4] ss:$8 sps:$4 sm:$0xff]   ;;  %v3652_v56 = vld [vmem:[%s4600_s3 + $0x4c0] ss:$8 sps:$4 sm:$0xff]  }
 0x3cd   : > { %v1578_v4 = vld [vmem:[#allocation3 + $0x18] sm:$0xff]  ;;  %2319 = vmatprep.subr.bf16.mxu1 %v3648_v49  ;;  %v3657_v57 = vld [vmem:[%s4600_s3 + $0x4d4] ss:$8 sps:$4 sm:$0xff]   ;;  %v3655_v58 = vld [vmem:[%s4600_s3 + $0x4d0] ss:$8 sps:$4 sm:$0xff]  }
 0x3ce   : > { %v1753_v25 = vld [vmem:[#allocation3 + $0x19] sm:$0xff] }
 0x3cf   : > { %v1576_v62 = vld [vmem:[#allocation3 + $0x8] sm:$0xff]  ;;  %v1577_v3 = vld [vmem:[#allocation3 + $0x10] sm:$0xff]  ;;  %v1755_v28 = vpack.c.bf16 %v1753_v25, %v1752_v24  ;;  %v1917_v43 = vld [vmem:[#allocation3 + $0x1a] sm:$0xff] }
 0x3d0   : > { %v1579_v18 = vpack.c.bf16 %v1576_v62, %v1575_v60  ;;  %v1580_v63 = vpack.c.bf16 %v1578_v4, %v1577_v3  ;;  %v1751_v17 = vld [vmem:[#allocation3 + $0x9] sm:$0xff]  ;;  %v1919_v44 = vpack.c.bf16 %v1917_v43, %v1916_v42  ;;  %2320 = vmatpush1.bf16.msra.mxu1 %v3646_v50  ;;  %v3660_v60 = vld [vmem:[%s4600_s3 + $0x4e4] ss:$8 sps:$4 sm:$0xff]  }
 0x3d1   : > { %v1754_v20 = vpack.c.bf16 %v1751_v17, %v1750_v16  ;;  %v1915_v39 = vld [vmem:[#allocation3 + $0xa] sm:$0xff]  ;;  %2321 = vmatprep.subr.bf16.mxu1 %v3651_v51 }
 0x3d2   : > { %1711 = vmatmul.mubr.bf16.vlgmr.msra.gmra.mrb[16].mxu0 %v1579_v18  ;;  %v1918_v41 = vpack.c.bf16 %v1915_v39, %v1914_v40  ;;  %v3663_v62 = vld [vmem:[%s4600_s3 + $0x4f4] ss:$8 sps:$4 sm:$0xff]   ;;  %v3661_v18 = vld [vmem:[%s4600_s3 + $0x4f0] ss:$8 sps:$4 sm:$0xff]  }
 0x3d3   : > { %1854 = vmatpush1.bf16.msra.mxu0 %v3592_v61  ;;  %1720 = vmatprep.mubr.bf16.mxu0 %v3796_v9  ;;  %v3658_v61 = vld [vmem:[%s4600_s3 + $0x4e0] ss:$8 sps:$4 sm:$0xff]  }
 0x3d4   : > { %1855 = vmatprep.subr.bf16.mxu0 %v3597_v0  ;;  %2322 = vmatpush1.bf16.msra.mxu1 %v3649_v54  ;;  %v3666_v0 = vld [vmem:[%s4600_s3 + $0x504] ss:$8 sps:$4 sm:$0xff]  }
 0x3d5   : > { %2323 = vmatprep.subr.bf16.mxu1 %v3654_v55 }
 0x3d7   : > { %1856 = vmatpush1.bf16.msra.mxu0 %v3595_v1  ;;  %v3123_v1 = vld [vmem:[%s4601_s4 + $0x4] sm:$0x3] }
 0x3d8   : > { %1857 = vmatprep.subr.bf16.mxu0 %v3600_v53  ;;  %2324 = vmatpush1.bf16.msra.mxu1 %v3652_v56  ;;  %v1739_v53 = vrot.slane %v3123_v1, %v3990_v52 }
 0x3d9   : > { %2325 = vmatprep.subr.bf16.mxu1 %v3657_v57 }
 0x3da   : > { %1721 = vmatmul.mubr.bf16.gmra.mrb[20].mxu0 %v1580_v63 }
 0x3db   : > { %1858 = vmatpush1.bf16.msra.mxu0 %v3598_v59  ;;  %1885 = vmatprep.mubr.bf16.mxu0 %v3796_v9 }
 0x3dc   : > { %1859 = vmatprep.subr.bf16.mxu0 %v3603_v2  ;;  %2326 = vmatpush1.bf16.msra.mxu1 %v3655_v58 }
 0x3dd   : > { %2327 = vmatprep.subr.bf16.mxu1 %v3660_v60 }
 0x3df   : > { %1860 = vmatpush1.bf16.msra.mxu0 %v3601_v5 }
 0x3e0   : > { %1861 = vmatprep.subr.bf16.mxu0 %v3606_v6  ;;  %2328 = vmatpush1.bf16.msra.mxu1 %v3658_v61 }
 0x3e1   : > { %2329 = vmatprep.subr.bf16.mxu1 %v3663_v62 }
 0x3e3   : > { %1862 = vmatpush1.bf16.msra.mxu0 %v3604_v7 }
 0x3e4   : > { %1863 = vmatprep.subr.bf16.mxu0 %v3609_v8  ;;  %2330 = vmatpush1.bf16.msra.mxu1 %v3661_v18  ;;  %v3664_v18 = vld [vmem:[%s4600_s3 + $0x500] ss:$8 sps:$4 sm:$0xff]  }
 0x3e5   : > { %2524 = vmatprep.subr.bf16.mxu1 %v3666_v0 }
 0x3e7   : > { %1864 = vmatpush1.bf16.msra.mxu0 %v3607_v10 }
 0x3e8   : > { %1865 = vmatprep.subr.bf16.mxu0 %v3612_v11 }
 0x3eb   : > { %1866 = vmatpush1.bf16.msra.mxu0 %v3610_v12 }
 0x3ec   : > { %1867 = vmatprep.subr.bf16.mxu0 %v3615_v13 }
 0x3ef   : > { %1868 = vmatpush1.bf16.msra.mxu0 %v3613_v14 }
 0x3f0   : > { %2017 = vmatprep.subr.bf16.mxu0 %v3618_v15 }
 0x3f2   : > { %1886 = vmatmul.mubr.bf16.vlgmr.msra.gmra.mrb[16].mxu0 %v1754_v20 }
 0x3f3   : > { %2018 = vmatpush1.bf16.msra.mxu0 %v3616_v19  ;;  %1895 = vmatprep.mubr.bf16.mxu0 %v3796_v9 }
 0x3f4   : > { %2019 = vmatprep.subr.bf16.mxu0 %v3621_v21 }
 0x3f7   : > { %2020 = vmatpush1.bf16.msra.mxu0 %v3619_v22 }
 0x3f8   : > { %2021 = vmatprep.subr.bf16.mxu0 %v3624_v23 }
 0x3fa   : > { %1896 = vmatmul.mubr.bf16.gmra.mrb[20].mxu0 %v1755_v28  ;;  %v1735_v28 = vrot.slane %v3123_v1, %v3889_v26 }
 0x3fb   : > { %2022 = vmatpush1.bf16.msra.mxu0 %v3622_v27  ;;  %2049 = vmatprep.mubr.bf16.mxu0 %v3796_v9 }
 0x3fc   : > { %2023 = vmatprep.subr.bf16.mxu0 %v3627_v29 }
 0x3ff   : > { %2024 = vmatpush1.bf16.msra.mxu0 %v3625_v30 }
 0x400   : > { %2025 = vmatprep.subr.bf16.mxu0 %v3630_v31 }
 0x403   : > { %2026 = vmatpush1.bf16.msra.mxu0 %v3628_v32 }
 0x404   : > { %2027 = vmatprep.subr.bf16.mxu0 %v3633_v33 }
 0x407   : > { %2028 = vmatpush1.bf16.msra.mxu0 %v3631_v34 }
 0x408   : > { %2029 = vmatprep.subr.bf16.mxu0 %v3636_v35 }
 0x40b   : > { %2030 = vmatpush1.bf16.msra.mxu0 %v3634_v36 }
 0x40c   : > { %2031 = vmatprep.subr.bf16.mxu0 %v3639_v37 }
 0x40f   : > { %2032 = vmatpush1.bf16.msra.mxu0 %v3637_v38 }
 0x412   : > { %2050 = vmatmul.mubr.bf16.vlgmr.msra.gmra.mrb[16].mxu0 %v1918_v41 }
 0x413   : > { %2059 = vmatprep.mubr.bf16.mxu0 %v3796_v9 }
 0x41a   : > { %2060 = vmatmul.mubr.bf16.gmra.mrb[20].mxu0 %v1919_v44 }
 0x4e5   : > { %v2051_v3 = vpop.f32.mrb[16].mxu0 }
 0x4e6   : > { %v2053_v4 = vpop.f32.mrb[17].mxu0  ;;  %v3326_v32 = vadd.f32 %v2051_v3, %v1735_v28 }
 0x4e7   : > { %v3327_v59 = vadd.f32 %v2053_v4, %v1739_v53  ;;  %v2055_v63 = vpop.f32.mrb[18].mxu0 }
 0x4e8   : > { %v2057_v2 = vpop.f32.mrb[19].mxu0  ;;  %v3328_v35 = vadd.f32 %v2055_v63, %v1735_v28 }
 0x4e9   : > { %v2078_v5 = vsub.f32 0.0, %v3327_v59  ;;  %v3329_v6 = vadd.f32 %v2057_v2, %v1739_v53 }
 0x4eb   : > { %v2082_v7 = vmul.f32 1.442695, %v2078_v5  ;;  %v2079_v8 = vsub.f32 0.0, %v3329_v6 }
 0x4ed   : > { %3740 = vpow2.f32 %v2082_v7  ;;  %v2084_v10 = vmul.f32 1.442695, %v2079_v8  ;;  %v2061_v11 = vpop.f32.mrb[20].mxu0  ;;  %v3669_v7 = vld [vmem:[%s4600_s3 + $0x514] ss:$8 sps:$4 sm:$0xff]  }
 0x4ee   : > { %v2063_v12 = vpop.f32.mrb[21].mxu0  ;;  %v3330_v38 = vadd.f32 %v2061_v11, %v1735_v28 }
 0x4ef   : > { %3742 = vpow2.f32 %v2084_v10  ;;  %v3331_v13 = vadd.f32 %v2063_v12, %v1739_v53  ;;  %v2065_v14 = vpop.f32.mrb[22].mxu0 }
 0x4f0   : > { %v2067_v15 = vpop.f32.mrb[23].mxu0  ;;  %v3332_v41 = vadd.f32 %v2065_v14, %v1735_v28  ;;  %v3678_v28 = vld [vmem:[%s4600_s3 + $0x544] ss:$8 sps:$4 sm:$0xff]  }
 0x4f1   : > { %v2080_v16 = vsub.f32 0.0, %v3331_v13  ;;  %v3333_v17 = vadd.f32 %v2067_v15, %v1739_v53 }
 0x4f3   : > { %v2086_v19 = vmul.f32 1.442695, %v2080_v16  ;;  %v2081_v20 = vsub.f32 0.0, %v3333_v17  ;;  %v3667_v16 = vld [vmem:[%s4600_s3 + $0x510] ss:$8 sps:$4 sm:$0xff]  }
 0x4f5   : > { %3744 = vpow2.f32 %v2086_v19  ;;  %v2088_v21 = vmul.f32 1.442695, %v2081_v20  ;;  %v3672_v20 = vld [vmem:[%s4600_s3 + $0x524] ss:$8 sps:$4 sm:$0xff]  }
 0x4f7   : > { %v3741_v22 = vpop.eup %3740  ;;  %3746 = vpow2.f32 %v2088_v21 }
 0x4f8   : > { %v2090_v23 = vadd.f32 1.0, %v3741_v22 }
 0x4f9   : > { %v3743_v24 = vpop.eup %3742 }
 0x4fa   : > { %3748 = vrcp.f32 %v2090_v23  ;;  %v2091_v25 = vadd.f32 1.0, %v3743_v24  ;;  %v3670_v23 = vld [vmem:[%s4600_s3 + $0x520] ss:$8 sps:$4 sm:$0xff]  }
 0x4fc   : > { %3750 = vrcp.f32 %v2091_v25  ;;  %v3675_v25 = vld [vmem:[%s4600_s3 + $0x534] ss:$8 sps:$4 sm:$0xff]  }
 0x4ff   : > { %v3745_v27 = vpop.eup %3744 }
 0x500   : > { %v2092_v29 = vadd.f32 1.0, %v3745_v27  ;;  %v3673_v27 = vld [vmem:[%s4600_s3 + $0x530] ss:$8 sps:$4 sm:$0xff]  }
 0x501   : > { %v3747_v30 = vpop.eup %3746 }
 0x502   : > { %3752 = vrcp.f32 %v2092_v29  ;;  %v2093_v31 = vadd.f32 1.0, %v3747_v30 }
 0x504   : > { %v3749_v33 = vpop.eup %3748  ;;  %3754 = vrcp.f32 %v2093_v31  ;;  %v3676_v31 = vld [vmem:[%s4600_s3 + $0x540] ss:$8 sps:$4 sm:$0xff]  }
 0x505   : > { %v2098_v34 = vmul.f32 %v3749_v33, %v3326_v32  ;;  %v3681_v33 = vld [vmem:[%s4600_s3 + $0x554] ss:$8 sps:$4 sm:$0xff]  }
 0x506   : > { %v3751_v36 = vpop.eup %3750 }
 0x507   : > { %2102 = vst [vmem:[#allocation2] sm:$0xff] %v2098_v34  ;;  %v2099_v37 = vmul.f32 %v3751_v36, %v3328_v35  ;;  %v3679_v34 = vld [vmem:[%s4600_s3 + $0x550] ss:$8 sps:$4 sm:$0xff]   ;;  %v3684_v35 = vld [vmem:[%s4600_s3 + $0x564] ss:$8 sps:$4 sm:$0xff]  }
 0x509   : > { %2103 = vst [vmem:[#allocation2 + $0x8] sm:$0xff] %v2099_v37 }
 0x50c   : > { %v3753_v39 = vpop.eup %3752 }
 0x50d   : > { %v2100_v40 = vmul.f32 %v3753_v39, %v3330_v38  ;;  %v3682_v38 = vld [vmem:[%s4600_s3 + $0x560] ss:$8 sps:$4 sm:$0xff]  }
 0x50e   : > { %v3755_v42 = vpop.eup %3754  ;;  %v2108_v43 = vld [vmem:[#allocation2] sm:$0x1]  ;;  %v2111_v44 = vld [vmem:[#allocation2 + $0x1] sm:$0x1]  ;;  %v2114_v45 = vld [vmem:[#allocation2 + $0x2] sm:$0x1] }
 0x50f   : > { %2104 = vst [vmem:[#allocation2 + $0x10] sm:$0xff] %v2100_v40  ;;  %v2101_v46 = vmul.f32 %v3755_v42, %v3332_v41  ;;  %2109 = vst [vmem:[#allocation3 + $0x1] sm:$0x1] %v2108_v43  ;;  %v2117_v47 = vld [vmem:[#allocation2 + $0x3] sm:$0x1] }
 0x510   : > { %2110 = vst [vmem:[#allocation3 + $0x2] sm:$0x1] %v2108_v43  ;;  %2112 = vst [vmem:[#allocation3 + $0x3] sm:$0x1] %v2111_v44  ;;  %v2120_v48 = vld [vmem:[#allocation2 + $0x4] sm:$0x1] }
 0x511   : > { %2113 = vst [vmem:[#allocation3 + $0x4] sm:$0x1] %v2111_v44  ;;  %2115 = vst [vmem:[#allocation3 + $0x5] sm:$0x1] %v2114_v45  ;;  %v2123_v49 = vld [vmem:[#allocation2 + $0x5] sm:$0x1] }
 0x512   : > { %2116 = vst [vmem:[#allocation3 + $0x6] sm:$0x1] %v2114_v45  ;;  %2118 = vst [vmem:[#allocation3 + $0x7] sm:$0x1] %v2117_v47  ;;  %v2126_v50 = vld [vmem:[#allocation2 + $0x6] sm:$0x1] }
 0x513   : > { %2119 = vst [vmem:[#allocation3 + $0x8] sm:$0x1] %v2117_v47  ;;  %2121 = vst [vmem:[#allocation3 + $0x9] sm:$0x1] %v2120_v48  ;;  %v2129_v51 = vld [vmem:[#allocation2 + $0x7] sm:$0x1] }
 0x514   : > { %2122 = vst [vmem:[#allocation3 + $0xa] sm:$0x1] %v2120_v48  ;;  %2124 = vst [vmem:[#allocation3 + $0xb] sm:$0x1] %v2123_v49  ;;  %v2132_v54 = vld [vmem:[#allocation2 + $0x8] sm:$0x1] }
 0x515   : > { %2125 = vst [vmem:[#allocation3 + $0xc] sm:$0x1] %v2123_v49  ;;  %2105 = vst [vmem:[#allocation2 + $0x18] sm:$0xff] %v2101_v46  ;;  %v2135_v55 = vld [vmem:[#allocation2 + $0x9] sm:$0x1] }
 0x516   : > { %2127 = vst [vmem:[#allocation3 + $0xd] sm:$0x1] %v2126_v50  ;;  %2128 = vst [vmem:[#allocation3 + $0xe] sm:$0x1] %v2126_v50  ;;  %v2138_v56 = vld [vmem:[#allocation2 + $0xa] sm:$0x1] }
 0x517   : > { %2130 = vst [vmem:[#allocation3 + $0xf] sm:$0x1] %v2129_v51  ;;  %2131 = vst [vmem:[#allocation3 + $0x10] sm:$0x1] %v2129_v51  ;;  %v2141_v57 = vld [vmem:[#allocation2 + $0xb] sm:$0x1] }
 0x518   : > { %2133 = vst [vmem:[#allocation3 + $0x11] sm:$0x1] %v2132_v54  ;;  %2134 = vst [vmem:[#allocation3 + $0x12] sm:$0x1] %v2132_v54  ;;  %v2144_v58 = vld [vmem:[#allocation2 + $0xc] sm:$0x1] }
 0x519   : > { %2136 = vst [vmem:[#allocation3 + $0x13] sm:$0x1] %v2135_v55  ;;  %2137 = vst [vmem:[#allocation3 + $0x14] sm:$0x1] %v2135_v55  ;;  %v2147_v60 = vld [vmem:[#allocation2 + $0xd] sm:$0x1] }
 0x51a   : > { %2139 = vst [vmem:[#allocation3 + $0x15] sm:$0x1] %v2138_v56  ;;  %2140 = vst [vmem:[#allocation3 + $0x16] sm:$0x1] %v2138_v56  ;;  %v2150_v61 = vld [vmem:[#allocation2 + $0xe] sm:$0x1] }
 0x51b   : > { %2142 = vst [vmem:[#allocation3 + $0x17] sm:$0x1] %v2141_v57  ;;  %2143 = vst [vmem:[#allocation3 + $0x18] sm:$0x1] %v2141_v57  ;;  %v2153_v62 = vld [vmem:[#allocation2 + $0xf] sm:$0x1] }
 0x51c   : > { %2145 = vst [vmem:[#allocation3 + $0x19] sm:$0x1] %v2144_v58  ;;  %2146 = vst [vmem:[#allocation3 + $0x1a] sm:$0x1] %v2144_v58  ;;  %v2156_v0 = vld [vmem:[#allocation2 + $0x10] sm:$0x1] }
 0x51d   : > { %2148 = vst [vmem:[#allocation3 + $0x1b] sm:$0x1] %v2147_v60  ;;  %2149 = vst [vmem:[#allocation3 + $0x1c] sm:$0x1] %v2147_v60  ;;  %v2159_v1 = vld [vmem:[#allocation2 + $0x11] sm:$0x1] }
 0x51e   : > { %2151 = vst [vmem:[#allocation3 + $0x1d] sm:$0x1] %v2150_v61  ;;  %2152 = vst [vmem:[#allocation3 + $0x1e] sm:$0x1] %v2150_v61  ;;  %v2162_v53 = vld [vmem:[#allocation2 + $0x12] sm:$0x1] }
 0x51f   : > { %2154 = vst [vmem:[#allocation3 + $0x1f] sm:$0x1] %v2153_v62  ;;  %2155 = vst [vmem:[#allocation3 + $0x20] sm:$0x1] %v2153_v62  ;;  %v2206_v3 = vld [vmem:[#allocation3] sm:$0xff]  ;;  %v2207_v63 = vld [vmem:[#allocation3 + $0x8] sm:$0xff] }
 0x520   : > { %2157 = vst [vmem:[#allocation3 + $0x21] sm:$0x1] %v2156_v0  ;;  %2158 = vst [vmem:[#allocation3 + $0x22] sm:$0x1] %v2156_v0  ;;  %v2165_v4 = vld [vmem:[#allocation2 + $0x13] sm:$0x1]  ;;  %v2214_v6 = vpack.c.bf16 %v2207_v63, %v2206_v3 }
 0x521   : > { %2160 = vst [vmem:[#allocation3 + $0x23] sm:$0x1] %v2159_v1  ;;  %2161 = vst [vmem:[#allocation3 + $0x24] sm:$0x1] %v2159_v1  ;;  %v2168_v59 = vld [vmem:[#allocation2 + $0x14] sm:$0x1] }
 0x522   : > { %2163 = vst [vmem:[#allocation3 + $0x25] sm:$0x1] %v2162_v53  ;;  %2164 = vst [vmem:[#allocation3 + $0x26] sm:$0x1] %v2162_v53  ;;  %v2171_v2 = vld [vmem:[#allocation2 + $0x15] sm:$0x1]  ;;  %2348 = vmatmul.mubr.bf16.vlgmr.msra.gmra.mrb[8].mxu1 %v2214_v6 }
 0x523   : > { %2166 = vst [vmem:[#allocation3 + $0x27] sm:$0x1] %v2165_v4  ;;  %2167 = vst [vmem:[#allocation3 + $0x28] sm:$0x1] %v2165_v4  ;;  %v2174_v5 = vld [vmem:[#allocation2 + $0x16] sm:$0x1]  ;;  %2525 = vmatpush1.bf16.msra.mxu1 %v3664_v18  ;;  %2357 = vmatprep.mubr.bf16.mxu1 %v3796_v9 }
 0x524   : > { %2169 = vst [vmem:[#allocation3 + $0x29] sm:$0x1] %v2168_v59  ;;  %2170 = vst [vmem:[#allocation3 + $0x2a] sm:$0x1] %v2168_v59  ;;  %v2177_v8 = vld [vmem:[#allocation2 + $0x17] sm:$0x1]  ;;  %2526 = vmatprep.subr.bf16.mxu1 %v3669_v7 }
 0x525   : > { %2172 = vst [vmem:[#allocation3 + $0x2b] sm:$0x1] %v2171_v2  ;;  %2173 = vst [vmem:[#allocation3 + $0x2c] sm:$0x1] %v2171_v2  ;;  %v2180_v10 = vld [vmem:[#allocation2 + $0x18] sm:$0x1] }
 0x526   : > { %2175 = vst [vmem:[#allocation3 + $0x2d] sm:$0x1] %v2174_v5  ;;  %2176 = vst [vmem:[#allocation3 + $0x2e] sm:$0x1] %v2174_v5  ;;  %v2183_v11 = vld [vmem:[#allocation2 + $0x19] sm:$0x1] }
 0x527   : > { %2178 = vst [vmem:[#allocation3 + $0x2f] sm:$0x1] %v2177_v8  ;;  %2179 = vst [vmem:[#allocation3 + $0x30] sm:$0x1] %v2177_v8  ;;  %v2186_v12 = vld [vmem:[#allocation2 + $0x1a] sm:$0x1]  ;;  %2527 = vmatpush1.bf16.msra.mxu1 %v3667_v16 }
 0x528   : > { %2181 = vst [vmem:[#allocation3 + $0x31] sm:$0x1] %v2180_v10  ;;  %2182 = vst [vmem:[#allocation3 + $0x32] sm:$0x1] %v2180_v10  ;;  %v2189_v13 = vld [vmem:[#allocation2 + $0x1b] sm:$0x1]  ;;  %2528 = vmatprep.subr.bf16.mxu1 %v3672_v20 }
 0x529   : > { %2184 = vst [vmem:[#allocation3 + $0x33] sm:$0x1] %v2183_v11  ;;  %2185 = vst [vmem:[#allocation3 + $0x34] sm:$0x1] %v2183_v11  ;;  %v2192_v14 = vld [vmem:[#allocation2 + $0x1c] sm:$0x1] }
 0x52a   : > { %2187 = vst [vmem:[#allocation3 + $0x35] sm:$0x1] %v2186_v12  ;;  %2188 = vst [vmem:[#allocation3 + $0x36] sm:$0x1] %v2186_v12  ;;  %v2195_v15 = vld [vmem:[#allocation2 + $0x1d] sm:$0x1] }
 0x52b   : > { %2190 = vst [vmem:[#allocation3 + $0x37] sm:$0x1] %v2189_v13  ;;  %2191 = vst [vmem:[#allocation3 + $0x38] sm:$0x1] %v2189_v13  ;;  %v2198_v17 = vld [vmem:[#allocation2 + $0x1e] sm:$0x1]  ;;  %2529 = vmatpush1.bf16.msra.mxu1 %v3670_v23 }
 0x52c   : > { %2193 = vst [vmem:[#allocation3 + $0x39] sm:$0x1] %v2192_v14  ;;  %2194 = vst [vmem:[#allocation3 + $0x3a] sm:$0x1] %v2192_v14  ;;  %v2201_v19 = vld [vmem:[#allocation2 + $0x1f] sm:$0x1]  ;;  %2530 = vmatprep.subr.bf16.mxu1 %v3675_v25 }
 0x52d   : > { %2196 = vst [vmem:[#allocation3 + $0x3b] sm:$0x1] %v2195_v15  ;;  %2197 = vst [vmem:[#allocation3 + $0x3c] sm:$0x1] %v2195_v15  ;;  %v2208_v21 = vld [vmem:[#allocation3 + $0x10] sm:$0xff]  ;;  %v2209_v22 = vld [vmem:[#allocation3 + $0x18] sm:$0xff] }
 0x52e   : > { %2199 = vst [vmem:[#allocation3 + $0x3d] sm:$0x1] %v2198_v17  ;;  %2200 = vst [vmem:[#allocation3 + $0x3e] sm:$0x1] %v2198_v17  ;;  %v2215_v24 = vpack.c.bf16 %v2209_v22, %v2208_v21  ;;  %v2210_v29 = vld [vmem:[#allocation3 + $0x20] sm:$0xff]  ;;  %v2211_v30 = vld [vmem:[#allocation3 + $0x28] sm:$0xff] }
 0x52f   : > { %2202 = vst [vmem:[#allocation3 + $0x3f] sm:$0x1] %v2201_v19  ;;  %2203 = vst [vmem:[#allocation3 + $0x40] sm:$0x1] %v2201_v19  ;;  %2531 = vmatpush1.bf16.msra.mxu1 %v3673_v27  ;;  %v2216_v32 = vpack.c.bf16 %v2211_v30, %v2210_v29  ;;  %v3687_v40 = vld [vmem:[%s4600_s3 + $0x574] ss:$8 sps:$4 sm:$0xff]  }
 0x530   : > { %2358 = vmatmul.mubr.bf16.gmra.mrb[12].mxu1 %v2215_v24  ;;  %2532 = vmatprep.subr.bf16.mxu1 %v3678_v28  ;;  %v3685_v41 = vld [vmem:[%s4600_s3 + $0x570] ss:$8 sps:$4 sm:$0xff]   ;;  %v3690_v42 = vld [vmem:[%s4600_s3 + $0x584] ss:$8 sps:$4 sm:$0xff]   ;;  %v3688_v45 = vld [vmem:[%s4600_s3 + $0x580] ss:$8 sps:$4 sm:$0xff]  }
 0x531   : > { %2367 = vmatprep.mubr.bf16.mxu1 %v3796_v9  ;;  %v2415_v43 = vld [vmem:[#allocation3 + $0x1] sm:$0xff]  ;;  %v2416_v44 = vld [vmem:[#allocation3 + $0x9] sm:$0xff]  ;;  %v2417_v50 = vld [vmem:[#allocation3 + $0x11] sm:$0xff] }
 0x532   : > { %v2212_v36 = vld [vmem:[#allocation3 + $0x30] sm:$0xff]  ;;  %v2423_v46 = vpack.c.bf16 %v2416_v44, %v2415_v43  ;;  %v3696_v49 = vld [vmem:[%s4600_s3 + $0x5a4] ss:$8 sps:$4 sm:$0xff]   ;;  %v3694_v54 = vld [vmem:[%s4600_s3 + $0x5a0] ss:$8 sps:$4 sm:$0xff]  }
 0x533   : > { %2533 = vmatpush1.bf16.msra.mxu1 %v3676_v31  ;;  %v3693_v47 = vld [vmem:[%s4600_s3 + $0x594] ss:$8 sps:$4 sm:$0xff]   ;;  %v3691_v48 = vld [vmem:[%s4600_s3 + $0x590] ss:$8 sps:$4 sm:$0xff]   ;;  %v2418_v51 = vld [vmem:[#allocation3 + $0x19] sm:$0xff] }
 0x534   : > { %2534 = vmatprep.subr.bf16.mxu1 %v3681_v33  ;;  %v2424_v55 = vpack.c.bf16 %v2418_v51, %v2417_v50  ;;  %v3699_v56 = vld [vmem:[%s4600_s3 + $0x5b4] ss:$8 sps:$4 sm:$0xff]   ;;  %v3697_v57 = vld [vmem:[%s4600_s3 + $0x5b0] ss:$8 sps:$4 sm:$0xff]   ;;  %v3702_v58 = vld [vmem:[%s4600_s3 + $0x5c4] ss:$8 sps:$4 sm:$0xff]  }
 0x535   : > { %v2419_v60 = vld [vmem:[#allocation3 + $0x21] sm:$0xff]  ;;  %v2420_v61 = vld [vmem:[#allocation3 + $0x29] sm:$0xff]  ;;  %v2421_v3 = vld [vmem:[#allocation3 + $0x31] sm:$0xff] }
 0x536   : > { %v2213_v37 = vld [vmem:[#allocation3 + $0x38] sm:$0xff]  ;;  %v2425_v18 = vpack.c.bf16 %v2420_v61, %v2419_v60  ;;  %v3705_v0 = vld [vmem:[%s4600_s3 + $0x5d4] ss:$8 sps:$4 sm:$0xff]   ;;  %v3703_v1 = vld [vmem:[%s4600_s3 + $0x5d0] ss:$8 sps:$4 sm:$0xff]  }
 0x537   : > { %2535 = vmatpush1.bf16.msra.mxu1 %v3679_v34  ;;  %v2217_v39 = vpack.c.bf16 %v2213_v37, %v2212_v36  ;;  %v3700_v62 = vld [vmem:[%s4600_s3 + $0x5c0] ss:$8 sps:$4 sm:$0xff]   ;;  %v3708_v53 = vld [vmem:[%s4600_s3 + $0x5e4] ss:$8 sps:$4 sm:$0xff]   ;;  %v3711_v2 = vld [vmem:[%s4600_s3 + $0x5f4] ss:$8 sps:$4 sm:$0xff]  }
 0x538   : > { %2368 = vmatmul.mubr.bf16.gmra.mrb[16].mxu1 %v2216_v32  ;;  %2536 = vmatprep.subr.bf16.mxu1 %v3684_v35  ;;  %v2422_v4 = vld [vmem:[#allocation3 + $0x39] sm:$0xff]  ;;  %v3709_v5 = vld [vmem:[%s4600_s3 + $0x5f0] ss:$8 sps:$4 sm:$0xff]  }
 0x539   : > { %2377 = vmatprep.mubr.bf16.mxu1 %v3796_v9  ;;  %v3706_v59 = vld [vmem:[%s4600_s3 + $0x5e0] ss:$8 sps:$4 sm:$0xff]   ;;  %v2426_v63 = vpack.c.bf16 %v2422_v4, %v2421_v3  ;;  %v2614_v6 = vld [vmem:[#allocation3 + $0xa] sm:$0xff]  ;;  %v3220_v20 = vld [vmem:[%s4601_s4 + $0x6] sm:$0x3] }
 0x53a   : > { %v2613_v7 = vld [vmem:[#allocation3 + $0x2] sm:$0xff]  ;;  %v2616_v10 = vld [vmem:[#allocation3 + $0x1a] sm:$0xff]  ;;  %v2615_v11 = vld [vmem:[#allocation3 + $0x12] sm:$0xff]  ;;  %v2396_v21 = vrot.slane %v3220_v20, %v3990_v52  ;;  %v2392_v61 = vrot.slane %v3220_v20, %v3889_v26 }
 0x53b   : > { %2537 = vmatpush1.bf16.msra.mxu1 %v3682_v38  ;;  %v2621_v8 = vpack.c.bf16 %v2614_v6, %v2613_v7  ;;  %v2622_v12 = vpack.c.bf16 %v2616_v10, %v2615_v11  ;;  %v2618_v13 = vld [vmem:[#allocation3 + $0x2a] sm:$0xff]  ;;  %v2617_v14 = vld [vmem:[#allocation3 + $0x22] sm:$0xff]  ;;  %v2619_v16 = vld [vmem:[#allocation3 + $0x32] sm:$0xff] }
 0x53c   : > { %2538 = vmatprep.subr.bf16.mxu1 %v3687_v40  ;;  %v2623_v15 = vpack.c.bf16 %v2618_v13, %v2617_v14  ;;  %v2620_v17 = vld [vmem:[#allocation3 + $0x3a] sm:$0xff] }
 0x53d   : > { %v2624_v19 = vpack.c.bf16 %v2620_v17, %v2619_v16 }
 0x53f   : > { %2539 = vmatpush1.bf16.msra.mxu1 %v3685_v41 }
 0x540   : > { %2378 = vmatmul.mubr.bf16.gmra.mrb[20].mxu1 %v2217_v39  ;;  %2722 = vmatprep.subr.bf16.mxu1 %v3690_v42 }
 0x541   : > { %2556 = vmatprep.mubr.bf16.mxu1 %v3796_v9 }
 0x548   : > { %2557 = vmatmul.mubr.bf16.vlgmr.msra.gmra.mrb[8].mxu1 %v2423_v46 }
 0x549   : > { %2723 = vmatpush1.bf16.msra.mxu1 %v3688_v45  ;;  %2566 = vmatprep.mubr.bf16.mxu1 %v3796_v9 }
 0x54a   : > { %2724 = vmatprep.subr.bf16.mxu1 %v3693_v47 }
 0x54d   : > { %2725 = vmatpush1.bf16.msra.mxu1 %v3691_v48 }
 0x54e   : > { %2726 = vmatprep.subr.bf16.mxu1 %v3696_v49 }
 0x550   : > { %2567 = vmatmul.mubr.bf16.gmra.mrb[12].mxu1 %v2424_v55 }
 0x551   : > { %2727 = vmatpush1.bf16.msra.mxu1 %v3694_v54  ;;  %2576 = vmatprep.mubr.bf16.mxu1 %v3796_v9 }
 0x552   : > { %2728 = vmatprep.subr.bf16.mxu1 %v3699_v56 }
 0x555   : > { %2729 = vmatpush1.bf16.msra.mxu1 %v3697_v57 }
 0x556   : > { %2730 = vmatprep.subr.bf16.mxu1 %v3702_v58 }
 0x558   : > { %2577 = vmatmul.mubr.bf16.gmra.mrb[16].mxu1 %v2425_v18 }
 0x559   : > { %2731 = vmatpush1.bf16.msra.mxu1 %v3700_v62  ;;  %2586 = vmatprep.mubr.bf16.mxu1 %v3796_v9 }
 0x55a   : > { %2732 = vmatprep.subr.bf16.mxu1 %v3705_v0 }
 0x55d   : > { %2733 = vmatpush1.bf16.msra.mxu1 %v3703_v1 }
 0x55e   : > { %2734 = vmatprep.subr.bf16.mxu1 %v3708_v53 }
 0x560   : > { %2587 = vmatmul.mubr.bf16.gmra.mrb[20].mxu1 %v2426_v63 }
 0x561   : > { %2735 = vmatpush1.bf16.msra.mxu1 %v3706_v59  ;;  %2754 = vmatprep.mubr.bf16.mxu1 %v3796_v9 }
 0x562   : > { %2736 = vmatprep.subr.bf16.mxu1 %v3711_v2 }
 0x565   : > { %2737 = vmatpush1.bf16.msra.mxu1 %v3709_v5 }
 0x568   : > { %2755 = vmatmul.mubr.bf16.vlgmr.msra.gmra.mrb[8].mxu1 %v2621_v8 }
 0x569   : > { %2764 = vmatprep.mubr.bf16.mxu1 %v3796_v9 }
 0x570   : > { %2765 = vmatmul.mubr.bf16.gmra.mrb[12].mxu1 %v2622_v12 }
 0x571   : > { %2774 = vmatprep.mubr.bf16.mxu1 %v3796_v9 }
 0x578   : > { %2775 = vmatmul.mubr.bf16.gmra.mrb[16].mxu1 %v2623_v15 }
 0x579   : > { %2784 = vmatprep.mubr.bf16.mxu1 %v3796_v9 }
 0x580   : > { %2785 = vmatmul.mubr.bf16.gmra.mrb[20].mxu1 %v2624_v19 }
 0x63b   : > { %v2756_v22 = vpop.f32.mrb[8].mxu1 }
 0x63c   : > { %v2758_v23 = vpop.f32.mrb[9].mxu1  ;;  %v3334_v63 = vadd.f32 %v2756_v22, %v2392_v61 }
 0x63d   : > { %v3335_v24 = vadd.f32 %v2758_v23, %v2396_v21  ;;  %v2760_v25 = vpop.f32.mrb[10].mxu1 }
 0x63e   : > { %v2762_v27 = vpop.f32.mrb[11].mxu1  ;;  %v3336_v7 = vadd.f32 %v2760_v25, %v2392_v61 }
 0x63f   : > { %v2811_v28 = vsub.f32 0.0, %v3335_v24  ;;  %v3337_v29 = vadd.f32 %v2762_v27, %v2396_v21 }
 0x641   : > { %v2819_v30 = vmul.f32 1.442695, %v2811_v28  ;;  %v2812_v31 = vsub.f32 0.0, %v3337_v29 }
 0x643   : > { %3756 = vpow2.f32 %v2819_v30  ;;  %v2821_v9 = vmul.f32 1.442695, %v2812_v31  ;;  %v4567_v32 = vpop.f32.mrb[12].mxu1 }
 0x644   : > { %v2768_v33 = vpop.f32.mrb[13].mxu1  ;;  %v3338_v16 = vadd.f32 %v4567_v32, %v2392_v61 }
 0x645   : > { %3758 = vpow2.f32 %v2821_v9  ;;  %v3339_v34 = vadd.f32 %v2768_v33, %v2396_v21  ;;  %v4569_v35 = vpop.f32.mrb[14].mxu1 }
 0x646   : > { %v2772_v36 = vpop.f32.mrb[15].mxu1  ;;  %v3340_v20 = vadd.f32 %v4569_v35, %v2392_v61 }
 0x647   : > { %v2813_v52 = vsub.f32 0.0, %v3339_v34  ;;  %v3341_v37 = vadd.f32 %v2772_v36, %v2396_v21 }
 0x649   : > { %v2823_v38 = vmul.f32 1.442695, %v2813_v52  ;;  %v2814_v39 = vsub.f32 0.0, %v3341_v37 }
 0x64b   : > { %3760 = vpow2.f32 %v2823_v38  ;;  %v2825_v40 = vmul.f32 1.442695, %v2814_v39  ;;  %v4571_v41 = vpop.f32.mrb[16].mxu1 }
 0x64c   : > { %v2778_v42 = vpop.f32.mrb[17].mxu1  ;;  %v3342_v28 = vadd.f32 %v4571_v41, %v2392_v61 }
 0x64d   : > { %v3757_v43 = vpop.eup %3756  ;;  %3762 = vpow2.f32 %v2825_v40  ;;  %v3343_v44 = vadd.f32 %v2778_v42, %v2396_v21  ;;  %v4573_v45 = vpop.f32.mrb[18].mxu1 }
 0x64e   : > { %v2835_v46 = vadd.f32 1.0, %v3757_v43  ;;  %v2782_v47 = vpop.f32.mrb[19].mxu1  ;;  %v3344_v31 = vadd.f32 %v4573_v45, %v2392_v61 }
 0x64f   : > { %v3759_v48 = vpop.eup %3758  ;;  %v2815_v49 = vsub.f32 0.0, %v3343_v44  ;;  %v3345_v50 = vadd.f32 %v2782_v47, %v2396_v21 }
 0x650   : > { %3764 = vrcp.f32 %v2835_v46  ;;  %v2836_v51 = vadd.f32 1.0, %v3759_v48 }
 0x651   : > { %v2827_v54 = vmul.f32 1.442695, %v2815_v49  ;;  %v2816_v55 = vsub.f32 0.0, %v3345_v50 }
 0x652   : > { %3766 = vrcp.f32 %v2836_v51 }
 0x653   : > { %3768 = vpow2.f32 %v2827_v54  ;;  %v2829_v56 = vmul.f32 1.442695, %v2816_v55  ;;  %v2786_v57 = vpop.f32.mrb[20].mxu1 }
 0x654   : > { %v2788_v58 = vpop.f32.mrb[21].mxu1  ;;  %v3346_v33 = vadd.f32 %v2786_v57, %v2392_v61 }
 0x655   : > { %v3761_v60 = vpop.eup %3760  ;;  %3770 = vpow2.f32 %v2829_v56  ;;  %v3347_v62 = vadd.f32 %v2788_v58, %v2396_v21  ;;  %v2790_v18 = vpop.f32.mrb[22].mxu1 }
 0x656   : > { %v2837_v0 = vadd.f32 1.0, %v3761_v60  ;;  %v2792_v1 = vpop.f32.mrb[23].mxu1  ;;  %v3348_v36 = vadd.f32 %v2790_v18, %v2392_v61 }
 0x657   : > { %v3763_v53 = vpop.eup %3762  ;;  %v2817_v3 = vsub.f32 0.0, %v3347_v62  ;;  %v3349_v4 = vadd.f32 %v2792_v1, %v2396_v21 }
 0x658   : > { %3772 = vrcp.f32 %v2837_v0  ;;  %v2838_v59 = vadd.f32 1.0, %v3763_v53 }
 0x659   : > { %v2831_v2 = vmul.f32 1.442695, %v2817_v3  ;;  %v2818_v5 = vsub.f32 0.0, %v3349_v4 }
 0x65a   : > { %v3765_v6 = vpop.eup %3764  ;;  %3774 = vrcp.f32 %v2838_v59 }
 0x65b   : > { %v2851_v26 = vmul.f32 %v3765_v6, %v3334_v63  ;;  %3776 = vpow2.f32 %v2831_v2  ;;  %v2833_v8 = vmul.f32 1.442695, %v2818_v5 }
 0x65c   : > { %v3767_v10 = vpop.eup %3766 }
 0x65d   : > { %v3769_v11 = vpop.eup %3768  ;;  %2859 = vst [vmem:[%s4580_s14] sm:$0xff] %v2851_v26  ;;  %v2852_v12 = vmul.f32 %v3767_v10, %v3336_v7  ;;  %3778 = vpow2.f32 %v2833_v8 }
 0x65e   : > { %v2839_v13 = vadd.f32 1.0, %v3769_v11 }
 0x65f   : > { %v3771_v14 = vpop.eup %3770  ;;  %2860 = vst [vmem:[%s4580_s14 + $0x8] sm:$0xff] %v2852_v12 }
 0x660   : > { %3780 = vrcp.f32 %v2839_v13  ;;  %v2840_v15 = vadd.f32 1.0, %v3771_v14 }
 0x662   : > { %v3773_v17 = vpop.eup %3772  ;;  %3782 = vrcp.f32 %v2840_v15 }
 0x663   : > { %v2853_v19 = vmul.f32 %v3773_v17, %v3338_v16 }
 0x664   : > { %v3775_v21 = vpop.eup %3774 }
 0x665   : > { %v3777_v22 = vpop.eup %3776  ;;  %2861 = vst [vmem:[%s4580_s14 + $0x10] sm:$0xff] %v2853_v19  ;;  %v2854_v23 = vmul.f32 %v3775_v21, %v3340_v20 }
 0x666   : > { %v2841_v24 = vadd.f32 1.0, %v3777_v22 }
 0x667   : > { %v3779_v25 = vpop.eup %3778  ;;  %2862 = vst [vmem:[%s4580_s14 + $0x18] sm:$0xff] %v2854_v23 }
 0x668   : > { %3784 = vrcp.f32 %v2841_v24  ;;  %v2842_v27 = vadd.f32 1.0, %v3779_v25 }
 0x66a   : > { %v3781_v29 = vpop.eup %3780  ;;  %3786 = vrcp.f32 %v2842_v27 }
 0x66b   : > { %v2855_v30 = vmul.f32 %v3781_v29, %v3342_v28 }
 0x66c   : > { %v3783_v9 = vpop.eup %3782 }
 0x66d   : > { %2863 = vst [vmem:[%s4580_s14 + $0x20] sm:$0xff] %v2855_v30  ;;  %v2856_v32 = vmul.f32 %v3783_v9, %v3344_v31 }
 0x66f   : > { %2864 = vst [vmem:[%s4580_s14 + $0x28] sm:$0xff] %v2856_v32 }
 0x672   : > { %v3785_v34 = vpop.eup %3784 }
 0x673   : > { %v2857_v35 = vmul.f32 %v3785_v34, %v3346_v33 }
 0x674   : > { %v3787_v52 = vpop.eup %3786 }
 0x675   : > { %2865 = vst [vmem:[%s4580_s14 + $0x30] sm:$0xff] %v2857_v35  ;;  %v2858_v37 = vmul.f32 %v3787_v52, %v3348_v36 }
 0x677   : > { %2866 = vst [vmem:[%s4580_s14 + $0x38] sm:$0xff] %v2858_v37 }
 0x678 PF: > { %s15_s18 = sadd.s32 1, %s3794_s18  }
 0x679   : > { %p12_p4 = scmp.ge.s32.totalorder %s15_s18, 4  }
 0x67b   :  { %14 = sbr.rel (!%p12_p4) target bundleno = 1 (0x1), region = 84 }

</bundles_post_ra>
